<compile_context>
chip_gen: v7x
topology: tpu7x:2x2x1
jax: 0.10.0
libtpu: 0.0.40
codegen_flags: <defaults>
</compile_context>

<pallas_src>
import functools

import jax
import jax.numpy as jnp
from jax.experimental import pallas as pl
from jax.experimental.pallas import tpu as pltpu

LANES = 128          # output-channel lane padding (dense vst) and K-pad granule
BN_EPS = 1e-5


def _round_up(x, m):
    return (x + m - 1) // m * m


# --------------------------------------------------------------------------
# Pallas kernels
# --------------------------------------------------------------------------
def _conv_stage_kernel(x_ref, w_ref, shift_ref, o_ref):
    """Fused Conv2d + BatchNorm(eval) + ReLU for one TR-row output chunk.

    x_ref:     (G, TR, Kp)   bf16  packed LHS, one tap-group per leading index
    w_ref:     (G, Kp, 128)  bf16  folded per-group weights (BN scale folded)
    shift_ref: (1, 128)      f32   (conv_bias - running_mean) * scale + beta
    o_ref:     (TR, 128)     bf16
    """
    n_groups = x_ref.shape[0]
    acc = jnp.dot(x_ref[0], w_ref[0], preferred_element_type=jnp.float32)
    for g in range(1, n_groups):          # register accumulation, no VMEM RMW
        acc = acc + jnp.dot(x_ref[g], w_ref[g], preferred_element_type=jnp.float32)
    o_ref[...] = jnp.maximum(acc + shift_ref[...], 0.0).astype(o_ref.dtype)


def _head_kernel(x_ref, w_ref, shift_ref, fcw_ref, fcb_ref, o_ref, *,
                 n_valid, inv_count):
    """conv5 + BN + ReLU fused with AdaptiveAvgPool2d((1,1)) + Linear (1 image).

    x_ref:   (G, P, Kp)  bf16   P = oh*ow padded to a multiple of 8
    fcw_ref: (128, C)    f32    fcb_ref: (1, C) f32
    o_ref:   (1, 1, C)   f32    logits for this image
    """
    n_groups = x_ref.shape[0]
    acc = jnp.dot(x_ref[0], w_ref[0], preferred_element_type=jnp.float32)
    for g in range(1, n_groups):
        acc = acc + jnp.dot(x_ref[g], w_ref[g], preferred_element_type=jnp.float32)
    y = jnp.maximum(acc + shift_ref[...], 0.0)                       # (P, 128) f32
    pooled = jnp.sum(y[:n_valid], axis=0, keepdims=True) * inv_count  # (1, 128)
    o_ref[0] = (jnp.dot(pooled, fcw_ref[...], preferred_element_type=jnp.float32)
                + fcb_ref[...])


# --------------------------------------------------------------------------
# Host-side packing / weight folding (XLA glue, O(activation) only)
# --------------------------------------------------------------------------
def _conv_geometry(h, w, kh, kw, stride, padding, dilation):
    hp, wp = h + 2 * padding, w + 2 * padding
    oh = (hp - dilation * (kh - 1) - 1) // stride + 1
    ow = (wp - dilation * (kw - 1) - 1) // stride + 1
    return hp, wp, oh, ow


def _pack_lhs(a, cin, kh, kw, stride, padding, dilation, rows_per_group):
    """Grouped-im2col LHS built directly at output resolution.

    a: (N, H, W, C>=cin) channels-last activation, real channels in [:cin].
    Returns ((G, N, oh, ow, Kp) bf16, oh, ow): one tap-group (rows_per_group
    kernel rows x kw column taps x cin channels, zero-padded to Kp lanes) per
    leading index.  The stride is folded into the gather, so only valid
    strided output positions are ever materialized / computed.
    """
    n, h, w = a.shape[:3]
    _, _, oh, ow = _conv_geometry(h, w, kh, kw, stride, padding, dilation)
    ap = jnp.pad(a[..., :cin].astype(jnp.bfloat16),
                 ((0, 0), (padding, padding), (padding, padding), (0, 0)))
    n_groups = -(-kh // rows_per_group)
    k_real = rows_per_group * kw * cin
    kp = _round_up(k_real, LANES)
    groups = []
    for g in range(n_groups):
        taps = []
        for r in range(rows_per_group):
            i = g * rows_per_group + r
            for j in range(kw):
                if i < kh:
                    y0, x0 = i * dilation, j * dilation
                    taps.append(ap[:, y0:y0 + (oh - 1) * stride + 1:stride,
                                   x0:x0 + (ow - 1) * stride + 1:stride, :])
                else:  # phantom kernel row when rows_per_group does not divide kh
                    taps.append(jnp.zeros((n, oh, ow, cin), jnp.bfloat16))
        grp = jnp.concatenate(taps, axis=-1)                 # (N, oh, ow, k_real)
        groups.append(jnp.pad(grp, ((0, 0), (0, 0), (0, 0), (0, kp - k_real))))
    return jnp.stack(groups, axis=0), oh, ow                 # (G, N, oh, ow, Kp)


def _fold_weights(w, b, bn, rows_per_group, kp):
    """Fold BN(eval) into the conv weight; emit (G, Kp, 128) bf16 + (1,128) f32."""
    gamma, beta, mean, var = bn
    cout, cin, kh, kw = w.shape
    inv_std = gamma / jnp.sqrt(var + BN_EPS)
    wf = (w * inv_std[:, None, None, None]).transpose(2, 3, 1, 0)  # (kh, kw, cin, cout)
    wf = wf.reshape(kh, kw * cin, cout)                            # lane = j*cin + c
    n_groups = -(-kh // rows_per_group)
    if n_groups * rows_per_group != kh:
        wf = jnp.pad(wf, ((0, n_groups * rows_per_group - kh), (0, 0), (0, 0)))
    wf = wf.reshape(n_groups, rows_per_group * kw * cin, cout)
    wf = jnp.pad(wf, ((0, 0), (0, kp - rows_per_group * kw * cin), (0, LANES - cout)))
    shift = (b - mean) * inv_std + beta
    shift = jnp.pad(shift, (0, LANES - cout)).reshape(1, LANES).astype(jnp.float32)
    return wf.astype(jnp.bfloat16), shift


def _rows_per_group(kh, kw, cin):
    """Pack as many whole kernel rows into one <=128-lane K group as possible."""
    return max(1, min(kh, LANES // (kw * cin)))


_MOSAIC_PARAMS = pltpu.CompilerParams(
    dimension_semantics=("parallel",),          # shards row/batch grid over TCs (v7x)
    vmem_limit_bytes=32 * 1024 * 1024,
)


# --------------------------------------------------------------------------
# Stage wrappers
# --------------------------------------------------------------------------
def conv_bn_relu_stage(a, p, *, stride, padding, dilation, max_rows_per_block=256):
    """One Conv2d + BatchNorm(eval) + ReLU stage.

    a: (N, H, W, C) bf16 channels-last -> (N, OH, OW, 128) bf16 (real channels
    in the first Cout lanes, remaining lanes exactly zero).
    """
    w = p["w"]
    cout, cin, kh, kw = w.shape
    rpg = _rows_per_group(kh, kw, cin)
    lhs, oh, ow = _pack_lhs(a, cin, kh, kw, stride, padding, dilation, rpg)
    n = a.shape[0]
    n_groups, kp = lhs.shape[0], lhs.shape[-1]
    rows = n * oh * ow
    tr = min(max_rows_per_block, _round_up(rows, 8))
    rows_p = _round_up(rows, tr)
    lhs = jnp.pad(lhs.reshape(n_groups, rows, kp), ((0, 0), (0, rows_p - rows), (0, 0)))
    wt, shift = _fold_weights(w, p["b"], p["bn"], rpg, kp)

    out = pl.pallas_call(
        _conv_stage_kernel,
        out_shape=jax.ShapeDtypeStruct((rows_p, LANES), jnp.bfloat16),
        grid_spec=pltpu.PrefetchScalarGridSpec(
            num_scalar_prefetch=0,
            grid=(rows_p // tr,),
            in_specs=[
                pl.BlockSpec((n_groups, tr, kp), lambda r: (0, r, 0)),
                pl.BlockSpec((n_groups, kp, LANES), lambda r: (0, 0, 0)),
                pl.BlockSpec((1, LANES), lambda r: (0, 0)),
            ],
            out_specs=pl.BlockSpec((tr, LANES), lambda r: (r, 0)),
        ),
        compiler_params=_MOSAIC_PARAMS,
    )(lhs, wt, shift)
    return out[:rows].reshape(n, oh, ow, LANES)


def conv_head_stage(a, p, fc, *, stride, padding, dilation):
    """conv5 + BN + ReLU fused with AdaptiveAvgPool2d((1,1)) + Flatten + Linear."""
    # TODO(synk): Dropout(p=0.3) is identity in eval mode; training-mode dropout
    # (RNG masking) is not implemented.
    w = p["w"]
    cout, cin, kh, kw = w.shape
    rpg = _rows_per_group(kh, kw, cin)
    lhs, oh, ow = _pack_lhs(a, cin, kh, kw, stride, padding, dilation, rpg)
    n = a.shape[0]
    n_groups, kp = lhs.shape[0], lhs.shape[-1]
    pos = oh * ow
    pos_p = _round_up(pos, 8)
    lhs = jnp.pad(lhs.reshape(n_groups, n, pos, kp),
                  ((0, 0), (0, 0), (0, pos_p - pos), (0, 0)))
    lhs = lhs.reshape(n_groups, n * pos_p, kp)     # image b occupies rows [b*pos_p, ...)
    wt, shift = _fold_weights(w, p["b"], p["bn"], rpg, kp)

    num_classes = fc["w"].shape[0]
    fcw = fc["w"].T.astype(jnp.float32)                       # (128, num_classes)
    fcb = fc["b"].reshape(1, num_classes).astype(jnp.float32)

    kern = functools.partial(_head_kernel, n_valid=pos, inv_count=1.0 / pos)
    out = pl.pallas_call(
        kern,
        out_shape=jax.ShapeDtypeStruct((n, 1, num_classes), jnp.float32),
        grid_spec=pltpu.PrefetchScalarGridSpec(
            num_scalar_prefetch=0,
            grid=(n,),
            in_specs=[
                pl.BlockSpec((n_groups, pos_p, kp), lambda b: (0, b, 0)),
                pl.BlockSpec((n_groups, kp, LANES), lambda b: (0, 0, 0)),
                pl.BlockSpec((1, LANES), lambda b: (0, 0)),
                pl.BlockSpec((LANES, num_classes), lambda b: (0, 0)),
                pl.BlockSpec((1, num_classes), lambda b: (0, 0)),
            ],
            out_specs=pl.BlockSpec((1, 1, num_classes), lambda b: (b, 0, 0)),
        ),
        compiler_params=_MOSAIC_PARAMS,
    )(lhs, wt, shift, fcw, fcb)
    return out.reshape(n, num_classes)


def wdm_classifier_tiny(x, params):
    """Forward pass of WDMClassifierTiny (eval mode). x: (N, Cin, H, W) NCHW f32."""
    a = x.transpose(0, 2, 3, 1).astype(jnp.bfloat16)   # NHWC + bf16 once, at the boundary
    a = conv_bn_relu_stage(a, params["conv1"], stride=1, padding=1, dilation=1)
    a = conv_bn_relu_stage(a, params["conv2"], stride=1, padding=1, dilation=1)
    a = conv_bn_relu_stage(a, params["conv3"], stride=2, padding=1, dilation=1)
    a = conv_bn_relu_stage(a, params["conv4"], stride=1, padding=2, dilation=2)
    return conv_head_stage(a, params["conv5"], params["fc"],
                           stride=2, padding=1, dilation=1)


# --------------------------------------------------------------------------
# Deterministic parameter initialization (shapes from the nn.Module __init__)
# --------------------------------------------------------------------------
def init_params(key, in_channels=1, num_classes=1):
    def conv_block(k, cout, cin, ks):
        ks_keys = jax.random.split(k, 6)
        w = 0.1 * jax.random.normal(ks_keys[0], (cout, cin, ks, ks), jnp.float32)
        b = 0.1 * jax.random.normal(ks_keys[1], (cout,), jnp.float32)
        gamma = 1.0 + 0.1 * jax.random.normal(ks_keys[2], (cout,), jnp.float32)
        beta = 0.1 * jax.random.normal(ks_keys[3], (cout,), jnp.float32)
        mean = 0.1 * jax.random.normal(ks_keys[4], (cout,), jnp.float32)
        var = 0.5 + jax.random.uniform(ks_keys[5], (cout,), jnp.float32)
        return dict(w=w, b=b, bn=(gamma, beta, mean, var))

    keys = jax.random.split(key, 6)
    params = {
        "conv1": conv_block(keys[0], 16, in_channels, 5),
        "conv2": conv_block(keys[1], 32, 16, 5),
        "conv3": conv_block(keys[2], 64, 32, 3),
        "conv4": conv_block(keys[3], 64, 64, 3),
        "conv5": conv_block(keys[4], 128, 64, 3),
    }
    kf1, kf2 = jax.random.split(keys[5])
    params["fc"] = dict(
        w=0.1 * jax.random.normal(kf1, (num_classes, 128), jnp.float32),
        b=0.1 * jax.random.normal(kf2, (num_classes,), jnp.float32),
    )
    return params


# --------------------------------------------------------------------------
if __name__ == "__main__":
    key = jax.random.PRNGKey(0)
    kx, kparams = jax.random.split(key)

    # small input consistent with the module: N=2, C_in=1, H=W=16
    x = jax.random.normal(kx, (2, 1, 16, 16), jnp.float32)
    params = init_params(kparams)

    fwd = jax.jit(wdm_classifier_tiny)
    out = jax.block_until_ready(fwd(x, params))

    assert out.shape == (2, 1), out.shape
    assert bool(jnp.all(jnp.isfinite(out)))
    print("KERNEL_OK")
</pallas_src>

<mosaic_0001>
module attributes {stable_mosaic.version = 11 : i64} {
  func.func @_conv_stage_kernel(%arg0: i32, %arg1: memref<1x256x128xbf16, #tpu.memory_space<vmem>>, %arg2: memref<1x128x128xbf16, #tpu.memory_space<vmem>>, %arg3: memref<1x128xf32, #tpu.memory_space<vmem>>, %arg4: memref<256x128xbf16, #tpu.memory_space<vmem>>) attributes {dimension_semantics = [#tpu.dimension_semantics<parallel>], iteration_bounds = array<i64: 2>, scalar_prefetch = 0 : i64, scratch_operands = 0 : i64, tpu.core_type = #tpu.core_type<tc>, window_params = [{transform_indices = @transform_0, window_bounds = array<i64: 1, 256, 128>}, {pipeline_mode = #tpu.pipeline_mode<synchronous>, transform_indices = @transform_1, window_bounds = array<i64: 1, 128, 128>}, {pipeline_mode = #tpu.pipeline_mode<synchronous>, transform_indices = @transform_2, window_bounds = array<i64: 1, 128>}, {transform_indices = @transform_3, window_bounds = array<i64: 256, 128>}]} {
    %c0 = arith.constant 0 : index
    %c0_0 = arith.constant 0 : index
    %c0_1 = arith.constant 0 : index
    %0 = vector.load %arg1[%c0, %c0_0, %c0_1] : memref<1x256x128xbf16, #tpu.memory_space<vmem>>, vector<1x256x128xbf16>
    %1 = vector.shape_cast %0 : vector<1x256x128xbf16> to vector<256x128xbf16>
    %c0_2 = arith.constant 0 : index
    %c0_3 = arith.constant 0 : index
    %c0_4 = arith.constant 0 : index
    %2 = vector.load %arg2[%c0_2, %c0_3, %c0_4] : memref<1x128x128xbf16, #tpu.memory_space<vmem>>, vector<1x128x128xbf16>
    %3 = vector.shape_cast %2 : vector<1x128x128xbf16> to vector<128x128xbf16>
    %cst = arith.constant dense<0.000000e+00> : vector<256x128xf32>
    %4 = tpu.matmul %1, %3, %cst {dimension_numbers = #tpu.dot_dimension_numbers<[1], [0], [0], [1], [0, 0, 1, 1], [], []>} : vector<256x128xbf16>, vector<128x128xbf16>, vector<256x128xf32> -> vector<256x128xf32>
    %c0_5 = arith.constant 0 : index
    %c0_6 = arith.constant 0 : index
    %5 = vector.load %arg3[%c0_5, %c0_6] : memref<1x128xf32, #tpu.memory_space<vmem>>, vector<1x128xf32>
    %6 = vector.broadcast %5 : vector<1x128xf32> to vector<256x128xf32>
    %7 = arith.addf %4, %6 : vector<256x128xf32>
    %cst_7 = arith.constant 0.000000e+00 : f32
    %8 = vector.broadcast %cst_7 : f32 to vector<256x128xf32>
    %9 = arith.maximumf %7, %8 : vector<256x128xf32>
    %10 = arith.truncf %9 : vector<256x128xf32> to vector<256x128xbf16>
    %c0_8 = arith.constant 0 : index
    %c0_9 = arith.constant 0 : index
    %11 = vector.load %arg4[%c0_8, %c0_9] : memref<256x128xbf16, #tpu.memory_space<vmem>>, vector<256x128xbf16>
    tpu.vector_store %arg4[%c0_8, %c0_9], %10 {strides = array<i32>} : memref<256x128xbf16, #tpu.memory_space<vmem>>, vector<256x128xbf16>,
    return
  }
  func.func @transform_0(%arg0: i32) -> (i32, i32, i32) {
    %c0_i32 = arith.constant 0 : i32
    %c0_i32_0 = arith.constant 0 : i32
    %c0_i32_1 = arith.constant 0 : i32
    return %c0_i32, %arg0, %c0_i32_0 : i32, i32, i32
  }
  func.func @transform_1(%arg0: i32) -> (i32, i32, i32) {
    %c0_i32 = arith.constant 0 : i32
    %c0_i32_0 = arith.constant 0 : i32
    %c0_i32_1 = arith.constant 0 : i32
    %c0_i32_2 = arith.constant 0 : i32
    return %c0_i32, %c0_i32_0, %c0_i32_1 : i32, i32, i32
  }
  func.func @transform_2(%arg0: i32) -> (i32, i32) {
    %c0_i32 = arith.constant 0 : i32
    %c0_i32_0 = arith.constant 0 : i32
    %c0_i32_1 = arith.constant 0 : i32
    return %c0_i32, %c0_i32_0 : i32, i32
  }
  func.func @transform_3(%arg0: i32) -> (i32, i32) {
    %c0_i32 = arith.constant 0 : i32
    %c0_i32_0 = arith.constant 0 : i32
    return %arg0, %c0_i32 : i32, i32
  }
}

module attributes {stable_mosaic.version = 11 : i64} {
  func.func @_conv_stage_kernel(%arg0: i32, %arg1: memref<5x256x128xbf16, #tpu.memory_space<vmem>>, %arg2: memref<5x128x128xbf16, #tpu.memory_space<vmem>>, %arg3: memref<1x128xf32, #tpu.memory_space<vmem>>, %arg4: memref<256x128xbf16, #tpu.memory_space<vmem>>) attributes {dimension_semantics = [#tpu.dimension_semantics<parallel>], iteration_bounds = array<i64: 2>, scalar_prefetch = 0 : i64, scratch_operands = 0 : i64, tpu.core_type = #tpu.core_type<tc>, window_params = [{transform_indices = @transform_0, window_bounds = array<i64: 5, 256, 128>}, {pipeline_mode = #tpu.pipeline_mode<synchronous>, transform_indices = @transform_1, window_bounds = array<i64: 5, 128, 128>}, {pipeline_mode = #tpu.pipeline_mode<synchronous>, transform_indices = @transform_2, window_bounds = array<i64: 1, 128>}, {transform_indices = @transform_3, window_bounds = array<i64: 256, 128>}]} {
    %c0 = arith.constant 0 : index
    %c0_0 = arith.constant 0 : index
    %c0_1 = arith.constant 0 : index
    %0 = vector.load %arg1[%c0, %c0_0, %c0_1] : memref<5x256x128xbf16, #tpu.memory_space<vmem>>, vector<1x256x128xbf16>
    %1 = vector.shape_cast %0 : vector<1x256x128xbf16> to vector<256x128xbf16>
    %c0_2 = arith.constant 0 : index
    %c0_3 = arith.constant 0 : index
    %c0_4 = arith.constant 0 : index
    %2 = vector.load %arg2[%c0_2, %c0_3, %c0_4] : memref<5x128x128xbf16, #tpu.memory_space<vmem>>, vector<1x128x128xbf16>
    %3 = vector.shape_cast %2 : vector<1x128x128xbf16> to vector<128x128xbf16>
    %cst = arith.constant dense<0.000000e+00> : vector<256x128xf32>
    %4 = tpu.matmul %1, %3, %cst {dimension_numbers = #tpu.dot_dimension_numbers<[1], [0], [0], [1], [0, 0, 1, 1], [], []>} : vector<256x128xbf16>, vector<128x128xbf16>, vector<256x128xf32> -> vector<256x128xf32>
    %c1 = arith.constant 1 : index
    %c0_5 = arith.constant 0 : index
    %c0_6 = arith.constant 0 : index
    %5 = vector.load %arg1[%c1, %c0_5, %c0_6] : memref<5x256x128xbf16, #tpu.memory_space<vmem>>, vector<1x256x128xbf16>
    %6 = vector.shape_cast %5 : vector<1x256x128xbf16> to vector<256x128xbf16>
    %c1_7 = arith.constant 1 : index
    %c0_8 = arith.constant 0 : index
    %c0_9 = arith.constant 0 : index
    %7 = vector.load %arg2[%c1_7, %c0_8, %c0_9] : memref<5x128x128xbf16, #tpu.memory_space<vmem>>, vector<1x128x128xbf16>
    %8 = vector.shape_cast %7 : vector<1x128x128xbf16> to vector<128x128xbf16>
    %cst_10 = arith.constant dense<0.000000e+00> : vector<256x128xf32>
    %9 = tpu.matmul %6, %8, %cst_10 {dimension_numbers = #tpu.dot_dimension_numbers<[1], [0], [0], [1], [0, 0, 1, 1], [], []>} : vector<256x128xbf16>, vector<128x128xbf16>, vector<256x128xf32> -> vector<256x128xf32>
    %10 = arith.addf %4, %9 : vector<256x128xf32>
    %c2 = arith.constant 2 : index
    %c0_11 = arith.constant 0 : index
    %c0_12 = arith.constant 0 : index
    %11 = vector.load %arg1[%c2, %c0_11, %c0_12] : memref<5x256x128xbf16, #tpu.memory_space<vmem>>, vector<1x256x128xbf16>
    %12 = vector.shape_cast %11 : vector<1x256x128xbf16> to vector<256x128xbf16>
    %c2_13 = arith.constant 2 : index
    %c0_14 = arith.constant 0 : index
    %c0_15 = arith.constant 0 : index
    %13 = vector.load %arg2[%c2_13, %c0_14, %c0_15] : memref<5x128x128xbf16, #tpu.memory_space<vmem>>, vector<1x128x128xbf16>
    %14 = vector.shape_cast %13 : vector<1x128x128xbf16> to vector<128x128xbf16>
    %cst_16 = arith.constant dense<0.000000e+00> : vector<256x128xf32>
    %15 = tpu.matmul %12, %14, %cst_16 {dimension_numbers = #tpu.dot_dimension_numbers<[1], [0], [0], [1], [0, 0, 1, 1], [], []>} : vector<256x128xbf16>, vector<128x128xbf16>, vector<256x128xf32> -> vector<256x128xf32>
    %16 = arith.addf %10, %15 : vector<256x128xf32>
    %c3 = arith.constant 3 : index
    %c0_17 = arith.constant 0 : index
    %c0_18 = arith.constant 0 : index
    %17 = vector.load %arg1[%c3, %c0_17, %c0_18] : memref<5x256x128xbf16, #tpu.memory_space<vmem>>, vector<1x256x128xbf16>
    %18 = vector.shape_cast %17 : vector<1x256x128xbf16> to vector<256x128xbf16>
    %c3_19 = arith.constant 3 : index
    %c0_20 = arith.constant 0 : index
    %c0_21 = arith.constant 0 : index
    %19 = vector.load %arg2[%c3_19, %c0_20, %c0_21] : memref<5x128x128xbf16, #tpu.memory_space<vmem>>, vector<1x128x128xbf16>
    %20 = vector.shape_cast %19 : vector<1x128x128xbf16> to vector<128x128xbf16>
    %cst_22 = arith.constant dense<0.000000e+00> : vector<256x128xf32>
    %21 = tpu.matmul %18, %20, %cst_22 {dimension_numbers = #tpu.dot_dimension_numbers<[1], [0], [0], [1], [0, 0, 1, 1], [], []>} : vector<256x128xbf16>, vector<128x128xbf16>, vector<256x128xf32> -> vector<256x128xf32>
    %22 = arith.addf %16, %21 : vector<256x128xf32>
    %c4 = arith.constant 4 : index
    %c0_23 = arith.constant 0 : index
    %c0_24 = arith.constant 0 : index
    %23 = vector.load %arg1[%c4, %c0_23, %c0_24] : memref<5x256x128xbf16, #tpu.memory_space<vmem>>, vector<1x256x128xbf16>
    %24 = vector.shape_cast %23 : vector<1x256x128xbf16> to vector<256x128xbf16>
    %c4_25 = arith.constant 4 : index
    %c0_26 = arith.constant 0 : index
    %c0_27 = arith.constant 0 : index
    %25 = vector.load %arg2[%c4_25, %c0_26, %c0_27] : memref<5x128x128xbf16, #tpu.memory_space<vmem>>, vector<1x128x128xbf16>
    %26 = vector.shape_cast %25 : vector<1x128x128xbf16> to vector<128x128xbf16>
    %cst_28 = arith.constant dense<0.000000e+00> : vector<256x128xf32>
    %27 = tpu.matmul %24, %26, %cst_28 {dimension_numbers = #tpu.dot_dimension_numbers<[1], [0], [0], [1], [0, 0, 1, 1], [], []>} : vector<256x128xbf16>, vector<128x128xbf16>, vector<256x128xf32> -> vector<256x128xf32>
    %28 = arith.addf %22, %27 : vector<256x128xf32>
    %c0_29 = arith.constant 0 : index
    %c0_30 = arith.constant 0 : index
    %29 = vector.load %arg3[%c0_29, %c0_30] : memref<1x128xf32, #tpu.memory_space<vmem>>, vector<1x128xf32>
    %30 = vector.broadcast %29 : vector<1x128xf32> to vector<256x128xf32>
    %31 = arith.addf %28, %30 : vector<256x128xf32>
    %cst_31 = arith.constant 0.000000e+00 : f32
    %32 = vector.broadcast %cst_31 : f32 to vector<256x128xf32>
    %33 = arith.maximumf %31, %32 : vector<256x128xf32>
    %34 = arith.truncf %33 : vector<256x128xf32> to vector<256x128xbf16>
    %c0_32 = arith.constant 0 : index
    %c0_33 = arith.constant 0 : index
    %35 = vector.load %arg4[%c0_32, %c0_33] : memref<256x128xbf16, #tpu.memory_space<vmem>>, vector<256x128xbf16>
    tpu.vector_store %arg4[%c0_32, %c0_33], %34 {strides = array<i32>} : memref<256x128xbf16, #tpu.memory_space<vmem>>, vector<256x128xbf16>,
    return
  }
  func.func @transform_0(%arg0: i32) -> (i32, i32, i32) {
    %c0_i32 = arith.constant 0 : i32
    %c0_i32_0 = arith.constant 0 : i32
    %c0_i32_1 = arith.constant 0 : i32
    return %c0_i32, %arg0, %c0_i32_0 : i32, i32, i32
  }
  func.func @transform_1(%arg0: i32) -> (i32, i32, i32) {
    %c0_i32 = arith.constant 0 : i32
    %c0_i32_0 = arith.constant 0 : i32
    %c0_i32_1 = arith.constant 0 : i32
    %c0_i32_2 = arith.constant 0 : i32
    return %c0_i32, %c0_i32_0, %c0_i32_1 : i32, i32, i32
  }
  func.func @transform_2(%arg0: i32) -> (i32, i32) {
    %c0_i32 = arith.constant 0 : i32
    %c0_i32_0 = arith.constant 0 : i32
    %c0_i32_1 = arith.constant 0 : i32
    return %c0_i32, %c0_i32_0 : i32, i32
  }
  func.func @transform_3(%arg0: i32) -> (i32, i32) {
    %c0_i32 = arith.constant 0 : i32
    %c0_i32_0 = arith.constant 0 : i32
    return %arg0, %c0_i32 : i32, i32
  }
}

module attributes {stable_mosaic.version = 11 : i64} {
  func.func @_conv_stage_kernel(%arg0: i32, %arg1: memref<3x72x128xbf16, #tpu.memory_space<vmem>>, %arg2: memref<3x128x128xbf16, #tpu.memory_space<vmem>>, %arg3: memref<1x128xf32, #tpu.memory_space<vmem>>, %arg4: memref<72x128xbf16, #tpu.memory_space<vmem>>) attributes {dimension_semantics = [#tpu.dimension_semantics<parallel>], iteration_bounds = array<i64: 1>, scalar_prefetch = 0 : i64, scratch_operands = 0 : i64, tpu.core_type = #tpu.core_type<tc>, window_params = [{transform_indices = @transform_0, window_bounds = array<i64: 3, 72, 128>}, {pipeline_mode = #tpu.pipeline_mode<synchronous>, transform_indices = @transform_1, window_bounds = array<i64: 3, 128, 128>}, {pipeline_mode = #tpu.pipeline_mode<synchronous>, transform_indices = @transform_2, window_bounds = array<i64: 1, 128>}, {transform_indices = @transform_3, window_bounds = array<i64: 72, 128>}]} {
    %c0 = arith.constant 0 : index
    %c0_0 = arith.constant 0 : index
    %c0_1 = arith.constant 0 : index
    %0 = vector.load %arg1[%c0, %c0_0, %c0_1] : memref<3x72x128xbf16, #tpu.memory_space<vmem>>, vector<1x72x128xbf16>
    %1 = vector.shape_cast %0 : vector<1x72x128xbf16> to vector<72x128xbf16>
    %c0_2 = arith.constant 0 : index
    %c0_3 = arith.constant 0 : index
    %c0_4 = arith.constant 0 : index
    %2 = vector.load %arg2[%c0_2, %c0_3, %c0_4] : memref<3x128x128xbf16, #tpu.memory_space<vmem>>, vector<1x128x128xbf16>
    %3 = vector.shape_cast %2 : vector<1x128x128xbf16> to vector<128x128xbf16>
    %cst = arith.constant dense<0.000000e+00> : vector<72x128xf32>
    %4 = tpu.matmul %1, %3, %cst {dimension_numbers = #tpu.dot_dimension_numbers<[1], [0], [0], [1], [0, 0, 1, 1], [], []>} : vector<72x128xbf16>, vector<128x128xbf16>, vector<72x128xf32> -> vector<72x128xf32>
    %c1 = arith.constant 1 : index
    %c0_5 = arith.constant 0 : index
    %c0_6 = arith.constant 0 : index
    %5 = vector.load %arg1[%c1, %c0_5, %c0_6] : memref<3x72x128xbf16, #tpu.memory_space<vmem>>, vector<1x72x128xbf16>
    %6 = vector.shape_cast %5 : vector<1x72x128xbf16> to vector<72x128xbf16>
    %c1_7 = arith.constant 1 : index
    %c0_8 = arith.constant 0 : index
    %c0_9 = arith.constant 0 : index
    %7 = vector.load %arg2[%c1_7, %c0_8, %c0_9] : memref<3x128x128xbf16, #tpu.memory_space<vmem>>, vector<1x128x128xbf16>
    %8 = vector.shape_cast %7 : vector<1x128x128xbf16> to vector<128x128xbf16>
    %cst_10 = arith.constant dense<0.000000e+00> : vector<72x128xf32>
    %9 = tpu.matmul %6, %8, %cst_10 {dimension_numbers = #tpu.dot_dimension_numbers<[1], [0], [0], [1], [0, 0, 1, 1], [], []>} : vector<72x128xbf16>, vector<128x128xbf16>, vector<72x128xf32> -> vector<72x128xf32>
    %10 = arith.addf %4, %9 : vector<72x128xf32>
    %c2 = arith.constant 2 : index
    %c0_11 = arith.constant 0 : index
    %c0_12 = arith.constant 0 : index
    %11 = vector.load %arg1[%c2, %c0_11, %c0_12] : memref<3x72x128xbf16, #tpu.memory_space<vmem>>, vector<1x72x128xbf16>
    %12 = vector.shape_cast %11 : vector<1x72x128xbf16> to vector<72x128xbf16>
    %c2_13 = arith.constant 2 : index
    %c0_14 = arith.constant 0 : index
    %c0_15 = arith.constant 0 : index
    %13 = vector.load %arg2[%c2_13, %c0_14, %c0_15] : memref<3x128x128xbf16, #tpu.memory_space<vmem>>, vector<1x128x128xbf16>
    %14 = vector.shape_cast %13 : vector<1x128x128xbf16> to vector<128x128xbf16>
    %cst_16 = arith.constant dense<0.000000e+00> : vector<72x128xf32>
    %15 = tpu.matmul %12, %14, %cst_16 {dimension_numbers = #tpu.dot_dimension_numbers<[1], [0], [0], [1], [0, 0, 1, 1], [], []>} : vector<72x128xbf16>, vector<128x128xbf16>, vector<72x128xf32> -> vector<72x128xf32>
    %16 = arith.addf %10, %15 : vector<72x128xf32>
    %c0_17 = arith.constant 0 : index
    %c0_18 = arith.constant 0 : index
    %17 = vector.load %arg3[%c0_17, %c0_18] : memref<1x128xf32, #tpu.memory_space<vmem>>, vector<1x128xf32>
    %18 = vector.broadcast %17 : vector<1x128xf32> to vector<72x128xf32>
    %19 = arith.addf %16, %18 : vector<72x128xf32>
    %cst_19 = arith.constant 0.000000e+00 : f32
    %20 = vector.broadcast %cst_19 : f32 to vector<72x128xf32>
    %21 = arith.maximumf %19, %20 : vector<72x128xf32>
    %22 = arith.truncf %21 : vector<72x128xf32> to vector<72x128xbf16>
    %c0_20 = arith.constant 0 : index
    %c0_21 = arith.constant 0 : index
    %23 = vector.load %arg4[%c0_20, %c0_21] : memref<72x128xbf16, #tpu.memory_space<vmem>>, vector<72x128xbf16>
    tpu.vector_store %arg4[%c0_20, %c0_21], %22 {strides = array<i32>} : memref<72x128xbf16, #tpu.memory_space<vmem>>, vector<72x128xbf16>,
    return
  }
  func.func @transform_0(%arg0: i32) -> (i32, i32, i32) {
    %c0_i32 = arith.constant 0 : i32
    %c0_i32_0 = arith.constant 0 : i32
    %c0_i32_1 = arith.constant 0 : i32
    return %c0_i32, %arg0, %c0_i32_0 : i32, i32, i32
  }
  func.func @transform_1(%arg0: i32) -> (i32, i32, i32) {
    %c0_i32 = arith.constant 0 : i32
    %c0_i32_0 = arith.constant 0 : i32
    %c0_i32_1 = arith.constant 0 : i32
    %c0_i32_2 = arith.constant 0 : i32
    return %c0_i32, %c0_i32_0, %c0_i32_1 : i32, i32, i32
  }
  func.func @transform_2(%arg0: i32) -> (i32, i32) {
    %c0_i32 = arith.constant 0 : i32
    %c0_i32_0 = arith.constant 0 : i32
    %c0_i32_1 = arith.constant 0 : i32
    return %c0_i32, %c0_i32_0 : i32, i32
  }
  func.func @transform_3(%arg0: i32) -> (i32, i32) {
    %c0_i32 = arith.constant 0 : i32
    %c0_i32_0 = arith.constant 0 : i32
    return %arg0, %c0_i32 : i32, i32
  }
}

module attributes {stable_mosaic.version = 11 : i64} {
  func.func @_conv_stage_kernel(%arg0: i32, %arg1: memref<3x72x256xbf16, #tpu.memory_space<vmem>>, %arg2: memref<3x256x128xbf16, #tpu.memory_space<vmem>>, %arg3: memref<1x128xf32, #tpu.memory_space<vmem>>, %arg4: memref<72x128xbf16, #tpu.memory_space<vmem>>) attributes {dimension_semantics = [#tpu.dimension_semantics<parallel>], iteration_bounds = array<i64: 1>, scalar_prefetch = 0 : i64, scratch_operands = 0 : i64, tpu.core_type = #tpu.core_type<tc>, window_params = [{transform_indices = @transform_0, window_bounds = array<i64: 3, 72, 256>}, {pipeline_mode = #tpu.pipeline_mode<synchronous>, transform_indices = @transform_1, window_bounds = array<i64: 3, 256, 128>}, {pipeline_mode = #tpu.pipeline_mode<synchronous>, transform_indices = @transform_2, window_bounds = array<i64: 1, 128>}, {transform_indices = @transform_3, window_bounds = array<i64: 72, 128>}]} {
    %c0 = arith.constant 0 : index
    %c0_0 = arith.constant 0 : index
    %c0_1 = arith.constant 0 : index
    %0 = vector.load %arg1[%c0, %c0_0, %c0_1] : memref<3x72x256xbf16, #tpu.memory_space<vmem>>, vector<1x72x256xbf16>
    %1 = vector.shape_cast %0 : vector<1x72x256xbf16> to vector<72x256xbf16>
    %c0_2 = arith.constant 0 : index
    %c0_3 = arith.constant 0 : index
    %c0_4 = arith.constant 0 : index
    %2 = vector.load %arg2[%c0_2, %c0_3, %c0_4] : memref<3x256x128xbf16, #tpu.memory_space<vmem>>, vector<1x256x128xbf16>
    %3 = vector.shape_cast %2 : vector<1x256x128xbf16> to vector<256x128xbf16>
    %cst = arith.constant dense<0.000000e+00> : vector<72x128xf32>
    %4 = tpu.matmul %1, %3, %cst {dimension_numbers = #tpu.dot_dimension_numbers<[1], [0], [0], [1], [0, 0, 1, 1], [], []>} : vector<72x256xbf16>, vector<256x128xbf16>, vector<72x128xf32> -> vector<72x128xf32>
    %c1 = arith.constant 1 : index
    %c0_5 = arith.constant 0 : index
    %c0_6 = arith.constant 0 : index
    %5 = vector.load %arg1[%c1, %c0_5, %c0_6] : memref<3x72x256xbf16, #tpu.memory_space<vmem>>, vector<1x72x256xbf16>
    %6 = vector.shape_cast %5 : vector<1x72x256xbf16> to vector<72x256xbf16>
    %c1_7 = arith.constant 1 : index
    %c0_8 = arith.constant 0 : index
    %c0_9 = arith.constant 0 : index
    %7 = vector.load %arg2[%c1_7, %c0_8, %c0_9] : memref<3x256x128xbf16, #tpu.memory_space<vmem>>, vector<1x256x128xbf16>
    %8 = vector.shape_cast %7 : vector<1x256x128xbf16> to vector<256x128xbf16>
    %cst_10 = arith.constant dense<0.000000e+00> : vector<72x128xf32>
    %9 = tpu.matmul %6, %8, %cst_10 {dimension_numbers = #tpu.dot_dimension_numbers<[1], [0], [0], [1], [0, 0, 1, 1], [], []>} : vector<72x256xbf16>, vector<256x128xbf16>, vector<72x128xf32> -> vector<72x128xf32>
    %10 = arith.addf %4, %9 : vector<72x128xf32>
    %c2 = arith.constant 2 : index
    %c0_11 = arith.constant 0 : index
    %c0_12 = arith.constant 0 : index
    %11 = vector.load %arg1[%c2, %c0_11, %c0_12] : memref<3x72x256xbf16, #tpu.memory_space<vmem>>, vector<1x72x256xbf16>
    %12 = vector.shape_cast %11 : vector<1x72x256xbf16> to vector<72x256xbf16>
    %c2_13 = arith.constant 2 : index
    %c0_14 = arith.constant 0 : index
    %c0_15 = arith.constant 0 : index
    %13 = vector.load %arg2[%c2_13, %c0_14, %c0_15] : memref<3x256x128xbf16, #tpu.memory_space<vmem>>, vector<1x256x128xbf16>
    %14 = vector.shape_cast %13 : vector<1x256x128xbf16> to vector<256x128xbf16>
    %cst_16 = arith.constant dense<0.000000e+00> : vector<72x128xf32>
    %15 = tpu.matmul %12, %14, %cst_16 {dimension_numbers = #tpu.dot_dimension_numbers<[1], [0], [0], [1], [0, 0, 1, 1], [], []>} : vector<72x256xbf16>, vector<256x128xbf16>, vector<72x128xf32> -> vector<72x128xf32>
    %16 = arith.addf %10, %15 : vector<72x128xf32>
    %c0_17 = arith.constant 0 : index
    %c0_18 = arith.constant 0 : index
    %17 = vector.load %arg3[%c0_17, %c0_18] : memref<1x128xf32, #tpu.memory_space<vmem>>, vector<1x128xf32>
    %18 = vector.broadcast %17 : vector<1x128xf32> to vector<72x128xf32>
    %19 = arith.addf %16, %18 : vector<72x128xf32>
    %cst_19 = arith.constant 0.000000e+00 : f32
    %20 = vector.broadcast %cst_19 : f32 to vector<72x128xf32>
    %21 = arith.maximumf %19, %20 : vector<72x128xf32>
    %22 = arith.truncf %21 : vector<72x128xf32> to vector<72x128xbf16>
    %c0_20 = arith.constant 0 : index
    %c0_21 = arith.constant 0 : index
    %23 = vector.load %arg4[%c0_20, %c0_21] : memref<72x128xbf16, #tpu.memory_space<vmem>>, vector<72x128xbf16>
    tpu.vector_store %arg4[%c0_20, %c0_21], %22 {strides = array<i32>} : memref<72x128xbf16, #tpu.memory_space<vmem>>, vector<72x128xbf16>,
    return
  }
  func.func @transform_0(%arg0: i32) -> (i32, i32, i32) {
    %c0_i32 = arith.constant 0 : i32
    %c0_i32_0 = arith.constant 0 : i32
    %c0_i32_1 = arith.constant 0 : i32
    return %c0_i32, %arg0, %c0_i32_0 : i32, i32, i32
  }
  func.func @transform_1(%arg0: i32) -> (i32, i32, i32) {
    %c0_i32 = arith.constant 0 : i32
    %c0_i32_0 = arith.constant 0 : i32
    %c0_i32_1 = arith.constant 0 : i32
    %c0_i32_2 = arith.constant 0 : i32
    return %c0_i32, %c0_i32_0, %c0_i32_1 : i32, i32, i32
  }
  func.func @transform_2(%arg0: i32) -> (i32, i32) {
    %c0_i32 = arith.constant 0 : i32
    %c0_i32_0 = arith.constant 0 : i32
    %c0_i32_1 = arith.constant 0 : i32
    return %c0_i32, %c0_i32_0 : i32, i32
  }
  func.func @transform_3(%arg0: i32) -> (i32, i32) {
    %c0_i32 = arith.constant 0 : i32
    %c0_i32_0 = arith.constant 0 : i32
    return %arg0, %c0_i32 : i32, i32
  }
}

module attributes {stable_mosaic.version = 11 : i64} {
  func.func @_head_kernel(%arg0: i32, %arg1: memref<3x16x256xbf16, #tpu.memory_space<vmem>>, %arg2: memref<3x256x128xbf16, #tpu.memory_space<vmem>>, %arg3: memref<1x128xf32, #tpu.memory_space<vmem>>, %arg4: memref<128x1xf32, #tpu.memory_space<vmem>>, %arg5: memref<1x1xf32, #tpu.memory_space<vmem>>, %arg6: memref<1x1x1xf32, #tpu.memory_space<vmem>>) attributes {dimension_semantics = [#tpu.dimension_semantics<parallel>], iteration_bounds = array<i64: 2>, scalar_prefetch = 0 : i64, scratch_operands = 0 : i64, tpu.core_type = #tpu.core_type<tc>, window_params = [{transform_indices = @transform_0, window_bounds = array<i64: 3, 16, 256>}, {pipeline_mode = #tpu.pipeline_mode<synchronous>, transform_indices = @transform_1, window_bounds = array<i64: 3, 256, 128>}, {pipeline_mode = #tpu.pipeline_mode<synchronous>, transform_indices = @transform_2, window_bounds = array<i64: 1, 128>}, {pipeline_mode = #tpu.pipeline_mode<synchronous>, transform_indices = @transform_3, window_bounds = array<i64: 128, 1>}, {pipeline_mode = #tpu.pipeline_mode<synchronous>, transform_indices = @transform_4, window_bounds = array<i64: 1, 1>}, {transform_indices = @transform_5, window_bounds = array<i64: 1, 1, 1>}]} {
    %c0 = arith.constant 0 : index
    %c0_0 = arith.constant 0 : index
    %c0_1 = arith.constant 0 : index
    %0 = vector.load %arg1[%c0, %c0_0, %c0_1] : memref<3x16x256xbf16, #tpu.memory_space<vmem>>, vector<1x16x256xbf16>
    %1 = vector.shape_cast %0 : vector<1x16x256xbf16> to vector<16x256xbf16>
    %c0_2 = arith.constant 0 : index
    %c0_3 = arith.constant 0 : index
    %c0_4 = arith.constant 0 : index
    %2 = vector.load %arg2[%c0_2, %c0_3, %c0_4] : memref<3x256x128xbf16, #tpu.memory_space<vmem>>, vector<1x256x128xbf16>
    %3 = vector.shape_cast %2 : vector<1x256x128xbf16> to vector<256x128xbf16>
    %cst = arith.constant dense<0.000000e+00> : vector<16x128xf32>
    %4 = tpu.matmul %1, %3, %cst {dimension_numbers = #tpu.dot_dimension_numbers<[1], [0], [0], [1], [0, 0, 1, 1], [], []>} : vector<16x256xbf16>, vector<256x128xbf16>, vector<16x128xf32> -> vector<16x128xf32>
    %c1 = arith.constant 1 : index
    %c0_5 = arith.constant 0 : index
    %c0_6 = arith.constant 0 : index
    %5 = vector.load %arg1[%c1, %c0_5, %c0_6] : memref<3x16x256xbf16, #tpu.memory_space<vmem>>, vector<1x16x256xbf16>
    %6 = vector.shape_cast %5 : vector<1x16x256xbf16> to vector<16x256xbf16>
    %c1_7 = arith.constant 1 : index
    %c0_8 = arith.constant 0 : index
    %c0_9 = arith.constant 0 : index
    %7 = vector.load %arg2[%c1_7, %c0_8, %c0_9] : memref<3x256x128xbf16, #tpu.memory_space<vmem>>, vector<1x256x128xbf16>
    %8 = vector.shape_cast %7 : vector<1x256x128xbf16> to vector<256x128xbf16>
    %cst_10 = arith.constant dense<0.000000e+00> : vector<16x128xf32>
    %9 = tpu.matmul %6, %8, %cst_10 {dimension_numbers = #tpu.dot_dimension_numbers<[1], [0], [0], [1], [0, 0, 1, 1], [], []>} : vector<16x256xbf16>, vector<256x128xbf16>, vector<16x128xf32> -> vector<16x128xf32>
    %10 = arith.addf %4, %9 : vector<16x128xf32>
    %c2 = arith.constant 2 : index
    %c0_11 = arith.constant 0 : index
    %c0_12 = arith.constant 0 : index
    %11 = vector.load %arg1[%c2, %c0_11, %c0_12] : memref<3x16x256xbf16, #tpu.memory_space<vmem>>, vector<1x16x256xbf16>
    %12 = vector.shape_cast %11 : vector<1x16x256xbf16> to vector<16x256xbf16>
    %c2_13 = arith.constant 2 : index
    %c0_14 = arith.constant 0 : index
    %c0_15 = arith.constant 0 : index
    %13 = vector.load %arg2[%c2_13, %c0_14, %c0_15] : memref<3x256x128xbf16, #tpu.memory_space<vmem>>, vector<1x256x128xbf16>
    %14 = vector.shape_cast %13 : vector<1x256x128xbf16> to vector<256x128xbf16>
    %cst_16 = arith.constant dense<0.000000e+00> : vector<16x128xf32>
    %15 = tpu.matmul %12, %14, %cst_16 {dimension_numbers = #tpu.dot_dimension_numbers<[1], [0], [0], [1], [0, 0, 1, 1], [], []>} : vector<16x256xbf16>, vector<256x128xbf16>, vector<16x128xf32> -> vector<16x128xf32>
    %16 = arith.addf %10, %15 : vector<16x128xf32>
    %c0_17 = arith.constant 0 : index
    %c0_18 = arith.constant 0 : index
    %17 = vector.load %arg3[%c0_17, %c0_18] : memref<1x128xf32, #tpu.memory_space<vmem>>, vector<1x128xf32>
    %18 = vector.broadcast %17 : vector<1x128xf32> to vector<16x128xf32>
    %19 = arith.addf %16, %18 : vector<16x128xf32>
    %cst_19 = arith.constant 0.000000e+00 : f32
    %20 = vector.broadcast %cst_19 : f32 to vector<16x128xf32>
    %21 = arith.maximumf %19, %20 : vector<16x128xf32>
    %22 = vector.extract_strided_slice %21 {offsets = [0, 0], sizes = [9, 128], strides = [1, 1]} : vector<16x128xf32> to vector<9x128xf32>
    %cst_20 = arith.constant dense<0.000000e+00> : vector<128xf32>
    %23 = vector.multi_reduction <add>, %22, %cst_20 [0] : vector<9x128xf32> to vector<128xf32>
    %24 = vector.shape_cast %23 : vector<128xf32> to vector<1x128xf32>
    %cst_21 = arith.constant 0.111111112 : f32
    %25 = vector.broadcast %cst_21 : f32 to vector<1x128xf32>
    %26 = arith.mulf %24, %25 : vector<1x128xf32>
    %c0_22 = arith.constant 0 : index
    %c0_23 = arith.constant 0 : index
    %27 = vector.load %arg4[%c0_22, %c0_23] : memref<128x1xf32, #tpu.memory_space<vmem>>, vector<128x1xf32>
    %cst_24 = arith.constant dense<0.000000e+00> : vector<1x1xf32>
    %28 = tpu.matmul %26, %27, %cst_24 {dimension_numbers = #tpu.dot_dimension_numbers<[1], [0], [0], [1], [0, 0, 1, 1], [], []>} : vector<1x128xf32>, vector<128x1xf32>, vector<1x1xf32> -> vector<1x1xf32>
    %c0_25 = arith.constant 0 : index
    %c0_26 = arith.constant 0 : index
    %29 = vector.load %arg5[%c0_25, %c0_26] : memref<1x1xf32, #tpu.memory_space<vmem>>, vector<1x1xf32>
    %30 = arith.addf %28, %29 : vector<1x1xf32>
    %c0_27 = arith.constant 0 : index
    %c0_28 = arith.constant 0 : index
    %c0_29 = arith.constant 0 : index
    %31 = vector.load %arg6[%c0_27, %c0_28, %c0_29] : memref<1x1x1xf32, #tpu.memory_space<vmem>>, vector<1x1x1xf32>
    %32 = vector.shape_cast %31 : vector<1x1x1xf32> to vector<1x1xf32>
    %33 = vector.shape_cast %30 : vector<1x1xf32> to vector<1x1x1xf32>
    tpu.vector_store %arg6[%c0_27, %c0_28, %c0_29], %33 {strides = array<i32>} : memref<1x1x1xf32, #tpu.memory_space<vmem>>, vector<1x1x1xf32>,
    return
  }
  func.func @transform_0(%arg0: i32) -> (i32, i32, i32) {
    %c0_i32 = arith.constant 0 : i32
    %c0_i32_0 = arith.constant 0 : i32
    %c0_i32_1 = arith.constant 0 : i32
    return %c0_i32, %arg0, %c0_i32_0 : i32, i32, i32
  }
  func.func @transform_1(%arg0: i32) -> (i32, i32, i32) {
    %c0_i32 = arith.constant 0 : i32
    %c0_i32_0 = arith.constant 0 : i32
    %c0_i32_1 = arith.constant 0 : i32
    %c0_i32_2 = arith.constant 0 : i32
    return %c0_i32, %c0_i32_0, %c0_i32_1 : i32, i32, i32
  }
  func.func @transform_2(%arg0: i32) -> (i32, i32) {
    %c0_i32 = arith.constant 0 : i32
    %c0_i32_0 = arith.constant 0 : i32
    %c0_i32_1 = arith.constant 0 : i32
    return %c0_i32, %c0_i32_0 : i32, i32
  }
  func.func @transform_3(%arg0: i32) -> (i32, i32) {
    %c0_i32 = arith.constant 0 : i32
    %c0_i32_0 = arith.constant 0 : i32
    %c0_i32_1 = arith.constant 0 : i32
    return %c0_i32, %c0_i32_0 : i32, i32
  }
  func.func @transform_4(%arg0: i32) -> (i32, i32) {
    %c0_i32 = arith.constant 0 : i32
    %c0_i32_0 = arith.constant 0 : i32
    %c0_i32_1 = arith.constant 0 : i32
    return %c0_i32, %c0_i32_0 : i32, i32
  }
  func.func @transform_5(%arg0: i32) -> (i32, i32, i32) {
    %c0_i32 = arith.constant 0 : i32
    %c0_i32_0 = arith.constant 0 : i32
    %c0_i32_1 = arith.constant 0 : i32
    return %arg0, %c0_i32, %c0_i32_0 : i32, i32, i32
  }
}

</mosaic_0001>

<bundles_post_ra>
// kernel: wdm_classifier_tiny.5
= control target key start
LH: loop header
LB: loop body
LE: loop exit
PB: predicated region body
PF: predicated region fallthrough
CT: control target
= control target key end

     0   :  { %s1126_s12 = smov 0   ;;  %s1247_s0 = inlined_call_operand.vmem [shape: bf16[1,512,128], index: 0, kind: input, shape index: {}]   ;;  %s1248_s1 = inlined_call_operand.vmem [shape: bf16[1,128,128], index: 1, kind: input, shape index: {}]   ;;  %s1249_s2 = inlined_call_operand.vmem [shape: f32[1,128], index: 2, kind: input, shape index: {}]   ;;  %s1250_s3 = inlined_call_operand.vmem [shape: bf16[512,128], index: 3, kind: output, shape index: {}]  }
   0x1 LB: > { %s783_s13 = sadd.s32 4294967295, %s1104_s12   ;;  %p787_p0 = scmp.ge.s32.totalorder %s1104_s12, 1  ;;  %s1104_s12 = sphi %s1126_s12, %s13_s12  }
   0x2   : > { %p138_p1 = scmp.lt.s32.totalorder %s1104_s12, 3 }
   0x4   : > { %p139_p2 = pnand %p787_p0, %p138_p1 }
   0x5   : > { %v1074_v0 = vld [vmem:[%s1248_s1] sm:$0xff] (!%p139_p2)   ;;  %s788_s16 = sshll.u32 (!%p139_p2), %s783_s13, 5  ;;  %v1075_v1 = vld [vmem:[%s1248_s1 + $0x8] sm:$0xff] (!%p139_p2)   ;;  %v1076_v2 = vld [vmem:[%s1248_s1 + $0x10] sm:$0xff] (!%p139_p2)  }
   0x6   : > { %142 = sbr.rel (%p139_p2) target bundleno = 284 (0x11c), region = 32  ;;  %p163_p3 = scmp.lt.s32.totalorder (!%p139_p2), %s788_s16, 63  ;;  %1002 = vmatprep.subr.bf16.mxu0 (!%p139_p2), %v1074_v0  ;;  %1050 = vmatprep.subr.bf16.mxu1 (!%p139_p2), %v1074_v0  ;;  %v1077_v3 = vld [vmem:[%s1248_s1 + $0x18] sm:$0xff] (!%p139_p2)   ;;  %v1078_v6 = vld [vmem:[%s1248_s1 + $0x20] sm:$0xff] (!%p139_p2)   ;;  %v1079_v7 = vld [vmem:[%s1248_s1 + $0x28] sm:$0xff] (!%p139_p2)  }
   0x7   : > { %1003 = vmatpush3.bf16.msra.mxu0 (!%p139_p2), %v1074_v0  ;;  %1058 = vmatpush3.bf16.msra.mxu1 (!%p139_p2), %v1074_v0  ;;  %v1080_v8 = vld [vmem:[%s1248_s1 + $0x30] sm:$0xff] (!%p139_p2)   ;;  %v1081_v9 = vld [vmem:[%s1248_s1 + $0x38] sm:$0xff] (!%p139_p2)   ;;  %v1187_v24 = vld [vmem:[%s1249_s2] ss:$0 sm:$0xff] (!%p139_p2) }
   0x8   : > { %1004 = vmatprep.subr.bf16.mxu0 (!%p139_p2), %v1075_v1  ;;  %1051 = vmatprep.subr.bf16.mxu1 (!%p139_p2), %v1075_v1 }
   0xb   : > { %1005 = vmatpush3.bf16.msra.mxu0 (!%p139_p2), %v1075_v1  ;;  %1059 = vmatpush3.bf16.msra.mxu1 (!%p139_p2), %v1075_v1 }
   0xc   : > { %1006 = vmatprep.subr.bf16.mxu0 (!%p139_p2), %v1076_v2  ;;  %1052 = vmatprep.subr.bf16.mxu1 (!%p139_p2), %v1076_v2 }
   0xd   : > { %s1252_s16 = smov (!%p163_p3, %s788_s16), 63 }
   0xe   : > { %s789_s21 = sshll.u32 %s1252_s16, 2 }
   0xf   : > { %s1151_s24 = scalar_lea.vmem %s1247_s0, %s789_s21  ;;  %1007 = vmatpush3.bf16.msra.mxu0 %v1076_v2  ;;  %1060 = vmatpush3.bf16.msra.mxu1 %v1076_v2  ;;  %s1202_s13 = scalar_lea.vmem %s1250_s3, %s789_s21 }
  0x10   : > { %v1082_v4 = vld [vmem:[%s1151_s24] sm:$0xff]   ;;  %1008 = vmatprep.subr.bf16.mxu0 %v1077_v3  ;;  %1053 = vmatprep.subr.bf16.mxu1 %v1077_v3  ;;  %v1084_v10 = vld [vmem:[%s1151_s24 + $0x8] sm:$0xff]   ;;  %v1086_v12 = vld [vmem:[%s1151_s24 + $0x10] sm:$0xff]  }
  0x11   : > { %v1083_v5 = vld [vmem:[%s1151_s24 + $0x40] sm:$0xff]   ;;  %1018 = vmatprep.mubr.bf16.mxu0 %v1082_v4  ;;  %v1085_v11 = vld [vmem:[%s1151_s24 + $0x48] sm:$0xff]   ;;  %v1087_v13 = vld [vmem:[%s1151_s24 + $0x50] sm:$0xff]  }
  0x12   : > { %1034 = vmatprep.mubr.bf16.mxu1 %v1083_v5  ;;  %v1088_v14 = vld [vmem:[%s1151_s24 + $0x18] sm:$0xff]   ;;  %v1090_v16 = vld [vmem:[%s1151_s24 + $0x20] sm:$0xff]   ;;  %v1092_v18 = vld [vmem:[%s1151_s24 + $0x28] sm:$0xff]  }
  0x13   : > { %1009 = vmatpush3.bf16.msra.mxu0 %v1077_v3  ;;  %1061 = vmatpush3.bf16.msra.mxu1 %v1077_v3  ;;  %v1089_v15 = vld [vmem:[%s1151_s24 + $0x58] sm:$0xff]   ;;  %v1091_v17 = vld [vmem:[%s1151_s24 + $0x60] sm:$0xff]   ;;  %v1093_v19 = vld [vmem:[%s1151_s24 + $0x68] sm:$0xff]  }
  0x14   : > { %1010 = vmatprep.subr.bf16.mxu0 %v1078_v6  ;;  %1054 = vmatprep.subr.bf16.mxu1 %v1078_v6  ;;  %v1094_v20 = vld [vmem:[%s1151_s24 + $0x30] sm:$0xff]   ;;  %v1096_v22 = vld [vmem:[%s1151_s24 + $0x38] sm:$0xff]  }
  0x15   : > { %v1095_v21 = vld [vmem:[%s1151_s24 + $0x70] sm:$0xff]   ;;  %v1097_v23 = vld [vmem:[%s1151_s24 + $0x78] sm:$0xff]  }
  0x17   : > { %1011 = vmatpush3.bf16.msra.mxu0 %v1078_v6  ;;  %1062 = vmatpush3.bf16.msra.mxu1 %v1078_v6 }
  0x18   : > { %1012 = vmatprep.subr.bf16.mxu0 %v1079_v7  ;;  %1055 = vmatprep.subr.bf16.mxu1 %v1079_v7 }
  0x1b   : > { %1013 = vmatpush3.bf16.msra.mxu0 %v1079_v7  ;;  %1063 = vmatpush3.bf16.msra.mxu1 %v1079_v7 }
  0x1c   : > { %1014 = vmatprep.subr.bf16.mxu0 %v1080_v8  ;;  %1056 = vmatprep.subr.bf16.mxu1 %v1080_v8 }
  0x1f   : > { %1015 = vmatpush3.bf16.msra.mxu0 %v1080_v8  ;;  %1064 = vmatpush3.bf16.msra.mxu1 %v1080_v8 }
  0x20   : > { %1016 = vmatprep.subr.bf16.mxu0 %v1081_v9  ;;  %1057 = vmatprep.subr.bf16.mxu1 %v1081_v9 }
  0x23   : > { %1017 = vmatpush3.bf16.msra.mxu0 %v1081_v9  ;;  %1065 = vmatpush3.bf16.msra.mxu1 %v1081_v9 }
  0x26   : > { %1019 = vmatmul.mubr.bf16.vlgmr.msra.gmra.mrb[0].mxu0 %v1084_v10  ;;  %1035 = vmatmul.mubr.bf16.vlgmr.msra.gmra.mrb[0].mxu1 %v1085_v11 }
  0x27   : > { %1022 = vmatprep.mubr.bf16.mxu0 %v1086_v12  ;;  %1038 = vmatprep.mubr.bf16.mxu1 %v1087_v13 }
  0x2e   : > { %1023 = vmatmul.mubr.bf16.gmra.mrb[4].mxu0 %v1088_v14  ;;  %1039 = vmatmul.mubr.bf16.gmra.mrb[4].mxu1 %v1089_v15 }
  0x2f   : > { %1026 = vmatprep.mubr.bf16.mxu0 %v1090_v16  ;;  %1042 = vmatprep.mubr.bf16.mxu1 %v1091_v17 }
  0x36   : > { %1027 = vmatmul.mubr.bf16.gmra.mrb[8].mxu0 %v1092_v18  ;;  %1043 = vmatmul.mubr.bf16.gmra.mrb[8].mxu1 %v1093_v19 }
  0x37   : > { %1030 = vmatprep.mubr.bf16.mxu0 %v1094_v20  ;;  %1046 = vmatprep.mubr.bf16.mxu1 %v1095_v21 }
  0x3e   : > { %1031 = vmatmul.mubr.bf16.gmra.mrb[12].mxu0 %v1096_v22  ;;  %1047 = vmatmul.mubr.bf16.gmra.mrb[12].mxu1 %v1097_v23 }
  0xf9   : > { %v1020_v25 = vpop.f32.mrb[0].mxu0  ;;  %v1036_v26 = vpop.f32.mrb[0].mxu1 }
  0xfa   : > { %v417_v27 = vadd.f32 %v1020_v25, %v1187_v24  ;;  %v481_v28 = vadd.f32 %v1036_v26, %v1187_v24  ;;  %v408_v29 = vpop.f32.mrb[1].mxu0  ;;  %v472_v30 = vpop.f32.mrb[1].mxu1 }
  0xfb   : > { %v409_v31 = vadd.f32 %v1187_v24, %v408_v29  ;;  %v473_v32 = vadd.f32 %v1187_v24, %v472_v30  ;;  %v1021_v33 = vpop.f32.mrb[2].mxu0  ;;  %v1037_v34 = vpop.f32.mrb[2].mxu1 }
  0xfc   : > { %v420_v35 = vadd.f32 %v1021_v33, %v1187_v24  ;;  %v484_v36 = vadd.f32 %v1037_v34, %v1187_v24  ;;  %v411_v37 = vpop.f32.mrb[3].mxu0  ;;  %v475_v38 = vpop.f32.mrb[3].mxu1  ;;  %v537_v41 = vmax.f32 %v417_v27, 0.0  ;;  %v553_v42 = vmax.f32 %v481_v28, 0.0 }
  0xfd   : > { %v412_v39 = vadd.f32 %v1187_v24, %v411_v37  ;;  %v476_v40 = vadd.f32 %v1187_v24, %v475_v38  ;;  %v535_v45 = vmax.f32 %v409_v31, 0.0  ;;  %v551_v46 = vmax.f32 %v473_v32, 0.0 }
  0xfe   : > { %v538_v43 = vmax.f32 %v420_v35, 0.0  ;;  %v554_v44 = vmax.f32 %v484_v36, 0.0 }
  0xff   : > { %v536_v47 = vmax.f32 %v412_v39, 0.0  ;;  %v552_v48 = vmax.f32 %v476_v40, 0.0 }
 0x100   : > { %v891_v49 = vpack.c.bf16 %v538_v43, %v537_v41  ;;  %v931_v50 = vpack.c.bf16 %v554_v44, %v553_v42 }
 0x101   : > { %v886_v51 = vpack.c.bf16 %v536_v47, %v535_v45  ;;  %v926_v52 = vpack.c.bf16 %v552_v48, %v551_v46  ;;  %v1024_v53 = vpop.f32.mrb[4].mxu0  ;;  %v1040_v54 = vpop.f32.mrb[4].mxu1 }
 0x102   : > { %963 = vst [vmem:[%s1202_s13 + $0x8] sm:$0xff] %v891_v49   ;;  %971 = vst [vmem:[%s1202_s13 + $0x48] sm:$0xff] %v931_v50   ;;  %v433_v55 = vadd.f32 %v1024_v53, %v1187_v24  ;;  %v497_v56 = vadd.f32 %v1040_v54, %v1187_v24  ;;  %v424_v57 = vpop.f32.mrb[5].mxu0  ;;  %v488_v58 = vpop.f32.mrb[5].mxu1 }
 0x103   : > { %887 = vst [vmem:[%s1202_s13] sm:$0xff] %v886_v51   ;;  %970 = vst [vmem:[%s1202_s13 + $0x40] sm:$0xff] %v926_v52   ;;  %v425_v59 = vadd.f32 %v1187_v24, %v424_v57  ;;  %v489_v60 = vadd.f32 %v1187_v24, %v488_v58  ;;  %v1025_v61 = vpop.f32.mrb[6].mxu0  ;;  %v1041_v62 = vpop.f32.mrb[6].mxu1 }
 0x104   : > { %v436_v63 = vadd.f32 %v1025_v61, %v1187_v24  ;;  %v500_v0 = vadd.f32 %v1041_v62, %v1187_v24  ;;  %v427_v1 = vpop.f32.mrb[7].mxu0  ;;  %v491_v2 = vpop.f32.mrb[7].mxu1  ;;  %v541_v5 = vmax.f32 %v433_v55, 0.0  ;;  %v557_v6 = vmax.f32 %v497_v56, 0.0 }
 0x105   : > { %v428_v3 = vadd.f32 %v1187_v24, %v427_v1  ;;  %v492_v4 = vadd.f32 %v1187_v24, %v491_v2  ;;  %v539_v9 = vmax.f32 %v425_v59, 0.0  ;;  %v555_v10 = vmax.f32 %v489_v60, 0.0 }
 0x106   : > { %v542_v7 = vmax.f32 %v436_v63, 0.0  ;;  %v558_v8 = vmax.f32 %v500_v0, 0.0 }
 0x107   : > { %v540_v11 = vmax.f32 %v428_v3, 0.0  ;;  %v556_v12 = vmax.f32 %v492_v4, 0.0 }
 0x108   : > { %v901_v13 = vpack.c.bf16 %v542_v7, %v541_v5  ;;  %v941_v14 = vpack.c.bf16 %v558_v8, %v557_v6 }
 0x109   : > { %v896_v15 = vpack.c.bf16 %v540_v11, %v539_v9  ;;  %v936_v16 = vpack.c.bf16 %v556_v12, %v555_v10  ;;  %v1028_v17 = vpop.f32.mrb[8].mxu0  ;;  %v1044_v18 = vpop.f32.mrb[8].mxu1 }
 0x10a   : > { %965 = vst [vmem:[%s1202_s13 + $0x18] sm:$0xff] %v901_v13   ;;  %973 = vst [vmem:[%s1202_s13 + $0x58] sm:$0xff] %v941_v14   ;;  %v449_v19 = vadd.f32 %v1028_v17, %v1187_v24  ;;  %v513_v20 = vadd.f32 %v1044_v18, %v1187_v24  ;;  %v440_v21 = vpop.f32.mrb[9].mxu0  ;;  %v504_v22 = vpop.f32.mrb[9].mxu1 }
 0x10b   : > { %964 = vst [vmem:[%s1202_s13 + $0x10] sm:$0xff] %v896_v15   ;;  %972 = vst [vmem:[%s1202_s13 + $0x50] sm:$0xff] %v936_v16   ;;  %v441_v23 = vadd.f32 %v1187_v24, %v440_v21  ;;  %v505_v25 = vadd.f32 %v1187_v24, %v504_v22  ;;  %v1029_v26 = vpop.f32.mrb[10].mxu0  ;;  %v1045_v27 = vpop.f32.mrb[10].mxu1 }
 0x10c   : > { %v452_v28 = vadd.f32 %v1029_v26, %v1187_v24  ;;  %v516_v29 = vadd.f32 %v1045_v27, %v1187_v24  ;;  %v443_v30 = vpop.f32.mrb[11].mxu0  ;;  %v507_v31 = vpop.f32.mrb[11].mxu1  ;;  %v545_v34 = vmax.f32 %v449_v19, 0.0  ;;  %v561_v35 = vmax.f32 %v513_v20, 0.0 }
 0x10d   : > { %v444_v32 = vadd.f32 %v1187_v24, %v443_v30  ;;  %v508_v33 = vadd.f32 %v1187_v24, %v507_v31  ;;  %v543_v38 = vmax.f32 %v441_v23, 0.0  ;;  %v559_v39 = vmax.f32 %v505_v25, 0.0 }
 0x10e   : > { %v546_v36 = vmax.f32 %v452_v28, 0.0  ;;  %v562_v37 = vmax.f32 %v516_v29, 0.0 }
 0x10f   : > { %v544_v40 = vmax.f32 %v444_v32, 0.0  ;;  %v560_v41 = vmax.f32 %v508_v33, 0.0 }
 0x110   : > { %v911_v42 = vpack.c.bf16 %v546_v36, %v545_v34  ;;  %v951_v43 = vpack.c.bf16 %v562_v37, %v561_v35 }
 0x111   : > { %v906_v44 = vpack.c.bf16 %v544_v40, %v543_v38  ;;  %v946_v45 = vpack.c.bf16 %v560_v41, %v559_v39  ;;  %v1032_v46 = vpop.f32.mrb[12].mxu0  ;;  %v1048_v47 = vpop.f32.mrb[12].mxu1 }
 0x112   : > { %967 = vst [vmem:[%s1202_s13 + $0x28] sm:$0xff] %v911_v42   ;;  %975 = vst [vmem:[%s1202_s13 + $0x68] sm:$0xff] %v951_v43   ;;  %v465_v48 = vadd.f32 %v1032_v46, %v1187_v24  ;;  %v529_v49 = vadd.f32 %v1048_v47, %v1187_v24  ;;  %v456_v50 = vpop.f32.mrb[13].mxu0  ;;  %v520_v51 = vpop.f32.mrb[13].mxu1 }
 0x113   : > { %966 = vst [vmem:[%s1202_s13 + $0x20] sm:$0xff] %v906_v44   ;;  %974 = vst [vmem:[%s1202_s13 + $0x60] sm:$0xff] %v946_v45   ;;  %v457_v52 = vadd.f32 %v1187_v24, %v456_v50  ;;  %v521_v53 = vadd.f32 %v1187_v24, %v520_v51  ;;  %v1033_v54 = vpop.f32.mrb[14].mxu0  ;;  %v1049_v55 = vpop.f32.mrb[14].mxu1 }
 0x114   : > { %v468_v56 = vadd.f32 %v1033_v54, %v1187_v24  ;;  %v532_v57 = vadd.f32 %v1049_v55, %v1187_v24  ;;  %v459_v58 = vpop.f32.mrb[15].mxu0  ;;  %v523_v59 = vpop.f32.mrb[15].mxu1  ;;  %v549_v62 = vmax.f32 %v465_v48, 0.0  ;;  %v565_v63 = vmax.f32 %v529_v49, 0.0 }
 0x115   : > { %v460_v60 = vadd.f32 %v1187_v24, %v459_v58  ;;  %v524_v61 = vadd.f32 %v1187_v24, %v523_v59  ;;  %v547_v2 = vmax.f32 %v457_v52, 0.0  ;;  %v563_v3 = vmax.f32 %v521_v53, 0.0 }
 0x116   : > { %v550_v0 = vmax.f32 %v468_v56, 0.0  ;;  %v566_v1 = vmax.f32 %v532_v57, 0.0 }
 0x117   : > { %v548_v4 = vmax.f32 %v460_v60, 0.0  ;;  %v564_v5 = vmax.f32 %v524_v61, 0.0 }
 0x118   : > { %v921_v6 = vpack.c.bf16 %v550_v0, %v549_v62  ;;  %v961_v7 = vpack.c.bf16 %v566_v1, %v565_v63 }
 0x119   : > { %v916_v8 = vpack.c.bf16 %v548_v4, %v547_v2  ;;  %v956_v9 = vpack.c.bf16 %v564_v5, %v563_v3 }
 0x11a   : > { %969 = vst [vmem:[%s1202_s13 + $0x38] sm:$0xff] %v921_v6   ;;  %977 = vst [vmem:[%s1202_s13 + $0x78] sm:$0xff] %v961_v7  }
 0x11b   : > { %968 = vst [vmem:[%s1202_s13 + $0x30] sm:$0xff] %v916_v8   ;;  %976 = vst [vmem:[%s1202_s13 + $0x70] sm:$0xff] %v956_v9  }
 0x11c PF: > { %s13_s12 = sadd.s32 1, %s1104_s12  }
 0x11d   : > { %p10_p4 = scmp.ge.s32.totalorder %s13_s12, 4  }
 0x11f   :  { %12 = sbr.rel (!%p10_p4) target bundleno = 1 (0x1), region = 62 }

// kernel: wdm_classifier_tiny.6
= control target key start
LH: loop header
LB: loop body
LE: loop exit
PB: predicated region body
PF: predicated region fallthrough
CT: control target
= control target key end

     0   :  { %s4192_s12 = smov 0   ;;  %s4194_s13 = smov 0   ;;  %s4725_s0 = inlined_call_operand.vmem [shape: bf16[5,512,128], index: 0, kind: input, shape index: {}]   ;;  %s4726_s1 = inlined_call_operand.vmem [shape: bf16[5,128,128], index: 1, kind: input, shape index: {}]   ;;  %s4727_s2 = inlined_call_operand.vmem [shape: f32[1,128], index: 2, kind: input, shape index: {}]   ;;  %s4728_s3 = inlined_call_operand.vmem [shape: bf16[512,128], index: 3, kind: output, shape index: {}]  }
   0x1   :  { %s4196_s14 = smov 0  }
   0x2 LB: > { %s3014_s15 = sadd.s32 4294967295, %s4170_s14   ;;  %s4209_s16 = sadd.s32 1, %s4170_s14   ;;  %s4170_s14 = sphi %s4196_s14, %s4731_s14   ;;  %s4166_s13 = sphi %s4194_s13, %s4730_s13   ;;  %s4162_s12 = sphi %s4192_s12, %s4729_s12  }
   0x3   : > { %s17_s17 = ssub.s32 %s4170_s14, %s4209_s16  ;;  %s20_s18 = sadd.s32 1, %s4166_s13 }
   0x4   : > { %p18_p0 = scmp.eq.s32.totalorder %s17_s17, 0  ;;  %p27_p1 = scmp.ne.s32.totalorder %s4166_s13, %s4162_s12 }
   0x5   : > { %p28_p2 = scmp.eq.s32.totalorder %s4170_s14, 0  ;;  %p3017_p4 = scmp.ge.s32.totalorder %s4170_s14, 2 }
   0x6   : > { %s4218_s19 = scalar_select %p18_p0, %s4166_s13, %s20_s18  }
   0x7   : > { %p29_p3 = por %p28_p2, %p27_p1  ;;  %127 = sbr.rel (%p3017_p4) target bundleno = 59 (0x3b), region = 24 }
   0xe   : > { %130 = sbr.rel (!%p29_p3) target bundleno = 59 (0x3b), region = 28  ;;  %s132_s20 = sand.u32 (%p29_p3), 1, %s4166_s13  }
   0xf   : > { %s3370_s21 = sshll.u32 (%p29_p3), %s4170_s14, 7  ;;  %s4002_s22 = smul.u32 (%p29_p3), 640, %s132_s20 }
  0x10   : > { %s4226_s25 = scalar_lea.vmem (%p29_p3), %s4725_s0, %s3370_s21 }
  0x11   : > { %v153_v0 = vld [vmem:[%s4226_s25] sm:$0xff] (%p29_p3)   ;;  %v157_v1 = vld [vmem:[%s4226_s25 + $0x8] sm:$0xff] (%p29_p3)   ;;  %v161_v2 = vld [vmem:[%s4226_s25 + $0x10] sm:$0xff] (%p29_p3)   ;;  %s4234_s26 = scalar_lea.vmem (%p29_p3), [#allocation2], %s4002_s22 }
  0x12   : > { %v165_v3 = vld [vmem:[%s4226_s25 + $0x18] sm:$0xff] (%p29_p3)   ;;  %v169_v4 = vld [vmem:[%s4226_s25 + $0x20] sm:$0xff] (%p29_p3)   ;;  %v173_v5 = vld [vmem:[%s4226_s25 + $0x28] sm:$0xff] (%p29_p3)   ;;  %154 = vst [vmem:[%s4234_s26] sm:$0xff] (%p29_p3), %v153_v0  }
  0x13   : > { %158 = vst [vmem:[%s4234_s26 + $0x8] sm:$0xff] (%p29_p3), %v157_v1   ;;  %162 = vst [vmem:[%s4234_s26 + $0x10] sm:$0xff] (%p29_p3), %v161_v2   ;;  %v177_v6 = vld [vmem:[%s4226_s25 + $0x30] sm:$0xff] (%p29_p3)   ;;  %v181_v7 = vld [vmem:[%s4226_s25 + $0x38] sm:$0xff] (%p29_p3)  }
  0x14   : > { %166 = vst [vmem:[%s4234_s26 + $0x18] sm:$0xff] (%p29_p3), %v165_v3   ;;  %170 = vst [vmem:[%s4234_s26 + $0x20] sm:$0xff] (%p29_p3), %v169_v4   ;;  %v185_v8 = vld [vmem:[%s4226_s25 + $0x40] sm:$0xff] (%p29_p3)   ;;  %v189_v9 = vld [vmem:[%s4226_s25 + $0x48] sm:$0xff] (%p29_p3)  }
  0x15   : > { %174 = vst [vmem:[%s4234_s26 + $0x28] sm:$0xff] %v173_v5   ;;  %178 = vst [vmem:[%s4234_s26 + $0x30] sm:$0xff] %v177_v6   ;;  %v193_v10 = vld [vmem:[%s4226_s25 + $0x50] sm:$0xff]   ;;  %v197_v11 = vld [vmem:[%s4226_s25 + $0x58] sm:$0xff]  }
  0x16   : > { %182 = vst [vmem:[%s4234_s26 + $0x38] sm:$0xff] %v181_v7   ;;  %186 = vst [vmem:[%s4234_s26 + $0x40] sm:$0xff] %v185_v8   ;;  %v201_v12 = vld [vmem:[%s4226_s25 + $0x60] sm:$0xff]   ;;  %v205_v13 = vld [vmem:[%s4226_s25 + $0x68] sm:$0xff]  }
  0x17   : > { %190 = vst [vmem:[%s4234_s26 + $0x48] sm:$0xff] %v189_v9   ;;  %194 = vst [vmem:[%s4234_s26 + $0x50] sm:$0xff] %v193_v10   ;;  %v209_v14 = vld [vmem:[%s4226_s25 + $0x70] sm:$0xff]   ;;  %v213_v15 = vld [vmem:[%s4226_s25 + $0x78] sm:$0xff]  }
  0x18   : > { %198 = vst [vmem:[%s4234_s26 + $0x58] sm:$0xff] %v197_v11   ;;  %202 = vst [vmem:[%s4234_s26 + $0x60] sm:$0xff] %v201_v12   ;;  %v217_v16 = vld [vmem:[%s4226_s25 + $0x100] sm:$0xff]   ;;  %v221_v17 = vld [vmem:[%s4226_s25 + $0x108] sm:$0xff]  }
  0x19   : > { %206 = vst [vmem:[%s4234_s26 + $0x68] sm:$0xff] %v205_v13   ;;  %210 = vst [vmem:[%s4234_s26 + $0x70] sm:$0xff] %v209_v14   ;;  %v225_v18 = vld [vmem:[%s4226_s25 + $0x110] sm:$0xff]   ;;  %v229_v19 = vld [vmem:[%s4226_s25 + $0x118] sm:$0xff]  }
  0x1a   : > { %214 = vst [vmem:[%s4234_s26 + $0x78] sm:$0xff] %v213_v15   ;;  %218 = vst [vmem:[%s4234_s26 + $0x80] sm:$0xff] %v217_v16   ;;  %v233_v20 = vld [vmem:[%s4226_s25 + $0x120] sm:$0xff]   ;;  %v237_v21 = vld [vmem:[%s4226_s25 + $0x128] sm:$0xff]  }
  0x1b   : > { %222 = vst [vmem:[%s4234_s26 + $0x88] sm:$0xff] %v221_v17   ;;  %226 = vst [vmem:[%s4234_s26 + $0x90] sm:$0xff] %v225_v18   ;;  %v241_v22 = vld [vmem:[%s4226_s25 + $0x130] sm:$0xff]   ;;  %v245_v23 = vld [vmem:[%s4226_s25 + $0x138] sm:$0xff]  }
  0x1c   : > { %230 = vst [vmem:[%s4234_s26 + $0x98] sm:$0xff] %v229_v19   ;;  %234 = vst [vmem:[%s4234_s26 + $0xa0] sm:$0xff] %v233_v20   ;;  %v249_v24 = vld [vmem:[%s4226_s25 + $0x140] sm:$0xff]   ;;  %v253_v25 = vld [vmem:[%s4226_s25 + $0x148] sm:$0xff]  }
  0x1d   : > { %238 = vst [vmem:[%s4234_s26 + $0xa8] sm:$0xff] %v237_v21   ;;  %242 = vst [vmem:[%s4234_s26 + $0xb0] sm:$0xff] %v241_v22   ;;  %v257_v26 = vld [vmem:[%s4226_s25 + $0x150] sm:$0xff]   ;;  %v261_v27 = vld [vmem:[%s4226_s25 + $0x158] sm:$0xff]  }
  0x1e   : > { %246 = vst [vmem:[%s4234_s26 + $0xb8] sm:$0xff] %v245_v23   ;;  %250 = vst [vmem:[%s4234_s26 + $0xc0] sm:$0xff] %v249_v24   ;;  %v265_v28 = vld [vmem:[%s4226_s25 + $0x160] sm:$0xff]   ;;  %v269_v29 = vld [vmem:[%s4226_s25 + $0x168] sm:$0xff]  }
  0x1f   : > { %254 = vst [vmem:[%s4234_s26 + $0xc8] sm:$0xff] %v253_v25   ;;  %258 = vst [vmem:[%s4234_s26 + $0xd0] sm:$0xff] %v257_v26   ;;  %v273_v30 = vld [vmem:[%s4226_s25 + $0x170] sm:$0xff]   ;;  %v277_v31 = vld [vmem:[%s4226_s25 + $0x178] sm:$0xff]  }
  0x20   : > { %262 = vst [vmem:[%s4234_s26 + $0xd8] sm:$0xff] %v261_v27   ;;  %266 = vst [vmem:[%s4234_s26 + $0xe0] sm:$0xff] %v265_v28   ;;  %v281_v32 = vld [vmem:[%s4226_s25 + $0x200] sm:$0xff]   ;;  %v285_v33 = vld [vmem:[%s4226_s25 + $0x208] sm:$0xff]  }
  0x21   : > { %270 = vst [vmem:[%s4234_s26 + $0xe8] sm:$0xff] %v269_v29   ;;  %274 = vst [vmem:[%s4234_s26 + $0xf0] sm:$0xff] %v273_v30   ;;  %v289_v34 = vld [vmem:[%s4226_s25 + $0x210] sm:$0xff]   ;;  %v293_v35 = vld [vmem:[%s4226_s25 + $0x218] sm:$0xff]  }
  0x22   : > { %278 = vst [vmem:[%s4234_s26 + $0xf8] sm:$0xff] %v277_v31   ;;  %282 = vst [vmem:[%s4234_s26 + $0x100] sm:$0xff] %v281_v32   ;;  %v297_v36 = vld [vmem:[%s4226_s25 + $0x220] sm:$0xff]   ;;  %v301_v37 = vld [vmem:[%s4226_s25 + $0x228] sm:$0xff]  }
  0x23   : > { %286 = vst [vmem:[%s4234_s26 + $0x108] sm:$0xff] %v285_v33   ;;  %290 = vst [vmem:[%s4234_s26 + $0x110] sm:$0xff] %v289_v34   ;;  %v305_v38 = vld [vmem:[%s4226_s25 + $0x230] sm:$0xff]   ;;  %v309_v39 = vld [vmem:[%s4226_s25 + $0x238] sm:$0xff]  }
  0x24   : > { %294 = vst [vmem:[%s4234_s26 + $0x118] sm:$0xff] %v293_v35   ;;  %298 = vst [vmem:[%s4234_s26 + $0x120] sm:$0xff] %v297_v36   ;;  %v313_v40 = vld [vmem:[%s4226_s25 + $0x240] sm:$0xff]   ;;  %v317_v41 = vld [vmem:[%s4226_s25 + $0x248] sm:$0xff]  }
  0x25   : > { %302 = vst [vmem:[%s4234_s26 + $0x128] sm:$0xff] %v301_v37   ;;  %306 = vst [vmem:[%s4234_s26 + $0x130] sm:$0xff] %v305_v38   ;;  %v321_v42 = vld [vmem:[%s4226_s25 + $0x250] sm:$0xff]   ;;  %v325_v43 = vld [vmem:[%s4226_s25 + $0x258] sm:$0xff]  }
  0x26   : > { %310 = vst [vmem:[%s4234_s26 + $0x138] sm:$0xff] %v309_v39   ;;  %314 = vst [vmem:[%s4234_s26 + $0x140] sm:$0xff] %v313_v40   ;;  %v329_v44 = vld [vmem:[%s4226_s25 + $0x260] sm:$0xff]   ;;  %v333_v45 = vld [vmem:[%s4226_s25 + $0x268] sm:$0xff]  }
  0x27   : > { %318 = vst [vmem:[%s4234_s26 + $0x148] sm:$0xff] %v317_v41   ;;  %322 = vst [vmem:[%s4234_s26 + $0x150] sm:$0xff] %v321_v42   ;;  %v337_v46 = vld [vmem:[%s4226_s25 + $0x270] sm:$0xff]   ;;  %v341_v47 = vld [vmem:[%s4226_s25 + $0x278] sm:$0xff]  }
  0x28   : > { %326 = vst [vmem:[%s4234_s26 + $0x158] sm:$0xff] %v325_v43   ;;  %330 = vst [vmem:[%s4234_s26 + $0x160] sm:$0xff] %v329_v44   ;;  %v345_v48 = vld [vmem:[%s4226_s25 + $0x300] sm:$0xff]   ;;  %v349_v49 = vld [vmem:[%s4226_s25 + $0x308] sm:$0xff]  }
  0x29   : > { %334 = vst [vmem:[%s4234_s26 + $0x168] sm:$0xff] %v333_v45   ;;  %338 = vst [vmem:[%s4234_s26 + $0x170] sm:$0xff] %v337_v46   ;;  %v353_v50 = vld [vmem:[%s4226_s25 + $0x310] sm:$0xff]   ;;  %v357_v51 = vld [vmem:[%s4226_s25 + $0x318] sm:$0xff]  }
  0x2a   : > { %342 = vst [vmem:[%s4234_s26 + $0x178] sm:$0xff] %v341_v47   ;;  %346 = vst [vmem:[%s4234_s26 + $0x180] sm:$0xff] %v345_v48   ;;  %v361_v52 = vld [vmem:[%s4226_s25 + $0x320] sm:$0xff]   ;;  %v365_v53 = vld [vmem:[%s4226_s25 + $0x328] sm:$0xff]  }
  0x2b   : > { %350 = vst [vmem:[%s4234_s26 + $0x188] sm:$0xff] %v349_v49   ;;  %354 = vst [vmem:[%s4234_s26 + $0x190] sm:$0xff] %v353_v50   ;;  %v369_v54 = vld [vmem:[%s4226_s25 + $0x330] sm:$0xff]   ;;  %v373_v55 = vld [vmem:[%s4226_s25 + $0x338] sm:$0xff]  }
  0x2c   : > { %358 = vst [vmem:[%s4234_s26 + $0x198] sm:$0xff] %v357_v51   ;;  %362 = vst [vmem:[%s4234_s26 + $0x1a0] sm:$0xff] %v361_v52   ;;  %v377_v56 = vld [vmem:[%s4226_s25 + $0x340] sm:$0xff]   ;;  %v381_v57 = vld [vmem:[%s4226_s25 + $0x348] sm:$0xff]  }
  0x2d   : > { %366 = vst [vmem:[%s4234_s26 + $0x1a8] sm:$0xff] %v365_v53   ;;  %370 = vst [vmem:[%s4234_s26 + $0x1b0] sm:$0xff] %v369_v54   ;;  %v385_v58 = vld [vmem:[%s4226_s25 + $0x350] sm:$0xff]   ;;  %v389_v59 = vld [vmem:[%s4226_s25 + $0x358] sm:$0xff]  }
  0x2e   : > { %374 = vst [vmem:[%s4234_s26 + $0x1b8] sm:$0xff] %v373_v55   ;;  %378 = vst [vmem:[%s4234_s26 + $0x1c0] sm:$0xff] %v377_v56   ;;  %v393_v60 = vld [vmem:[%s4226_s25 + $0x360] sm:$0xff]   ;;  %v397_v61 = vld [vmem:[%s4226_s25 + $0x368] sm:$0xff]  }
  0x2f   : > { %382 = vst [vmem:[%s4234_s26 + $0x1c8] sm:$0xff] %v381_v57   ;;  %386 = vst [vmem:[%s4234_s26 + $0x1d0] sm:$0xff] %v385_v58   ;;  %v401_v62 = vld [vmem:[%s4226_s25 + $0x370] sm:$0xff]   ;;  %v405_v63 = vld [vmem:[%s4226_s25 + $0x378] sm:$0xff]  }
  0x30   : > { %390 = vst [vmem:[%s4234_s26 + $0x1d8] sm:$0xff] %v389_v59   ;;  %394 = vst [vmem:[%s4234_s26 + $0x1e0] sm:$0xff] %v393_v60   ;;  %v409_v0 = vld [vmem:[%s4226_s25 + $0x400] sm:$0xff]   ;;  %v413_v1 = vld [vmem:[%s4226_s25 + $0x408] sm:$0xff]  }
  0x31   : > { %398 = vst [vmem:[%s4234_s26 + $0x1e8] sm:$0xff] %v397_v61   ;;  %402 = vst [vmem:[%s4234_s26 + $0x1f0] sm:$0xff] %v401_v62   ;;  %v417_v2 = vld [vmem:[%s4226_s25 + $0x410] sm:$0xff]   ;;  %v421_v3 = vld [vmem:[%s4226_s25 + $0x418] sm:$0xff]  }
  0x32   : > { %406 = vst [vmem:[%s4234_s26 + $0x1f8] sm:$0xff] %v405_v63   ;;  %410 = vst [vmem:[%s4234_s26 + $0x200] sm:$0xff] %v409_v0   ;;  %v425_v4 = vld [vmem:[%s4226_s25 + $0x420] sm:$0xff]   ;;  %v429_v5 = vld [vmem:[%s4226_s25 + $0x428] sm:$0xff]  }
  0x33   : > { %414 = vst [vmem:[%s4234_s26 + $0x208] sm:$0xff] %v413_v1   ;;  %418 = vst [vmem:[%s4234_s26 + $0x210] sm:$0xff] %v417_v2   ;;  %v433_v6 = vld [vmem:[%s4226_s25 + $0x430] sm:$0xff]   ;;  %v437_v7 = vld [vmem:[%s4226_s25 + $0x438] sm:$0xff]  }
  0x34   : > { %422 = vst [vmem:[%s4234_s26 + $0x218] sm:$0xff] %v421_v3   ;;  %426 = vst [vmem:[%s4234_s26 + $0x220] sm:$0xff] %v425_v4   ;;  %v441_v8 = vld [vmem:[%s4226_s25 + $0x440] sm:$0xff]   ;;  %v445_v9 = vld [vmem:[%s4226_s25 + $0x448] sm:$0xff]  }
  0x35   : > { %430 = vst [vmem:[%s4234_s26 + $0x228] sm:$0xff] %v429_v5   ;;  %434 = vst [vmem:[%s4234_s26 + $0x230] sm:$0xff] %v433_v6   ;;  %v449_v10 = vld [vmem:[%s4226_s25 + $0x450] sm:$0xff]   ;;  %v453_v11 = vld [vmem:[%s4226_s25 + $0x458] sm:$0xff]  }
  0x36   : > { %438 = vst [vmem:[%s4234_s26 + $0x238] sm:$0xff] %v437_v7   ;;  %442 = vst [vmem:[%s4234_s26 + $0x240] sm:$0xff] %v441_v8   ;;  %v457_v12 = vld [vmem:[%s4226_s25 + $0x460] sm:$0xff]   ;;  %v461_v13 = vld [vmem:[%s4226_s25 + $0x468] sm:$0xff]  }
  0x37   : > { %446 = vst [vmem:[%s4234_s26 + $0x248] sm:$0xff] %v445_v9   ;;  %450 = vst [vmem:[%s4234_s26 + $0x250] sm:$0xff] %v449_v10   ;;  %v465_v14 = vld [vmem:[%s4226_s25 + $0x470] sm:$0xff]   ;;  %v469_v15 = vld [vmem:[%s4226_s25 + $0x478] sm:$0xff]  }
  0x38   : > { %454 = vst [vmem:[%s4234_s26 + $0x258] sm:$0xff] %v453_v11   ;;  %458 = vst [vmem:[%s4234_s26 + $0x260] sm:$0xff] %v457_v12  }
  0x39   : > { %462 = vst [vmem:[%s4234_s26 + $0x268] sm:$0xff] %v461_v13   ;;  %466 = vst [vmem:[%s4234_s26 + $0x270] sm:$0xff] %v465_v14  }
  0x3a   : > { %470 = vst [vmem:[%s4234_s26 + $0x278] sm:$0xff] %v469_v15  }
  0x3b PF: > { %p3020_p5 = scmp.ge.s32.totalorder %s4170_s14, 1  ;;  %p814_p6 = scmp.lt.s32.totalorder %s4170_s14, 3 }
  0x3d   : > { %p815_p7 = pnand %p3020_p5, %p814_p6 }
  0x3e   : > { %v4028_v16 = vld [vmem:[%s4726_s1 + $0x40] sm:$0xff] (!%p815_p7)   ;;  %v4030_v18 = vld [vmem:[%s4726_s1 + $0x48] sm:$0xff] (!%p815_p7)   ;;  %v4032_v20 = vld [vmem:[%s4726_s1 + $0x50] sm:$0xff] (!%p815_p7)   ;;  %s821_s17 = sand.u32 (!%p815_p7), 1, %s4162_s12  }
  0x3f   : > { %818 = sbr.rel (%p815_p7) target bundleno = 472 (0x1d8), region = 69  ;;  %v4398_v17 = vld [vmem:[%s4726_s1 + $0x80] sm:$0xff] (!%p815_p7)   ;;  %3618 = vmatprep.subr.bf16.mxu1 (!%p815_p7), %v4028_v16  ;;  %v4407_v19 = vld [vmem:[%s4726_s1 + $0x88] sm:$0xff] (!%p815_p7)   ;;  %v4417_v21 = vld [vmem:[%s4726_s1 + $0x90] sm:$0xff] (!%p815_p7)  }
  0x40   : > { %3714 = vmatprep.subr.bf16.mxu0 (!%p815_p7), %v4398_v17  ;;  %3619 = vmatpush3.bf16.msra.mxu1 (!%p815_p7), %v4028_v16  ;;  %v4034_v22 = vld [vmem:[%s4726_s1 + $0x58] sm:$0xff] (!%p815_p7)   ;;  %s4003_s23 = smul.u32 (!%p815_p7), 640, %s821_s17  ;;  %v4036_v24 = vld [vmem:[%s4726_s1 + $0x60] sm:$0xff] (!%p815_p7)   ;;  %v4038_v26 = vld [vmem:[%s4726_s1 + $0x68] sm:$0xff] (!%p815_p7)  }
  0x41   : > { %3715 = vmatpush3.bf16.msra.mxu0 (!%p815_p7), %v4398_v17  ;;  %3620 = vmatprep.subr.bf16.mxu1 (!%p815_p7), %v4030_v18  ;;  %v4428_v23 = vld [vmem:[%s4726_s1 + $0x98] sm:$0xff] (!%p815_p7)   ;;  %v4438_v25 = vld [vmem:[%s4726_s1 + $0xa0] sm:$0xff] (!%p815_p7)   ;;  %v4446_v27 = vld [vmem:[%s4726_s1 + $0xa8] sm:$0xff] (!%p815_p7)  }
  0x42   : > { %3716 = vmatprep.subr.bf16.mxu0 (!%p815_p7), %v4407_v19  ;;  %s4449_s4 = scalar_lea.vmem (!%p815_p7), [#allocation2], %s4003_s23  ;;  %v4040_v30 = vld [vmem:[%s4726_s1 + $0x70] sm:$0xff] (!%p815_p7)   ;;  %v4042_v32 = vld [vmem:[%s4726_s1 + $0x78] sm:$0xff] (!%p815_p7)   ;;  %v4047_v35 = vld [vmem:[%s4726_s1] sm:$0xff] (!%p815_p7)  }
  0x43   : > { %v4044_v28 = vld [vmem:[%s4449_s4 + $0x80] sm:$0xff] (!%p815_p7)   ;;  %v4462_v31 = vld [vmem:[%s4726_s1 + $0xb0] sm:$0xff] (!%p815_p7)   ;;  %v4472_v33 = vld [vmem:[%s4726_s1 + $0xb8] sm:$0xff] (!%p815_p7)  }
  0x44   : > { %3621 = vmatpush3.bf16.msra.mxu1 (!%p815_p7), %v4030_v18  ;;  %v4045_v29 = vld [vmem:[%s4449_s4 + $0x100] sm:$0xff] (!%p815_p7)   ;;  %3634 = vmatprep.mubr.bf16.mxu1 (!%p815_p7), %v4044_v28  ;;  %v4046_v34 = vld [vmem:[%s4449_s4 + $0x88] sm:$0xff] (!%p815_p7)   ;;  %v4051_v39 = vld [vmem:[%s4449_s4 + $0x90] sm:$0xff] (!%p815_p7)  }
  0x45   : > { %3717 = vmatpush3.bf16.msra.mxu0 (!%p815_p7), %v4407_v19  ;;  %3622 = vmatprep.subr.bf16.mxu1 (!%p815_p7), %v4032_v20  ;;  %v4049_v36 = vld [vmem:[%s4726_s1 + $0xc0] sm:$0xff] (!%p815_p7)   ;;  %v4048_v37 = vld [vmem:[%s4449_s4 + $0x108] sm:$0xff] (!%p815_p7)   ;;  %v4052_v40 = vld [vmem:[%s4449_s4 + $0x110] sm:$0xff] (!%p815_p7)  }
  0x46   : > { %3718 = vmatprep.subr.bf16.mxu0 %v4417_v21  ;;  %3730 = vmatprep.mubr.bf16.mxu0 %v4045_v29  ;;  %v4050_v38 = vld [vmem:[%s4726_s1 + $0xc8] sm:$0xff]   ;;  %v4053_v42 = vld [vmem:[%s4449_s4 + $0x98] sm:$0xff]   ;;  %v4061_v43 = vld [vmem:[%s4726_s1 + $0x10] sm:$0xff]  }
  0x47   : > { %v4054_v41 = vld [vmem:[%s4726_s1 + $0x8] sm:$0xff]   ;;  %v4056_v44 = vld [vmem:[%s4726_s1 + $0xd0] sm:$0xff]   ;;  %v4055_v45 = vld [vmem:[%s4449_s4 + $0x118] sm:$0xff]  }
  0x48   : > { %3623 = vmatpush3.bf16.msra.mxu1 %v4032_v20  ;;  %v4058_v46 = vld [vmem:[%s4449_s4 + $0xa0] sm:$0xff]   ;;  %v4057_v48 = vld [vmem:[%s4726_s1 + $0xd8] sm:$0xff]   ;;  %v4060_v50 = vld [vmem:[%s4449_s4 + $0xa8] sm:$0xff]  }
  0x49   : > { %3719 = vmatpush3.bf16.msra.mxu0 %v4417_v21  ;;  %3624 = vmatprep.subr.bf16.mxu1 %v4034_v22  ;;  %v4059_v47 = vld [vmem:[%s4449_s4 + $0x120] sm:$0xff]   ;;  %v4068_v49 = vld [vmem:[%s4726_s1 + $0x18] sm:$0xff]   ;;  %v4062_v51 = vld [vmem:[%s4449_s4 + $0x128] sm:$0xff]  }
  0x4a   : > { %3720 = vmatprep.subr.bf16.mxu0 %v4428_v23  ;;  %v4063_v52 = vld [vmem:[%s4726_s1 + $0xe0] sm:$0xff]   ;;  %v4065_v53 = vld [vmem:[%s4449_s4 + $0xb0] sm:$0xff]   ;;  %v4064_v56 = vld [vmem:[%s4726_s1 + $0xe8] sm:$0xff]  }
  0x4b   : > { %v4075_v54 = vld [vmem:[%s4726_s1 + $0x20] sm:$0xff]   ;;  %v4066_v55 = vld [vmem:[%s4449_s4 + $0x130] sm:$0xff]   ;;  %v4067_v57 = vld [vmem:[%s4449_s4 + $0xb8] sm:$0xff]  }
  0x4c   : > { %3625 = vmatpush3.bf16.msra.mxu1 %v4034_v22  ;;  %v4070_v58 = vld [vmem:[%s4726_s1 + $0xf0] sm:$0xff]   ;;  %v4081_v59 = vld [vmem:[%s4726_s1 + $0x28] sm:$0xff]   ;;  %v4069_v60 = vld [vmem:[%s4449_s4 + $0x138] sm:$0xff]  }
  0x4d   : > { %3721 = vmatpush3.bf16.msra.mxu0 %v4428_v23  ;;  %3626 = vmatprep.subr.bf16.mxu1 %v4036_v24  ;;  %v4072_v61 = vld [vmem:[%s4449_s4 + $0xc0] sm:$0xff]   ;;  %v4071_v63 = vld [vmem:[%s4726_s1 + $0xf8] sm:$0xff]   ;;  %v4087_v0 = vld [vmem:[%s4726_s1 + $0x30] sm:$0xff]  }
  0x4e   : > { %3722 = vmatprep.subr.bf16.mxu0 %v4438_v25  ;;  %v4073_v62 = vld [vmem:[%s4449_s4 + $0x180] sm:$0xff]   ;;  %v4074_v1 = vld [vmem:[%s4449_s4 + $0xc8] sm:$0xff]   ;;  %v4078_v4 = vld [vmem:[%s4449_s4 + $0xd0] sm:$0xff]  }
  0x4f   : > { %v4076_v2 = vld [vmem:[%s4449_s4 + $0x188] sm:$0xff]   ;;  %v4077_v3 = vld [vmem:[%s4726_s1 + $0x100] sm:$0xff]   ;;  %v4079_v5 = vld [vmem:[%s4449_s4 + $0x190] sm:$0xff]  }
  0x50   : > { %3627 = vmatpush3.bf16.msra.mxu1 %v4036_v24  ;;  %v4083_v6 = vld [vmem:[%s4726_s1 + $0x108] sm:$0xff]   ;;  %v4093_v7 = vld [vmem:[%s4726_s1 + $0x38] sm:$0xff]   ;;  %v4089_v9 = vld [vmem:[%s4726_s1 + $0x110] sm:$0xff]  }
  0x51   : > { %3723 = vmatpush3.bf16.msra.mxu0 %v4438_v25  ;;  %3628 = vmatprep.subr.bf16.mxu1 %v4038_v26  ;;  %v4080_v8 = vld [vmem:[%s4449_s4 + $0xd8] sm:$0xff]   ;;  %v4084_v11 = vld [vmem:[%s4449_s4 + $0xe0] sm:$0xff]   ;;  %v4086_v14 = vld [vmem:[%s4449_s4 + $0xe8] sm:$0xff]  }
  0x52   : > { %3724 = vmatprep.subr.bf16.mxu0 %v4446_v27  ;;  %v4082_v10 = vld [vmem:[%s4449_s4 + $0x198] sm:$0xff]   ;;  %v4085_v12 = vld [vmem:[%s4449_s4 + $0x1a0] sm:$0xff]   ;;  %v4088_v16 = vld [vmem:[%s4449_s4 + $0x1a8] sm:$0xff]  }
  0x53   : > { %v4095_v13 = vld [vmem:[%s4726_s1 + $0x118] sm:$0xff]   ;;  %v4100_v15 = vld [vmem:[%s4726_s1 + $0x120] sm:$0xff]   ;;  %v4090_v18 = vld [vmem:[%s4449_s4 + $0xf0] sm:$0xff]  }
  0x54   : > { %3629 = vmatpush3.bf16.msra.mxu1 %v4038_v26  ;;  %v4091_v20 = vld [vmem:[%s4449_s4 + $0x1b0] sm:$0xff]   ;;  %v4105_v22 = vld [vmem:[%s4726_s1 + $0x128] sm:$0xff]   ;;  %v4092_v24 = vld [vmem:[%s4449_s4 + $0xf8] sm:$0xff]  }
  0x55   : > { %3725 = vmatpush3.bf16.msra.mxu0 %v4446_v27  ;;  %3630 = vmatprep.subr.bf16.mxu1 %v4040_v30  ;;  %v4110_v26 = vld [vmem:[%s4726_s1 + $0x130] sm:$0xff]   ;;  %v4094_v28 = vld [vmem:[%s4449_s4 + $0x1b8] sm:$0xff]   ;;  %v4096_v29 = vld [vmem:[%s4449_s4] sm:$0xff]  }
  0x56   : > { %3726 = vmatprep.subr.bf16.mxu0 %v4462_v31 }
  0x58   : > { %3631 = vmatpush3.bf16.msra.mxu1 %v4040_v30  ;;  %v4097_v30 = vld [vmem:[%s4449_s4 + $0x1c0] sm:$0xff]  }
  0x59   : > { %3727 = vmatpush3.bf16.msra.mxu0 %v4462_v31  ;;  %3632 = vmatprep.subr.bf16.mxu1 %v4042_v32 }
  0x5a   : > { %3728 = vmatprep.subr.bf16.mxu0 %v4472_v33 }
  0x5c   : > { %3633 = vmatpush3.bf16.msra.mxu1 %v4042_v32  ;;  %v4115_v32 = vld [vmem:[%s4726_s1 + $0x138] sm:$0xff]  }
  0x5d   : > { %3729 = vmatpush3.bf16.msra.mxu0 %v4472_v33  ;;  %3666 = vmatprep.subr.bf16.mxu1 %v4047_v35 }
  0x5e   : > { %3762 = vmatprep.subr.bf16.mxu0 %v4049_v36 }
  0x5f   : > { %3635 = vmatmul.mubr.bf16.vlgmr.msra.gmra.mrb[0].mxu1 %v4046_v34  ;;  %v4098_v34 = vld [vmem:[%s4449_s4 + $0x8] sm:$0xff]  }
  0x60   : > { %3731 = vmatmul.mubr.bf16.vlgmr.msra.gmra.mrb[0].mxu0 %v4048_v37  ;;  %3667 = vmatpush3.bf16.msra.mxu1 %v4047_v35  ;;  %v4099_v35 = vld [vmem:[%s4449_s4 + $0x1c8] sm:$0xff]   ;;  %v4102_v37 = vld [vmem:[%s4449_s4 + $0x1d0] sm:$0xff]  }
  0x61   : > { %3763 = vmatpush3.bf16.msra.mxu0 %v4049_v36  ;;  %3638 = vmatprep.mubr.bf16.mxu1 %v4051_v39  ;;  %v4101_v36 = vld [vmem:[%s4449_s4 + $0x10] sm:$0xff]   ;;  %v4104_v39 = vld [vmem:[%s4449_s4 + $0x1d8] sm:$0xff]  }
  0x62   : > { %3764 = vmatprep.subr.bf16.mxu0 %v4050_v38  ;;  %3734 = vmatprep.mubr.bf16.mxu0 %v4052_v40  ;;  %v4106_v40 = vld [vmem:[%s4449_s4 + $0x20] sm:$0xff]  }
  0x63   : > { %3668 = vmatprep.subr.bf16.mxu1 %v4054_v41 }
  0x64   : > { %3669 = vmatpush3.bf16.msra.mxu1 %v4054_v41  ;;  %v4107_v41 = vld [vmem:[%s4449_s4 + $0x1e0] sm:$0xff]  }
  0x65   : > { %3765 = vmatpush3.bf16.msra.mxu0 %v4050_v38  ;;  %3670 = vmatprep.subr.bf16.mxu1 %v4061_v43  ;;  %v4103_v38 = vld [vmem:[%s4449_s4 + $0x18] sm:$0xff]  }
  0x66   : > { %3766 = vmatprep.subr.bf16.mxu0 %v4056_v44 }
  0x67   : > { %3639 = vmatmul.mubr.bf16.gmra.mrb[4].mxu1 %v4053_v42  ;;  %v4109_v42 = vld [vmem:[%s4449_s4 + $0x1e8] sm:$0xff]  }
  0x68   : > { %3735 = vmatmul.mubr.bf16.gmra.mrb[4].mxu0 %v4055_v45  ;;  %3642 = vmatprep.mubr.bf16.mxu1 %v4058_v46  ;;  %v4116_v45 = vld [vmem:[%s4449_s4 + $0x40] sm:$0xff]  }
  0x69   : > { %3767 = vmatpush3.bf16.msra.mxu0 %v4056_v44  ;;  %3738 = vmatprep.mubr.bf16.mxu0 %v4059_v47  ;;  %v4114_v44 = vld [vmem:[%s4449_s4 + $0x1f8] sm:$0xff]   ;;  %v4117_v46 = vld [vmem:[%s4449_s4 + $0x200] sm:$0xff]   ;;  %v4120_v47 = vld [vmem:[%s4449_s4 + $0x50] sm:$0xff]  }
  0x6a   : > { %3768 = vmatprep.subr.bf16.mxu0 %v4057_v48  ;;  %3671 = vmatpush3.bf16.msra.mxu1 %v4061_v43  ;;  %v4111_v43 = vld [vmem:[%s4449_s4 + $0x30] sm:$0xff]  }
  0x6b   : > { %3672 = vmatprep.subr.bf16.mxu1 %v4068_v49 }
  0x6d   : > { %3769 = vmatpush3.bf16.msra.mxu0 %v4057_v48  ;;  %v4122_v48 = vld [vmem:[%s4449_s4 + $0x58] sm:$0xff]  }
  0x6e   : > { %3770 = vmatprep.subr.bf16.mxu0 %v4063_v52  ;;  %3673 = vmatpush3.bf16.msra.mxu1 %v4068_v49  ;;  %v4123_v49 = vld [vmem:[%s4449_s4 + $0x218] sm:$0xff]  }
  0x6f   : > { %3643 = vmatmul.mubr.bf16.gmra.mrb[8].mxu1 %v4060_v50  ;;  %3674 = vmatprep.subr.bf16.mxu1 %v4075_v54  ;;  %v4125_v50 = vld [vmem:[%s4449_s4 + $0x220] sm:$0xff]  }
  0x70   : > { %3739 = vmatmul.mubr.bf16.gmra.mrb[8].mxu0 %v4062_v51  ;;  %3646 = vmatprep.mubr.bf16.mxu1 %v4065_v53  ;;  %v4126_v51 = vld [vmem:[%s4449_s4 + $0x68] sm:$0xff]   ;;  %v4129_v53 = vld [vmem:[%s4449_s4 + $0x230] sm:$0xff]  }
  0x71   : > { %3771 = vmatpush3.bf16.msra.mxu0 %v4063_v52  ;;  %3742 = vmatprep.mubr.bf16.mxu0 %v4066_v55  ;;  %v4128_v52 = vld [vmem:[%s4449_s4 + $0x70] sm:$0xff]   ;;  %v4131_v55 = vld [vmem:[%s4449_s4 + $0x238] sm:$0xff]  }
  0x72   : > { %3772 = vmatprep.subr.bf16.mxu0 %v4064_v56  ;;  %3675 = vmatpush3.bf16.msra.mxu1 %v4075_v54  ;;  %v4130_v54 = vld [vmem:[%s4449_s4 + $0x78] sm:$0xff]  }
  0x73   : > { %3676 = vmatprep.subr.bf16.mxu1 %v4081_v59 }
  0x75   : > { %3773 = vmatpush3.bf16.msra.mxu0 %v4064_v56  ;;  %v4132_v56 = vld [vmem:[%s4449_s4 + $0x140] sm:$0xff]  }
  0x76   : > { %3774 = vmatprep.subr.bf16.mxu0 %v4070_v58  ;;  %3677 = vmatpush3.bf16.msra.mxu1 %v4081_v59  ;;  %v4135_v59 = vld [vmem:[%s4449_s4 + $0x248] sm:$0xff]  }
  0x77   : > { %3647 = vmatmul.mubr.bf16.gmra.mrb[12].mxu1 %v4067_v57  ;;  %3678 = vmatprep.subr.bf16.mxu1 %v4087_v0  ;;  %v4133_v57 = vld [vmem:[%s4449_s4 + $0x240] sm:$0xff]  }
  0x78   : > { %3743 = vmatmul.mubr.bf16.gmra.mrb[12].mxu0 %v4069_v60  ;;  %3650 = vmatprep.mubr.bf16.mxu1 %v4072_v61  ;;  %v4136_v60 = vld [vmem:[%s4449_s4 + $0x150] sm:$0xff]  }
  0x79   : > { %3775 = vmatpush3.bf16.msra.mxu0 %v4070_v58  ;;  %3778 = vmatprep.mubr.bf16.mxu0 %v4073_v62  ;;  %v4134_v58 = vld [vmem:[%s4449_s4 + $0x148] sm:$0xff]   ;;  %v4137_v61 = vld [vmem:[%s4449_s4 + $0x250] sm:$0xff]   ;;  %v4138_v62 = vld [vmem:[%s4449_s4 + $0x158] sm:$0xff]  }
  0x7a   : > { %3776 = vmatprep.subr.bf16.mxu0 %v4071_v63  ;;  %3679 = vmatpush3.bf16.msra.mxu1 %v4087_v0  ;;  %v4140_v0 = vld [vmem:[%s4449_s4 + $0x160] sm:$0xff]  }
  0x7b   : > { %3680 = vmatprep.subr.bf16.mxu1 %v4093_v7 }
  0x7d   : > { %3777 = vmatpush3.bf16.msra.mxu0 %v4071_v63  ;;  %v4139_v63 = vld [vmem:[%s4449_s4 + $0x258] sm:$0xff]  }
  0x7e   : > { %3810 = vmatprep.subr.bf16.mxu0 %v4077_v3  ;;  %3681 = vmatpush3.bf16.msra.mxu1 %v4093_v7  ;;  %v4147_v7 = vld [vmem:[%s4449_s4 + $0x278] sm:$0xff]  }
  0x7f   : > { %3651 = vmatmul.mubr.bf16.gmra.mrb[16].mxu1 %v4074_v1  ;;  %3858 = vmatprep.subr.bf16.mxu1 %v4398_v17  ;;  %v4141_v1 = vld [vmem:[%s4449_s4 + $0x260] sm:$0xff]  }
  0x80   : > { %3779 = vmatmul.mubr.bf16.vlgmr.msra.gmra.mrb[0].mxu0 %v4076_v2  ;;  %3654 = vmatprep.mubr.bf16.mxu1 %v4078_v4  ;;  %v4142_v2 = vld [vmem:[%s4449_s4 + $0x168] sm:$0xff]   ;;  %v4144_v4 = vld [vmem:[%s4449_s4 + $0x170] sm:$0xff]  }
  0x81   : > { %3811 = vmatpush3.bf16.msra.mxu0 %v4077_v3  ;;  %3782 = vmatprep.mubr.bf16.mxu0 %v4079_v5  ;;  %v4143_v3 = vld [vmem:[%s4449_s4 + $0x268] sm:$0xff]   ;;  %v4145_v5 = vld [vmem:[%s4449_s4 + $0x270] sm:$0xff]  }
  0x82   : > { %3812 = vmatprep.subr.bf16.mxu0 %v4083_v6 }
  0x85   : > { %3813 = vmatpush3.bf16.msra.mxu0 %v4083_v6  ;;  %v4146_v6 = vld [vmem:[%s4449_s4 + $0x178] sm:$0xff]  }
  0x86   : > { %3814 = vmatprep.subr.bf16.mxu0 %v4089_v9 }
  0x87   : > { %3655 = vmatmul.mubr.bf16.gmra.mrb[20].mxu1 %v4080_v8 }
  0x88   : > { %3783 = vmatmul.mubr.bf16.gmra.mrb[4].mxu0 %v4082_v10  ;;  %3658 = vmatprep.mubr.bf16.mxu1 %v4084_v11 }
  0x89   : > { %3786 = vmatprep.mubr.bf16.mxu0 %v4085_v12  ;;  %3815 = vmatpush3.bf16.msra.mxu0 %v4089_v9 }
  0x8a   : > { %3816 = vmatprep.subr.bf16.mxu0 %v4095_v13 }
  0x8d   : > { %3817 = vmatpush3.bf16.msra.mxu0 %v4095_v13 }
  0x8e   : > { %3818 = vmatprep.subr.bf16.mxu0 %v4100_v15 }
  0x8f   : > { %3659 = vmatmul.mubr.bf16.gmra.mrb[24].mxu1 %v4086_v14 }
  0x90   : > { %3787 = vmatmul.mubr.bf16.gmra.mrb[8].mxu0 %v4088_v16  ;;  %3662 = vmatprep.mubr.bf16.mxu1 %v4090_v18 }
  0x91   : > { %3790 = vmatprep.mubr.bf16.mxu0 %v4091_v20  ;;  %3819 = vmatpush3.bf16.msra.mxu0 %v4100_v15 }
  0x92   : > { %3820 = vmatprep.subr.bf16.mxu0 %v4105_v22 }
  0x95   : > { %3821 = vmatpush3.bf16.msra.mxu0 %v4105_v22 }
  0x96   : > { %3822 = vmatprep.subr.bf16.mxu0 %v4110_v26 }
  0x97   : > { %3663 = vmatmul.mubr.bf16.gmra.mrb[28].mxu1 %v4092_v24 }
  0x98   : > { %3791 = vmatmul.mubr.bf16.gmra.mrb[12].mxu0 %v4094_v28  ;;  %3682 = vmatprep.mubr.bf16.mxu1 %v4096_v29 }
  0x99   : > { %3794 = vmatprep.mubr.bf16.mxu0 %v4097_v30  ;;  %3823 = vmatpush3.bf16.msra.mxu0 %v4110_v26 }
  0x9a   : > { %3824 = vmatprep.subr.bf16.mxu0 %v4115_v32 }
  0x9d   : > { %3825 = vmatpush3.bf16.msra.mxu0 %v4115_v32  ;;  %v4656_v32 = vld [vmem:[%s4727_s2] ss:$0 sm:$0xff] }
  0x9f   : > { %3683 = vmatmul.mubr.bf16.vlgmr.msra.gmra.mrb[0].mxu1 %v4098_v34 }
  0xa0   : > { %3795 = vmatmul.mubr.bf16.gmra.mrb[16].mxu0 %v4099_v35  ;;  %3866 = vmatpush3.bf16.msra.mxu1 %v4398_v17  ;;  %v4108_v17 = vld [vmem:[%s4449_s4 + $0x28] sm:$0xff]  }
  0xa1   : > { %3686 = vmatprep.mubr.bf16.mxu1 %v4101_v36  ;;  %3798 = vmatprep.mubr.bf16.mxu0 %v4102_v37 }
  0xa2   : > { %3859 = vmatprep.subr.bf16.mxu1 %v4407_v19 }
  0xa4   : > { %3867 = vmatpush3.bf16.msra.mxu1 %v4407_v19  ;;  %v4112_v19 = vld [vmem:[%s4449_s4 + $0x1f0] sm:$0xff]  }
  0xa5   : > { %3860 = vmatprep.subr.bf16.mxu1 %v4417_v21 }
  0xa7   : > { %3687 = vmatmul.mubr.bf16.gmra.mrb[4].mxu1 %v4103_v38 }
  0xa8   : > { %3799 = vmatmul.mubr.bf16.gmra.mrb[20].mxu0 %v4104_v39  ;;  %3690 = vmatprep.mubr.bf16.mxu1 %v4106_v40 }
  0xa9   : > { %3802 = vmatprep.mubr.bf16.mxu0 %v4107_v41  ;;  %3868 = vmatpush3.bf16.msra.mxu1 %v4417_v21  ;;  %v4113_v21 = vld [vmem:[%s4449_s4 + $0x38] sm:$0xff]  }
  0xaa   : > { %3861 = vmatprep.subr.bf16.mxu1 %v4428_v23 }
  0xad   : > { %3869 = vmatpush3.bf16.msra.mxu1 %v4428_v23  ;;  %v4118_v23 = vld [vmem:[%s4449_s4 + $0x48] sm:$0xff]  }
  0xae   : > { %3862 = vmatprep.subr.bf16.mxu1 %v4438_v25 }
  0xaf   : > { %3691 = vmatmul.mubr.bf16.gmra.mrb[8].mxu1 %v4108_v17 }
  0xb0   : > { %3803 = vmatmul.mubr.bf16.gmra.mrb[24].mxu0 %v4109_v42  ;;  %3694 = vmatprep.mubr.bf16.mxu1 %v4111_v43 }
  0xb1   : > { %3806 = vmatprep.mubr.bf16.mxu0 %v4112_v19  ;;  %3870 = vmatpush3.bf16.msra.mxu1 %v4438_v25  ;;  %v4119_v25 = vld [vmem:[%s4449_s4 + $0x208] sm:$0xff]  }
  0xb2   : > { %3863 = vmatprep.subr.bf16.mxu1 %v4446_v27 }
  0xb5   : > { %3871 = vmatpush3.bf16.msra.mxu1 %v4446_v27  ;;  %v4121_v27 = vld [vmem:[%s4449_s4 + $0x210] sm:$0xff]  }
  0xb6   : > { %3864 = vmatprep.subr.bf16.mxu1 %v4462_v31 }
  0xb7   : > { %3695 = vmatmul.mubr.bf16.gmra.mrb[12].mxu1 %v4113_v21 }
  0xb8   : > { %3807 = vmatmul.mubr.bf16.gmra.mrb[28].mxu0 %v4114_v44  ;;  %3698 = vmatprep.mubr.bf16.mxu1 %v4116_v45 }
  0xb9   : > { %3826 = vmatprep.mubr.bf16.mxu0 %v4117_v46  ;;  %3872 = vmatpush3.bf16.msra.mxu1 %v4462_v31  ;;  %v4124_v31 = vld [vmem:[%s4449_s4 + $0x60] sm:$0xff]  }
  0xba   : > { %3865 = vmatprep.subr.bf16.mxu1 %v4472_v33 }
  0xbd   : > { %3873 = vmatpush3.bf16.msra.mxu1 %v4472_v33  ;;  %v4127_v33 = vld [vmem:[%s4449_s4 + $0x228] sm:$0xff]   ;;  %s3021_s4 = sshll.u32 %s3014_s15, 5 }
  0xbe   : > { %p846_p8 = scmp.lt.s32.totalorder %s3021_s4, 63 }
  0xbf   : > { %3699 = vmatmul.mubr.bf16.gmra.mrb[16].mxu1 %v4118_v23 }
  0xc0   : > { %3827 = vmatmul.mubr.bf16.vlgmr.msra.gmra.mrb[0].mxu0 %v4119_v25  ;;  %3702 = vmatprep.mubr.bf16.mxu1 %v4120_v47  ;;  %s4733_s4 = smov (!%p846_p8, %s3021_s4), 63 }
  0xc1   : > { %3830 = vmatprep.mubr.bf16.mxu0 %v4121_v27  ;;  %s3022_s14 = sshll.u32 %s4733_s4, 2 }
  0xc2   : > { %s4665_s27 = scalar_lea.vmem %s4728_s3, %s3022_s14 }
  0xc7   : > { %3703 = vmatmul.mubr.bf16.gmra.mrb[20].mxu1 %v4122_v48 }
  0xc8   : > { %3831 = vmatmul.mubr.bf16.gmra.mrb[4].mxu0 %v4123_v49  ;;  %3706 = vmatprep.mubr.bf16.mxu1 %v4124_v31 }
  0xc9   : > { %3834 = vmatprep.mubr.bf16.mxu0 %v4125_v50 }
  0xcf   : > { %3707 = vmatmul.mubr.bf16.gmra.mrb[24].mxu1 %v4126_v51 }
  0xd0   : > { %3835 = vmatmul.mubr.bf16.gmra.mrb[8].mxu0 %v4127_v33  ;;  %3710 = vmatprep.mubr.bf16.mxu1 %v4128_v52 }
  0xd1   : > { %3838 = vmatprep.mubr.bf16.mxu0 %v4129_v53 }
  0xd7   : > { %3711 = vmatmul.mubr.bf16.gmra.mrb[28].mxu1 %v4130_v54 }
  0xd8   : > { %3839 = vmatmul.mubr.bf16.gmra.mrb[12].mxu0 %v4131_v55  ;;  %3746 = vmatprep.mubr.bf16.mxu1 %v4132_v56 }
  0xd9   : > { %3842 = vmatprep.mubr.bf16.mxu0 %v4133_v57 }
  0xdf   : > { %3747 = vmatmul.mubr.bf16.vlgmr.msra.gmra.mrb[16].mxu1 %v4134_v58 }
  0xe0   : > { %3843 = vmatmul.mubr.bf16.gmra.mrb[16].mxu0 %v4135_v59  ;;  %3750 = vmatprep.mubr.bf16.mxu1 %v4136_v60 }
  0xe1   : > { %3846 = vmatprep.mubr.bf16.mxu0 %v4137_v61 }
  0xe7   : > { %3751 = vmatmul.mubr.bf16.gmra.mrb[20].mxu1 %v4138_v62 }
  0xe8   : > { %3847 = vmatmul.mubr.bf16.gmra.mrb[20].mxu0 %v4139_v63  ;;  %3754 = vmatprep.mubr.bf16.mxu1 %v4140_v0 }
  0xe9   : > { %3850 = vmatprep.mubr.bf16.mxu0 %v4141_v1 }
  0xef   : > { %3755 = vmatmul.mubr.bf16.gmra.mrb[24].mxu1 %v4142_v2 }
  0xf0   : > { %3851 = vmatmul.mubr.bf16.gmra.mrb[24].mxu0 %v4143_v3  ;;  %3758 = vmatprep.mubr.bf16.mxu1 %v4144_v4 }
  0xf1   : > { %3854 = vmatprep.mubr.bf16.mxu0 %v4145_v5 }
  0xf7   : > { %3759 = vmatmul.mubr.bf16.gmra.mrb[28].mxu1 %v4146_v6 }
  0xf8   : > { %3855 = vmatmul.mubr.bf16.gmra.mrb[28].mxu0 %v4147_v7 }
 0x172   : > { %v3684_v8 = vpop.f32.mrb[0].mxu1 }
 0x173   : > { %v1433_v9 = vpop.f32.mrb[1].mxu1 }
 0x174   : > { %v3685_v10 = vpop.f32.mrb[2].mxu1 }
 0x175   : > { %v1436_v11 = vpop.f32.mrb[3].mxu1 }
 0x17a   : > { %v3688_v12 = vpop.f32.mrb[4].mxu1 }
 0x17b   : > { %v1449_v13 = vpop.f32.mrb[5].mxu1 }
 0x17c   : > { %v3689_v14 = vpop.f32.mrb[6].mxu1 }
 0x17d   : > { %v1452_v15 = vpop.f32.mrb[7].mxu1 }
 0x182   : > { %v3692_v16 = vpop.f32.mrb[8].mxu1 }
 0x183   : > { %v1465_v18 = vpop.f32.mrb[9].mxu1 }
 0x184   : > { %v3693_v20 = vpop.f32.mrb[10].mxu1 }
 0x185   : > { %v1468_v22 = vpop.f32.mrb[11].mxu1 }
 0x18a   : > { %v4643_v24 = vpop.f32.mrb[12].mxu1 }
 0x18b   : > { %v4645_v26 = vpop.f32.mrb[13].mxu1 }
 0x18c   : > { %v4647_v28 = vpop.f32.mrb[14].mxu1 }
 0x18d   : > { %v4649_v29 = vpop.f32.mrb[15].mxu1 }
 0x193   : > { %v3828_v30 = vpop.f32.mrb[0].mxu0 }
 0x194   : > { %v3874_v34 = vadd.f32 %v3828_v30, %v3684_v8  ;;  %v2562_v35 = vpop.f32.mrb[1].mxu0 }
 0x195   : > { %v3875_v36 = vadd.f32 %v2562_v35, %v1433_v9  ;;  %v3829_v37 = vpop.f32.mrb[2].mxu0 }
 0x196   : > { %v2730_v38 = vadd.f32 %v3874_v34, %v4656_v32  ;;  %v3876_v39 = vadd.f32 %v3829_v37, %v3685_v10  ;;  %v2565_v40 = vpop.f32.mrb[3].mxu0 }
 0x197   : > { %v2728_v41 = vadd.f32 %v3875_v36, %v4656_v32  ;;  %v3877_v17 = vadd.f32 %v2565_v40, %v1436_v11 }
 0x198   : > { %v2731_v42 = vadd.f32 %v3876_v39, %v4656_v32  ;;  %v2762_v19 = vmax.f32 %v2730_v38, 0.0 }
 0x199   : > { %v2729_v43 = vadd.f32 %v3877_v17, %v4656_v32  ;;  %v2760_v44 = vmax.f32 %v2728_v41, 0.0 }
 0x19a   : > { %v2763_v21 = vmax.f32 %v2731_v42, 0.0 }
 0x19b   : > { %v2761_v45 = vmax.f32 %v2729_v43, 0.0  ;;  %v3832_v46 = vpop.f32.mrb[4].mxu0 }
 0x19c   : > { %v3411_v23 = vpack.c.bf16 %v2763_v21, %v2762_v19  ;;  %v3878_v25 = vadd.f32 %v3832_v46, %v3688_v12  ;;  %v2578_v47 = vpop.f32.mrb[5].mxu0 }
 0x19d   : > { %v3406_v27 = vpack.c.bf16 %v2761_v45, %v2760_v44  ;;  %v3879_v48 = vadd.f32 %v2578_v47, %v1449_v13  ;;  %v3833_v49 = vpop.f32.mrb[6].mxu0 }
 0x19e   : > { %3483 = vst [vmem:[%s4665_s27 + $0x8] sm:$0xff] %v3411_v23   ;;  %v2734_v31 = vadd.f32 %v3878_v25, %v4656_v32  ;;  %v3880_v50 = vadd.f32 %v3833_v49, %v3689_v14  ;;  %v2581_v51 = vpop.f32.mrb[7].mxu0 }
 0x19f   : > { %3407 = vst [vmem:[%s4665_s27] sm:$0xff] %v3406_v27   ;;  %v2732_v33 = vadd.f32 %v3879_v48, %v4656_v32  ;;  %v3881_v52 = vadd.f32 %v2581_v51, %v1452_v15 }
 0x1a0   : > { %v2735_v53 = vadd.f32 %v3880_v50, %v4656_v32  ;;  %v2766_v55 = vmax.f32 %v2734_v31, 0.0 }
 0x1a1   : > { %v2733_v54 = vadd.f32 %v3881_v52, %v4656_v32  ;;  %v2764_v57 = vmax.f32 %v2732_v33, 0.0 }
 0x1a2   : > { %v2767_v56 = vmax.f32 %v2735_v53, 0.0 }
 0x1a3   : > { %v2765_v58 = vmax.f32 %v2733_v54, 0.0  ;;  %v3836_v59 = vpop.f32.mrb[8].mxu0 }
 0x1a4   : > { %v3421_v60 = vpack.c.bf16 %v2767_v56, %v2766_v55  ;;  %v3882_v61 = vadd.f32 %v3836_v59, %v3692_v16  ;;  %v2594_v62 = vpop.f32.mrb[9].mxu0 }
 0x1a5   : > { %v3416_v63 = vpack.c.bf16 %v2765_v58, %v2764_v57  ;;  %v3883_v0 = vadd.f32 %v2594_v62, %v1465_v18  ;;  %v3837_v1 = vpop.f32.mrb[10].mxu0 }
 0x1a6   : > { %3485 = vst [vmem:[%s4665_s27 + $0x18] sm:$0xff] %v3421_v60   ;;  %v2738_v2 = vadd.f32 %v3882_v61, %v4656_v32  ;;  %v3884_v3 = vadd.f32 %v3837_v1, %v3693_v20  ;;  %v2597_v4 = vpop.f32.mrb[11].mxu0 }
 0x1a7   : > { %3484 = vst [vmem:[%s4665_s27 + $0x10] sm:$0xff] %v3416_v63   ;;  %v2736_v5 = vadd.f32 %v3883_v0, %v4656_v32  ;;  %v3885_v6 = vadd.f32 %v2597_v4, %v1468_v22 }
 0x1a8   : > { %v2739_v7 = vadd.f32 %v3884_v3, %v4656_v32  ;;  %v2770_v9 = vmax.f32 %v2738_v2, 0.0 }
 0x1a9   : > { %v2737_v8 = vadd.f32 %v3885_v6, %v4656_v32  ;;  %v2768_v11 = vmax.f32 %v2736_v5, 0.0 }
 0x1aa   : > { %v2771_v10 = vmax.f32 %v2739_v7, 0.0 }
 0x1ab   : > { %v2769_v12 = vmax.f32 %v2737_v8, 0.0  ;;  %v3840_v13 = vpop.f32.mrb[12].mxu0 }
 0x1ac   : > { %v3431_v14 = vpack.c.bf16 %v2771_v10, %v2770_v9  ;;  %v3886_v15 = vadd.f32 %v3840_v13, %v4643_v24  ;;  %v2610_v16 = vpop.f32.mrb[13].mxu0 }
 0x1ad   : > { %v3426_v18 = vpack.c.bf16 %v2769_v12, %v2768_v11  ;;  %v3887_v20 = vadd.f32 %v2610_v16, %v4645_v26  ;;  %v3841_v30 = vpop.f32.mrb[14].mxu0 }
 0x1ae   : > { %3487 = vst [vmem:[%s4665_s27 + $0x28] sm:$0xff] %v3431_v14   ;;  %v2742_v22 = vadd.f32 %v3886_v15, %v4656_v32  ;;  %v3888_v34 = vadd.f32 %v3841_v30, %v4647_v28  ;;  %v2613_v35 = vpop.f32.mrb[15].mxu0 }
 0x1af   : > { %3486 = vst [vmem:[%s4665_s27 + $0x20] sm:$0xff] %v3426_v18   ;;  %v2740_v36 = vadd.f32 %v3887_v20, %v4656_v32  ;;  %v3889_v37 = vadd.f32 %v2613_v35, %v4649_v29 }
 0x1b0   : > { %v2743_v38 = vadd.f32 %v3888_v34, %v4656_v32  ;;  %v2774_v39 = vmax.f32 %v2742_v22, 0.0 }
 0x1b1   : > { %v2741_v24 = vadd.f32 %v3889_v37, %v4656_v32  ;;  %v2772_v41 = vmax.f32 %v2740_v36, 0.0 }
 0x1b2   : > { %v2775_v40 = vmax.f32 %v2743_v38, 0.0  ;;  %v3748_v26 = vpop.f32.mrb[16].mxu1 }
 0x1b3   : > { %v2773_v17 = vmax.f32 %v2741_v24, 0.0  ;;  %v3844_v42 = vpop.f32.mrb[16].mxu0  ;;  %v1852_v43 = vpop.f32.mrb[17].mxu1 }
 0x1b4   : > { %v3441_v28 = vpack.c.bf16 %v2775_v40, %v2774_v39  ;;  %v3890_v19 = vadd.f32 %v3844_v42, %v3748_v26  ;;  %v2626_v21 = vpop.f32.mrb[17].mxu0  ;;  %v3749_v44 = vpop.f32.mrb[18].mxu1 }
 0x1b5   : > { %v3436_v45 = vpack.c.bf16 %v2773_v17, %v2772_v41  ;;  %v3891_v46 = vadd.f32 %v2626_v21, %v1852_v43  ;;  %v3845_v29 = vpop.f32.mrb[18].mxu0  ;;  %v1855_v23 = vpop.f32.mrb[19].mxu1 }
 0x1b6   : > { %3489 = vst [vmem:[%s4665_s27 + $0x38] sm:$0xff] %v3441_v28   ;;  %v2746_v25 = vadd.f32 %v3890_v19, %v4656_v32  ;;  %v3892_v47 = vadd.f32 %v3845_v29, %v3749_v44  ;;  %v2629_v27 = vpop.f32.mrb[19].mxu0 }
 0x1b7   : > { %3488 = vst [vmem:[%s4665_s27 + $0x30] sm:$0xff] %v3436_v45   ;;  %v2744_v48 = vadd.f32 %v3891_v46, %v4656_v32  ;;  %v3893_v49 = vadd.f32 %v2629_v27, %v1855_v23 }
 0x1b8   : > { %v2747_v31 = vadd.f32 %v3892_v47, %v4656_v32  ;;  %v2778_v51 = vmax.f32 %v2746_v25, 0.0 }
 0x1b9   : > { %v2745_v50 = vadd.f32 %v3893_v49, %v4656_v32  ;;  %v2776_v53 = vmax.f32 %v2744_v48, 0.0 }
 0x1ba   : > { %v2779_v33 = vmax.f32 %v2747_v31, 0.0  ;;  %v3752_v52 = vpop.f32.mrb[20].mxu1 }
 0x1bb   : > { %v2777_v54 = vmax.f32 %v2745_v50, 0.0  ;;  %v3848_v55 = vpop.f32.mrb[20].mxu0  ;;  %v1868_v56 = vpop.f32.mrb[21].mxu1 }
 0x1bc   : > { %v3451_v57 = vpack.c.bf16 %v2779_v33, %v2778_v51  ;;  %v3894_v58 = vadd.f32 %v3848_v55, %v3752_v52  ;;  %v2642_v59 = vpop.f32.mrb[21].mxu0  ;;  %v3753_v60 = vpop.f32.mrb[22].mxu1 }
 0x1bd   : > { %v3446_v61 = vpack.c.bf16 %v2777_v54, %v2776_v53  ;;  %v3895_v62 = vadd.f32 %v2642_v59, %v1868_v56  ;;  %v3849_v63 = vpop.f32.mrb[22].mxu0  ;;  %v1871_v0 = vpop.f32.mrb[23].mxu1 }
 0x1be   : > { %3491 = vst [vmem:[%s4665_s27 + $0x48] sm:$0xff] %v3451_v57   ;;  %v2750_v1 = vadd.f32 %v3894_v58, %v4656_v32  ;;  %v3896_v2 = vadd.f32 %v3849_v63, %v3753_v60  ;;  %v2645_v3 = vpop.f32.mrb[23].mxu0 }
 0x1bf   : > { %3490 = vst [vmem:[%s4665_s27 + $0x40] sm:$0xff] %v3446_v61   ;;  %v2748_v4 = vadd.f32 %v3895_v62, %v4656_v32  ;;  %v3897_v5 = vadd.f32 %v2645_v3, %v1871_v0 }
 0x1c0   : > { %v2751_v6 = vadd.f32 %v3896_v2, %v4656_v32  ;;  %v2782_v8 = vmax.f32 %v2750_v1, 0.0 }
 0x1c1   : > { %v2749_v7 = vadd.f32 %v3897_v5, %v4656_v32  ;;  %v2780_v11 = vmax.f32 %v2748_v4, 0.0 }
 0x1c2   : > { %v2783_v9 = vmax.f32 %v2751_v6, 0.0  ;;  %v3756_v10 = vpop.f32.mrb[24].mxu1 }
 0x1c3   : > { %v2781_v12 = vmax.f32 %v2749_v7, 0.0  ;;  %v3852_v13 = vpop.f32.mrb[24].mxu0  ;;  %v1884_v14 = vpop.f32.mrb[25].mxu1 }
 0x1c4   : > { %v3461_v15 = vpack.c.bf16 %v2783_v9, %v2782_v8  ;;  %v3898_v16 = vadd.f32 %v3852_v13, %v3756_v10  ;;  %v2658_v18 = vpop.f32.mrb[25].mxu0  ;;  %v3757_v20 = vpop.f32.mrb[26].mxu1 }
 0x1c5   : > { %v3456_v30 = vpack.c.bf16 %v2781_v12, %v2780_v11  ;;  %v3899_v22 = vadd.f32 %v2658_v18, %v1884_v14  ;;  %v3853_v34 = vpop.f32.mrb[26].mxu0  ;;  %v1887_v35 = vpop.f32.mrb[27].mxu1 }
 0x1c6   : > { %3493 = vst [vmem:[%s4665_s27 + $0x58] sm:$0xff] %v3461_v15   ;;  %v2754_v36 = vadd.f32 %v3898_v16, %v4656_v32  ;;  %v3900_v37 = vadd.f32 %v3853_v34, %v3757_v20  ;;  %v2661_v38 = vpop.f32.mrb[27].mxu0 }
 0x1c7   : > { %3492 = vst [vmem:[%s4665_s27 + $0x50] sm:$0xff] %v3456_v30   ;;  %v2752_v24 = vadd.f32 %v3899_v22, %v4656_v32  ;;  %v3901_v39 = vadd.f32 %v2661_v38, %v1887_v35 }
 0x1c8   : > { %v2755_v40 = vadd.f32 %v3900_v37, %v4656_v32  ;;  %v2786_v41 = vmax.f32 %v2754_v36, 0.0 }
 0x1c9   : > { %v2753_v26 = vadd.f32 %v3901_v39, %v4656_v32  ;;  %v2784_v43 = vmax.f32 %v2752_v24, 0.0 }
 0x1ca   : > { %v2787_v17 = vmax.f32 %v2755_v40, 0.0  ;;  %v3760_v42 = vpop.f32.mrb[28].mxu1 }
 0x1cb   : > { %v2785_v28 = vmax.f32 %v2753_v26, 0.0  ;;  %v3856_v19 = vpop.f32.mrb[28].mxu0  ;;  %v1900_v21 = vpop.f32.mrb[29].mxu1 }
 0x1cc   : > { %v3471_v44 = vpack.c.bf16 %v2787_v17, %v2786_v41  ;;  %v3902_v45 = vadd.f32 %v3856_v19, %v3760_v42  ;;  %v2674_v46 = vpop.f32.mrb[29].mxu0  ;;  %v3761_v29 = vpop.f32.mrb[30].mxu1 }
 0x1cd   : > { %v3466_v23 = vpack.c.bf16 %v2785_v28, %v2784_v43  ;;  %v3903_v25 = vadd.f32 %v2674_v46, %v1900_v21  ;;  %v3857_v47 = vpop.f32.mrb[30].mxu0  ;;  %v1903_v27 = vpop.f32.mrb[31].mxu1 }
 0x1ce   : > { %3495 = vst [vmem:[%s4665_s27 + $0x68] sm:$0xff] %v3471_v44   ;;  %v2758_v48 = vadd.f32 %v3902_v45, %v4656_v32  ;;  %v3904_v49 = vadd.f32 %v3857_v47, %v3761_v29  ;;  %v2677_v31 = vpop.f32.mrb[31].mxu0 }
 0x1cf   : > { %3494 = vst [vmem:[%s4665_s27 + $0x60] sm:$0xff] %v3466_v23   ;;  %v2756_v50 = vadd.f32 %v3903_v25, %v4656_v32  ;;  %v3905_v51 = vadd.f32 %v2677_v31, %v1903_v27 }
 0x1d0   : > { %v2759_v33 = vadd.f32 %v3904_v49, %v4656_v32  ;;  %v2790_v53 = vmax.f32 %v2758_v48, 0.0 }
 0x1d1   : > { %v2757_v52 = vadd.f32 %v3905_v51, %v4656_v32  ;;  %v2788_v55 = vmax.f32 %v2756_v50, 0.0 }
 0x1d2   : > { %v2791_v54 = vmax.f32 %v2759_v33, 0.0 }
 0x1d3   : > { %v2789_v56 = vmax.f32 %v2757_v52, 0.0 }
 0x1d4   : > { %v3481_v57 = vpack.c.bf16 %v2791_v54, %v2790_v53 }
 0x1d5   : > { %v3476_v58 = vpack.c.bf16 %v2789_v56, %v2788_v55 }
 0x1d6   : > { %3497 = vst [vmem:[%s4665_s27 + $0x78] sm:$0xff] %v3481_v57  }
 0x1d7   : > { %3496 = vst [vmem:[%s4665_s27 + $0x70] sm:$0xff] %v3476_v58  }
 0x1d8 PF: > { %p10_p9 = scmp.ge.s32.totalorder %s4209_s16, 4   ;;  %s4729_s12 = smov %s4166_s13 }
 0x1d9   : > { %s4730_s13 = smov %s4218_s19  ;;  %s4731_s14 = smov %s4209_s16 }
 0x1da   :  { %12 = sbr.rel (!%p10_p9) target bundleno = 2 (0x2), region = 116 }

// kernel: wdm_classifier_tiny.7
= control target key start
LH: loop header
LB: loop body
LE: loop exit
PB: predicated region body
PF: predicated region fallthrough
CT: control target
= control target key end

     0   :  { %v957_v0 = vmov 0.0   ;;  %vm958_vm0 = vmmov 0   ;;  %s1185_s1 = inlined_call_operand.vmem [shape: bf16[3,128,128], index: 1, kind: input, shape index: {}]   ;;  %s1186_s0 = inlined_call_operand.vmem [shape: bf16[3,72,128], index: 0, kind: input, shape index: {}]   ;;  %s1187_s2 = inlined_call_operand.vmem [shape: f32[1,128], index: 2, kind: input, shape index: {}]   ;;  %s1188_s3 = inlined_call_operand.vmem [shape: bf16[72,128], index: 3, kind: output, shape index: {}]  }
   0x1   :  { %792 = vmatprep.subr.bf16.mxu0 %v957_v0  ;;  %828 = vmatprep.subr.bf16.mxu1 %v957_v0  ;;  %v918_v1 = vld [vmem:[%s1185_s1 + $0x40] sm:$0xff]   ;;  %v920_v3 = vld [vmem:[%s1185_s1 + $0x48] sm:$0xff]   ;;  %v922_v5 = vld [vmem:[%s1185_s1 + $0x50] sm:$0xff]  }
   0x2   :  { %v919_v2 = vld [vmem:[%s1185_s1] sm:$0xff]   ;;  %808 = vmatprep.mubr.msk.bf16.mxu0 %vm958_vm0, %v957_v0  ;;  %844 = vmatprep.mubr.msk.bf16.mxu1 %vm958_vm0, %v957_v0  ;;  %v921_v4 = vld [vmem:[%s1185_s1 + $0x8] sm:$0xff]   ;;  %v923_v6 = vld [vmem:[%s1185_s1 + $0x10] sm:$0xff]  }
   0x3   :  { %793 = vmatpush3.bf16.msra.mxu0 %v918_v1  ;;  %829 = vmatpush3.bf16.msra.mxu1 %v919_v2  ;;  %v924_v7 = vld [vmem:[%s1185_s1 + $0x58] sm:$0xff]   ;;  %v926_v9 = vld [vmem:[%s1185_s1 + $0x60] sm:$0xff]   ;;  %v928_v11 = vld [vmem:[%s1185_s1 + $0x68] sm:$0xff]  }
   0x4   :  { %794 = vmatprep.subr.bf16.mxu0 %v957_v0  ;;  %830 = vmatprep.subr.bf16.mxu1 %v957_v0  ;;  %v925_v8 = vld [vmem:[%s1185_s1 + $0x18] sm:$0xff]   ;;  %v927_v10 = vld [vmem:[%s1185_s1 + $0x20] sm:$0xff]   ;;  %v929_v12 = vld [vmem:[%s1185_s1 + $0x28] sm:$0xff]  }
   0x5   :  { %v930_v13 = vld [vmem:[%s1185_s1 + $0x70] sm:$0xff]   ;;  %v932_v15 = vld [vmem:[%s1185_s1 + $0x78] sm:$0xff]   ;;  %v934_v17 = vld [vmem:[%s1186_s0 + $0x24] sm:$0xff]  }
   0x6   :  { %v931_v14 = vld [vmem:[%s1185_s1 + $0x30] sm:$0xff]   ;;  %v933_v16 = vld [vmem:[%s1185_s1 + $0x38] sm:$0xff]   ;;  %v935_v18 = vld [vmem:[%s1186_s0] sm:$0xff]  }
   0x7   :  { %795 = vmatpush3.bf16.msra.mxu0 %v920_v3  ;;  %831 = vmatpush3.bf16.msra.mxu1 %v921_v4  ;;  %v936_v19 = vld [vmem:[%s1185_s1 + $0x80] sm:$0xff]   ;;  %v937_v20 = vld [vmem:[%s1185_s1 + $0x88] sm:$0xff]   ;;  %v940_v23 = vld [vmem:[%s1185_s1 + $0x90] sm:$0xff]  }
   0x8   :  { %796 = vmatprep.subr.bf16.mxu0 %v957_v0  ;;  %832 = vmatprep.subr.bf16.mxu1 %v957_v0  ;;  %v938_v21 = vld [vmem:[%s1186_s0 + $0x2c] sm:$0xff]   ;;  %v943_v24 = vld [vmem:[%s1185_s1 + $0x98] sm:$0xff]   ;;  %v944_v27 = vld [vmem:[%s1185_s1 + $0xa0] sm:$0xff]  }
   0x9   :  { %v939_v22 = vld [vmem:[%s1186_s0 + $0x8] sm:$0xff]   ;;  %v941_v25 = vld [vmem:[%s1186_s0 + $0x34] sm:$0xff]   ;;  %v945_v29 = vld [vmem:[%s1186_s0 + $0x3c] sm:$0xff]  }
   0xa   :  { %v942_v26 = vld [vmem:[%s1186_s0 + $0x10] sm:$0xff]   ;;  %v947_v28 = vld [vmem:[%s1185_s1 + $0xa8] sm:$0xff]   ;;  %v946_v30 = vld [vmem:[%s1186_s0 + $0x18] sm:$0xff]  }
   0xb   :  { %797 = vmatpush3.bf16.msra.mxu0 %v922_v5  ;;  %833 = vmatpush3.bf16.msra.mxu1 %v923_v6  ;;  %v948_v31 = vld [vmem:[%s1185_s1 + $0xb0] sm:$0xff]   ;;  %v951_v32 = vld [vmem:[%s1185_s1 + $0xb8] sm:$0xff]   ;;  %v949_v33 = vld [vmem:[%s1186_s0 + $0x44] ss:$0 sps:$4 sm:$0xff]  }
   0xc   :  { %798 = vmatprep.subr.bf16.mxu0 %v957_v0  ;;  %834 = vmatprep.subr.bf16.mxu1 %v957_v0  ;;  %v950_v34 = vld [vmem:[%s1186_s0 + $0x20] ss:$0 sps:$4 sm:$0xff]   ;;  %v952_v35 = vld [vmem:[%s1186_s0 + $0x48] sm:$0xff]   ;;  %v954_v37 = vld [vmem:[%s1186_s0 + $0x50] sm:$0xff]  }
   0xd   :  { %v953_v36 = vld [vmem:[%s1186_s0 + $0x60] sm:$0xff]   ;;  %v955_v38 = vld [vmem:[%s1186_s0 + $0x68] ss:$0 sps:$4 sm:$0xff]   ;;  %v956_v39 = vld [vmem:[%s1186_s0 + $0x58] sm:$0xff]  }
   0xf   :  { %799 = vmatpush3.bf16.msra.mxu0 %v924_v7  ;;  %835 = vmatpush3.bf16.msra.mxu1 %v925_v8 }
  0x10   :  { %800 = vmatprep.subr.bf16.mxu0 %v957_v0  ;;  %836 = vmatprep.subr.bf16.mxu1 %v957_v0 }
  0x13   :  { %801 = vmatpush3.bf16.msra.mxu0 %v926_v9  ;;  %837 = vmatpush3.bf16.msra.mxu1 %v927_v10 }
  0x14   :  { %802 = vmatprep.subr.bf16.mxu0 %v957_v0  ;;  %838 = vmatprep.subr.bf16.mxu1 %v957_v0 }
  0x17   :  { %803 = vmatpush3.bf16.msra.mxu0 %v928_v11  ;;  %839 = vmatpush3.bf16.msra.mxu1 %v929_v12 }
  0x18   :  { %804 = vmatprep.subr.bf16.mxu0 %v957_v0  ;;  %840 = vmatprep.subr.bf16.mxu1 %v957_v0 }
  0x1b   :  { %805 = vmatpush3.bf16.msra.mxu0 %v930_v13  ;;  %841 = vmatpush3.bf16.msra.mxu1 %v931_v14 }
  0x1c   :  { %806 = vmatprep.subr.bf16.mxu0 %v957_v0  ;;  %842 = vmatprep.subr.bf16.mxu1 %v957_v0 }
  0x1f   :  { %807 = vmatpush3.bf16.msra.mxu0 %v932_v15  ;;  %843 = vmatpush3.bf16.msra.mxu1 %v933_v16 }
  0x20   :  { %864 = vmatprep.subr.bf16.mxu0 %v957_v0  ;;  %900 = vmatprep.subr.bf16.mxu1 %v957_v0 }
  0x22   :  { %809 = vmatmul.mubr.bf16.vlgmr.msra.gmra.mrb[0].mxu0 %v934_v17  ;;  %845 = vmatmul.mubr.bf16.vlgmr.msra.gmra.mrb[0].mxu1 %v935_v18 }
  0x23   :  { %865 = vmatpush3.bf16.msra.mxu0 %v936_v19  ;;  %812 = vmatprep.mubr.msk.bf16.mxu0 %vm958_vm0, %v957_v0 }
  0x24   :  { %866 = vmatprep.subr.bf16.mxu0 %v957_v0  ;;  %848 = vmatprep.mubr.msk.bf16.mxu1 %vm958_vm0, %v957_v0 }
  0x25   :  { %908 = vmatpush3.bf16.msra.mxu1 %v936_v19 }
  0x26   :  { %901 = vmatprep.subr.bf16.mxu1 %v957_v0 }
  0x27   :  { %867 = vmatpush3.bf16.msra.mxu0 %v937_v20 }
  0x28   :  { %868 = vmatprep.subr.bf16.mxu0 %v957_v0 }
  0x29   :  { %909 = vmatpush3.bf16.msra.mxu1 %v937_v20 }
  0x2a   :  { %813 = vmatmul.mubr.bf16.gmra.mrb[4].mxu0 %v938_v21  ;;  %902 = vmatprep.subr.bf16.mxu1 %v957_v0 }
  0x2b   :  { %849 = vmatmul.mubr.bf16.gmra.mrb[4].mxu1 %v939_v22  ;;  %869 = vmatpush3.bf16.msra.mxu0 %v940_v23 }
  0x2c   :  { %816 = vmatprep.mubr.msk.bf16.mxu0 %vm958_vm0, %v957_v0  ;;  %852 = vmatprep.mubr.msk.bf16.mxu1 %vm958_vm0, %v957_v0 }
  0x2d   :  { %870 = vmatprep.subr.bf16.mxu0 %v957_v0  ;;  %910 = vmatpush3.bf16.msra.mxu1 %v940_v23 }
  0x2e   :  { %903 = vmatprep.subr.bf16.mxu1 %v957_v0 }
  0x2f   :  { %871 = vmatpush3.bf16.msra.mxu0 %v943_v24 }
  0x30   :  { %872 = vmatprep.subr.bf16.mxu0 %v957_v0 }
  0x31   :  { %911 = vmatpush3.bf16.msra.mxu1 %v943_v24 }
  0x32   :  { %817 = vmatmul.mubr.bf16.gmra.mrb[8].mxu0 %v941_v25  ;;  %904 = vmatprep.subr.bf16.mxu1 %v957_v0 }
  0x33   :  { %853 = vmatmul.mubr.bf16.gmra.mrb[8].mxu1 %v942_v26  ;;  %873 = vmatpush3.bf16.msra.mxu0 %v944_v27  ;;  %v711_v26 = vld [vmem:[%s1187_s2] ss:$0 sm:$0xff] }
  0x34   :  { %820 = vmatprep.mubr.msk.bf16.mxu0 %vm958_vm0, %v957_v0  ;;  %856 = vmatprep.mubr.msk.bf16.mxu1 %vm958_vm0, %v957_v0 }
  0x35   :  { %912 = vmatpush3.bf16.msra.mxu1 %v944_v27  ;;  %874 = vmatprep.subr.bf16.mxu0 %v957_v0 }
  0x36   :  { %905 = vmatprep.subr.bf16.mxu1 %v957_v0 }
  0x37   :  { %875 = vmatpush3.bf16.msra.mxu0 %v947_v28 }
  0x38   :  { %876 = vmatprep.subr.bf16.mxu0 %v957_v0 }
  0x39   :  { %913 = vmatpush3.bf16.msra.mxu1 %v947_v28 }
  0x3a   :  { %821 = vmatmul.mubr.bf16.gmra.mrb[12].mxu0 %v945_v29  ;;  %906 = vmatprep.subr.bf16.mxu1 %v957_v0 }
  0x3b   :  { %857 = vmatmul.mubr.bf16.gmra.mrb[12].mxu1 %v946_v30  ;;  %824 = vmatprep.mubr.msk.bf16.mxu0 %vm958_vm0, %v957_v0 }
  0x3c   :  { %860 = vmatprep.mubr.msk.bf16.mxu1 %vm958_vm0, %v957_v0  ;;  %877 = vmatpush3.bf16.msra.mxu0 %v948_v31 }
  0x3d   :  { %914 = vmatpush3.bf16.msra.mxu1 %v948_v31  ;;  %878 = vmatprep.subr.bf16.mxu0 %v957_v0 }
  0x3e   :  { %907 = vmatprep.subr.bf16.mxu1 %v957_v0 }
  0x40   :  { %879 = vmatpush3.bf16.msra.mxu0 %v951_v32 }
  0x41   :  { %915 = vmatpush3.bf16.msra.mxu1 %v951_v32 }
  0x42   :  { %825 = vmatmul.mubr.bf16.gmra.mrb[16].mxu0 %v949_v33 }
  0x43   :  { %861 = vmatmul.mubr.bf16.gmra.mrb[16].mxu1 %v950_v34  ;;  %880 = vmatprep.mubr.msk.bf16.mxu0 %vm958_vm0, %v957_v0 }
  0x44   :  { %892 = vmatprep.mubr.msk.bf16.mxu1 %vm958_vm0, %v957_v0 }
  0x4a   :  { %881 = vmatmul.mubr.bf16.vlgmr.msra.gmra.mrb[20].mxu0 %v952_v35 }
  0x4b   :  { %893 = vmatmul.mubr.bf16.vlgmr.msra.gmra.mrb[20].mxu1 %v953_v36  ;;  %884 = vmatprep.mubr.msk.bf16.mxu0 %vm958_vm0, %v957_v0 }
  0x4c   :  { %896 = vmatprep.mubr.msk.bf16.mxu1 %vm958_vm0, %v957_v0 }
  0x52   :  { %885 = vmatmul.mubr.bf16.gmra.mrb[24].mxu0 %v954_v37 }
  0x53   :  { %897 = vmatmul.mubr.bf16.gmra.mrb[24].mxu1 %v955_v38  ;;  %888 = vmatprep.mubr.msk.bf16.mxu0 %vm958_vm0, %v957_v0 }
  0x5a   :  { %889 = vmatmul.mubr.bf16.gmra.mrb[28].mxu0 %v956_v39 }
  0xf5   :  { %v177_v40 = vpop.f32.mrb[0].mxu0  ;;  %v325_v41 = vpop.f32.mrb[0].mxu1 }
  0xf6   :  { %v810_v42 = vpop.f32.mrb[1].mxu0  ;;  %v326_v43 = vadd.f32 %v325_v41, %v177_v40  ;;  %v846_v44 = vpop.f32.mrb[1].mxu1 }
  0xf7   :  { %v180_v45 = vpop.f32.mrb[2].mxu0  ;;  %v328_v46 = vpop.f32.mrb[2].mxu1 }
  0xf8   :  { %v811_v47 = vpop.f32.mrb[3].mxu0  ;;  %v329_v48 = vadd.f32 %v328_v46, %v180_v45  ;;  %v847_v49 = vpop.f32.mrb[3].mxu1 }
  0xfd   :  { %v185_v50 = vpop.f32.mrb[4].mxu0 }
  0xfe   :  { %v333_v51 = vpop.f32.mrb[4].mxu1  ;;  %v814_v52 = vpop.f32.mrb[5].mxu0 }
  0xff   :  { %v334_v53 = vadd.f32 %v333_v51, %v185_v50  ;;  %v850_v54 = vpop.f32.mrb[5].mxu1  ;;  %v188_v55 = vpop.f32.mrb[6].mxu0 }
 0x100   :  { %v336_v56 = vpop.f32.mrb[6].mxu1  ;;  %v815_v57 = vpop.f32.mrb[7].mxu0 }
 0x101   :  { %v1158_v58 = vadd.f32 %v336_v56, %v188_v55  ;;  %v851_v59 = vpop.f32.mrb[7].mxu1 }
 0x105   :  { %v193_v60 = vpop.f32.mrb[8].mxu0 }
 0x106   :  { %v341_v61 = vpop.f32.mrb[8].mxu1  ;;  %v818_v62 = vpop.f32.mrb[9].mxu0 }
 0x107   :  { %v1160_v63 = vadd.f32 %v341_v61, %v193_v60  ;;  %v854_v0 = vpop.f32.mrb[9].mxu1  ;;  %v196_v1 = vpop.f32.mrb[10].mxu0 }
 0x108   :  { %v344_v2 = vpop.f32.mrb[10].mxu1  ;;  %v819_v3 = vpop.f32.mrb[11].mxu0 }
 0x109   :  { %v1162_v4 = vadd.f32 %v344_v2, %v196_v1  ;;  %v855_v5 = vpop.f32.mrb[11].mxu1 }
 0x10d   :  { %v201_v6 = vpop.f32.mrb[12].mxu0 }
 0x10e   :  { %v349_v7 = vpop.f32.mrb[12].mxu1  ;;  %v822_v8 = vpop.f32.mrb[13].mxu0 }
 0x10f   :  { %v350_v9 = vadd.f32 %v349_v7, %v201_v6  ;;  %v858_v10 = vpop.f32.mrb[13].mxu1  ;;  %v204_v11 = vpop.f32.mrb[14].mxu0 }
 0x110   :  { %v352_v12 = vpop.f32.mrb[14].mxu1  ;;  %v823_v13 = vpop.f32.mrb[15].mxu0 }
 0x111   :  { %v353_v14 = vadd.f32 %v352_v12, %v204_v11  ;;  %v859_v15 = vpop.f32.mrb[15].mxu1 }
 0x115   :  { %v209_v16 = vpop.f32.mrb[16].mxu0 }
 0x116   :  { %v826_v17 = vpop.f32.mrb[17].mxu0  ;;  %v357_v18 = vpop.f32.mrb[16].mxu1 }
 0x117   :  { %v358_v19 = vadd.f32 %v357_v18, %v209_v16  ;;  %v212_v20 = vpop.f32.mrb[18].mxu0  ;;  %v862_v21 = vpop.f32.mrb[17].mxu1 }
 0x118   :  { %v827_v22 = vpop.f32.mrb[19].mxu0  ;;  %v360_v23 = vpop.f32.mrb[18].mxu1 }
 0x119   :  { %v863_v24 = vpop.f32.mrb[19].mxu1 }
 0x11d   :  { %v500_v25 = vpop.f32.mrb[20].mxu0 }
 0x11e   :  { %v538_v27 = vadd.f32 %v500_v25, %v326_v43  ;;  %v524_v28 = vpop.f32.mrb[20].mxu1  ;;  %v882_v29 = vpop.f32.mrb[21].mxu0 }
 0x11f   :  { %v544_v30 = vadd.f32 %v524_v28, %v350_v9  ;;  %v894_v31 = vpop.f32.mrb[21].mxu1  ;;  %v503_v32 = vpop.f32.mrb[22].mxu0 }
 0x120   :  { %v554_v33 = vadd.f32 %v711_v26, %v538_v27  ;;  %v539_v34 = vadd.f32 %v503_v32, %v329_v48  ;;  %v527_v35 = vpop.f32.mrb[22].mxu1  ;;  %v883_v36 = vpop.f32.mrb[23].mxu0 }
 0x121   :  { %v560_v37 = vadd.f32 %v711_v26, %v544_v30  ;;  %v545_v38 = vadd.f32 %v527_v35, %v353_v14  ;;  %v895_v39 = vpop.f32.mrb[23].mxu1 }
 0x122   :  { %v555_v40 = vadd.f32 %v711_v26, %v539_v34  ;;  %v563_v42 = vmax.f32 %v554_v33, 0.0 }
 0x123   :  { %v561_v41 = vadd.f32 %v711_v26, %v545_v38  ;;  %v569_v45 = vmax.f32 %v560_v37, 0.0 }
 0x124   :  { %v564_v44 = vmax.f32 %v555_v40, 0.0 }
 0x125   :  { %v570_v46 = vmax.f32 %v561_v41, 0.0  ;;  %v508_v47 = vpop.f32.mrb[24].mxu0 }
 0x126   :  { %v733_v43 = vpack.c.bf16 %v564_v44, %v563_v42  ;;  %v540_v49 = vadd.f32 %v508_v47, %v334_v53  ;;  %v532_v50 = vpop.f32.mrb[24].mxu1  ;;  %v886_v51 = vpop.f32.mrb[25].mxu0 }
 0x127   :  { %v748_v52 = vpack.c.bf16 %v570_v46, %v569_v45  ;;  %v546_v54 = vadd.f32 %v532_v50, %v358_v19  ;;  %v511_v55 = vpop.f32.mrb[26].mxu0  ;;  %v898_v48 = vpop.f32.mrb[25].mxu1 }
 0x128   :  { %734 = vst [vmem:[%s1188_s3] sm:$0xff] %v733_v43   ;;  %v556_v56 = vadd.f32 %v711_v26, %v540_v49  ;;  %v541_v57 = vadd.f32 %v511_v55, %v1158_v58  ;;  %v887_v59 = vpop.f32.mrb[27].mxu0  ;;  %v535_v60 = vpop.f32.mrb[26].mxu1 }
 0x129   :  { %752 = vst [vmem:[%s1188_s3 + $0x18] sm:$0xff] %v748_v52   ;;  %v562_v53 = vadd.f32 %v711_v26, %v546_v54  ;;  %v899_v61 = vpop.f32.mrb[27].mxu1 }
 0x12a   :  { %v557_v62 = vadd.f32 %v711_v26, %v541_v57  ;;  %v565_v1 = vmax.f32 %v556_v56, 0.0 }
 0x12b   :  { %v571_v0 = vmax.f32 %v562_v53, 0.0 }
 0x12c   :  { %v566_v2 = vmax.f32 %v557_v62, 0.0 }
 0x12d   :  { %v729_v3 = vpack.c.bf16 %v571_v0, %v571_v0  ;;  %v516_v5 = vpop.f32.mrb[28].mxu0 }
 0x12e   :  { %v738_v6 = vpack.c.bf16 %v566_v2, %v565_v1  ;;  %v542_v7 = vadd.f32 %v516_v5, %v1160_v63  ;;  %v890_v8 = vpop.f32.mrb[29].mxu0 }
 0x12f   :  { %617 = vst [vmem:[%s1188_s3 + $0x20] sm:$0xf] %v729_v3  ;;  %v519_v58 = vpop.f32.mrb[30].mxu0 }
 0x130   :  { %750 = vst [vmem:[%s1188_s3 + $0x8] sm:$0xff] %v738_v6   ;;  %v558_v9 = vadd.f32 %v711_v26, %v542_v7  ;;  %v543_v10 = vadd.f32 %v519_v58, %v1162_v4  ;;  %v891_v11 = vpop.f32.mrb[31].mxu0 }
 0x132   :  { %v559_v12 = vadd.f32 %v711_v26, %v543_v10  ;;  %v567_v13 = vmax.f32 %v558_v9, 0.0 }
 0x134   :  { %v568_v14 = vmax.f32 %v559_v12, 0.0 }
 0x136   :  { %v743_v15 = vpack.c.bf16 %v568_v14, %v567_v13 }
 0x138   :  { %751 = vst [vmem:[%s1188_s3 + $0x10] sm:$0xff] %v743_v15  }

// kernel: wdm_classifier_tiny.8
= control target key start
LH: loop header
LB: loop body
LE: loop exit
PB: predicated region body
PF: predicated region fallthrough
CT: control target
= control target key end

     0   :  { %s1598_s1 = inlined_call_operand.vmem [shape: bf16[3,256,128], index: 1, kind: input, shape index: {}]   ;;  %s1599_s0 = inlined_call_operand.vmem [shape: bf16[3,72,256], index: 0, kind: input, shape index: {}]   ;;  %s1600_s2 = inlined_call_operand.vmem [shape: f32[1,128], index: 2, kind: input, shape index: {}]   ;;  %s1601_s3 = inlined_call_operand.vmem [shape: bf16[72,128], index: 3, kind: output, shape index: {}]  }
   0x1   :  { %v1227_v0 = vld [vmem:[%s1598_s1 + $0xc0] sm:$0xff]   ;;  %v1231_v4 = vld [vmem:[%s1598_s1 + $0xc8] sm:$0xff]   ;;  %v1235_v8 = vld [vmem:[%s1598_s1 + $0xd0] sm:$0xff]  }
   0x2   :  { %v1228_v1 = vld [vmem:[%s1598_s1 + $0x40] sm:$0xff]   ;;  %1073 = vmatprep.subr.bf16.mxu0 %v1227_v0  ;;  %v1232_v5 = vld [vmem:[%s1598_s1 + $0x48] sm:$0xff]   ;;  %v1236_v9 = vld [vmem:[%s1598_s1 + $0x50] sm:$0xff]  }
   0x3   :  { %v1229_v2 = vld [vmem:[%s1598_s1 + $0x80] sm:$0xff]   ;;  %1119 = vmatprep.subr.bf16.mxu1 %v1228_v1  ;;  %v1233_v6 = vld [vmem:[%s1598_s1 + $0x88] sm:$0xff]   ;;  %v1237_v10 = vld [vmem:[%s1598_s1 + $0x90] sm:$0xff]  }
   0x4   :  { %v1230_v3 = vld [vmem:[%s1598_s1] sm:$0xff]   ;;  %1074 = vmatpush3.bf16.msra.mxu0 %v1229_v2  ;;  %v1234_v7 = vld [vmem:[%s1598_s1 + $0x8] sm:$0xff]   ;;  %v1238_v11 = vld [vmem:[%s1598_s1 + $0x10] sm:$0xff]  }
   0x5   :  { %1120 = vmatpush3.bf16.msra.mxu1 %v1230_v3  ;;  %1075 = vmatprep.subr.bf16.mxu0 %v1231_v4  ;;  %v1239_v12 = vld [vmem:[%s1598_s1 + $0xd8] sm:$0xff]   ;;  %v1243_v16 = vld [vmem:[%s1598_s1 + $0xe0] sm:$0xff]   ;;  %v1247_v20 = vld [vmem:[%s1598_s1 + $0xe8] sm:$0xff]  }
   0x6   :  { %1121 = vmatprep.subr.bf16.mxu1 %v1232_v5  ;;  %v1240_v13 = vld [vmem:[%s1598_s1 + $0x58] sm:$0xff]   ;;  %v1244_v17 = vld [vmem:[%s1598_s1 + $0x60] sm:$0xff]   ;;  %v1248_v21 = vld [vmem:[%s1598_s1 + $0x68] sm:$0xff]  }
   0x7   :  { %v1241_v14 = vld [vmem:[%s1598_s1 + $0x98] sm:$0xff]   ;;  %v1245_v18 = vld [vmem:[%s1598_s1 + $0xa0] sm:$0xff]   ;;  %v1249_v22 = vld [vmem:[%s1598_s1 + $0xa8] sm:$0xff]  }
   0x8   :  { %1076 = vmatpush3.bf16.msra.mxu0 %v1233_v6  ;;  %v1242_v15 = vld [vmem:[%s1598_s1 + $0x18] sm:$0xff]   ;;  %v1246_v19 = vld [vmem:[%s1598_s1 + $0x20] sm:$0xff]   ;;  %v1250_v23 = vld [vmem:[%s1598_s1 + $0x28] sm:$0xff]  }
   0x9   :  { %1122 = vmatpush3.bf16.msra.mxu1 %v1234_v7  ;;  %1077 = vmatprep.subr.bf16.mxu0 %v1235_v8  ;;  %v1251_v24 = vld [vmem:[%s1598_s1 + $0xf0] sm:$0xff]   ;;  %v1255_v28 = vld [vmem:[%s1598_s1 + $0xf8] sm:$0xff]   ;;  %v1262_v34 = vld [vmem:[%s1599_s0] ss:$8 sps:$4 sm:$0xff]  }
   0xa   :  { %1123 = vmatprep.subr.bf16.mxu1 %v1236_v9  ;;  %v1252_v25 = vld [vmem:[%s1598_s1 + $0x70] sm:$0xff]   ;;  %v1256_v29 = vld [vmem:[%s1598_s1 + $0x78] sm:$0xff]   ;;  %v1264_v35 = vld [vmem:[%s1599_s0 + $0x4] ss:$8 sps:$4 sm:$0xff]  }
   0xb   :  { %v1253_v26 = vld [vmem:[%s1598_s1 + $0xb0] sm:$0xff]   ;;  %v1257_v30 = vld [vmem:[%s1598_s1 + $0xb8] sm:$0xff]   ;;  %v1265_v36 = vld [vmem:[%s1598_s1 + $0x140] sm:$0xff]   ;;  %489 = vmatprep.mubr.bf16.mxu1 %v1264_v35 }
   0xc   :  { %1078 = vmatpush3.bf16.msra.mxu0 %v1237_v10  ;;  %v1254_v27 = vld [vmem:[%s1598_s1 + $0x30] sm:$0xff]   ;;  %v1258_v31 = vld [vmem:[%s1598_s1 + $0x38] sm:$0xff]   ;;  %v1266_v37 = vld [vmem:[%s1598_s1 + $0x100] sm:$0xff]  }
   0xd   :  { %1124 = vmatpush3.bf16.msra.mxu1 %v1238_v11  ;;  %1079 = vmatprep.subr.bf16.mxu0 %v1239_v12  ;;  %v1259_v32 = vld [vmem:[%s1599_s0 + $0x48] ss:$8 sps:$4 sm:$0xff]   ;;  %v1261_v33 = vld [vmem:[%s1599_s0 + $0x4c] ss:$8 sps:$4 sm:$0xff]   ;;  %v1269_v40 = vld [vmem:[%s1599_s0 + $0x5c] ss:$8 sps:$4 sm:$0xff]  }
   0xe   :  { %1125 = vmatprep.subr.bf16.mxu1 %v1240_v13  ;;  %274 = vmatprep.mubr.bf16.mxu0 %v1261_v33  ;;  %v1267_v38 = vld [vmem:[%s1598_s1 + $0x148] sm:$0xff]   ;;  %v1271_v41 = vld [vmem:[%s1599_s0 + $0x14] ss:$8 sps:$4 sm:$0xff]   ;;  %v1273_v42 = vld [vmem:[%s1599_s0 + $0x58] ss:$8 sps:$4 sm:$0xff]  }
   0xf   :  { %v1268_v39 = vld [vmem:[%s1598_s1 + $0x108] sm:$0xff]   ;;  %v1274_v43 = vld [vmem:[%s1599_s0 + $0x10] ss:$8 sps:$4 sm:$0xff]   ;;  %v1285_v52 = vld [vmem:[%s1598_s1 + $0x160] sm:$0xff]  }
  0x10   :  { %1080 = vmatpush3.bf16.msra.mxu0 %v1241_v14  ;;  %v1275_v44 = vld [vmem:[%s1598_s1 + $0x150] sm:$0xff]   ;;  %v1279_v47 = vld [vmem:[%s1599_s0 + $0x24] ss:$8 sps:$4 sm:$0xff]   ;;  %v1281_v48 = vld [vmem:[%s1598_s1 + $0x158] sm:$0xff]  }
  0x11   :  { %1126 = vmatpush3.bf16.msra.mxu1 %v1242_v15  ;;  %1081 = vmatprep.subr.bf16.mxu0 %v1243_v16  ;;  %v1276_v45 = vld [vmem:[%s1598_s1 + $0x110] sm:$0xff]   ;;  %v1283_v50 = vld [vmem:[%s1599_s0 + $0x20] ss:$8 sps:$4 sm:$0xff]   ;;  %v1284_v51 = vld [vmem:[%s1598_s1 + $0x118] sm:$0xff]  }
  0x12   :  { %1127 = vmatprep.subr.bf16.mxu1 %v1244_v17  ;;  %v1277_v46 = vld [vmem:[%s1599_s0 + $0x6c] ss:$8 sps:$4 sm:$0xff]   ;;  %v1282_v49 = vld [vmem:[%s1599_s0 + $0x68] ss:$8 sps:$4 sm:$0xff]   ;;  %v1286_v53 = vld [vmem:[%s1598_s1 + $0x120] sm:$0xff]  }
  0x13   :  { %v1287_v54 = vld [vmem:[%s1599_s0 + $0x7c] ss:$8 sps:$4 sm:$0xff]   ;;  %v1293_v56 = vld [vmem:[%s1598_s1 + $0x168] sm:$0xff]   ;;  %v1291_v57 = vld [vmem:[%s1599_s0 + $0x78] ss:$8 sps:$4 sm:$0xff]  }
  0x14   :  { %1082 = vmatpush3.bf16.msra.mxu0 %v1245_v18  ;;  %v1289_v55 = vld [vmem:[%s1599_s0 + $0x34] ss:$8 sps:$4 sm:$0xff]   ;;  %v1294_v58 = vld [vmem:[%s1598_s1 + $0x128] sm:$0xff]   ;;  %v23_v61 = vld [vmem:[%s1599_s0 + $0x40] sm:$0xff] }
  0x15   :  { %1128 = vmatpush3.bf16.msra.mxu1 %v1246_v19  ;;  %1083 = vmatprep.subr.bf16.mxu0 %v1247_v20  ;;  %v1295_v59 = vld [vmem:[%s1598_s1 + $0x170] sm:$0xff]   ;;  %v879_v60 = vld [vmem:[%s1599_s0 + $0x88] sm:$0xff]  ;;  %v947_v0 = vcombine.high %v23_v61, %v23_v61  ;;  %v1301_v2 = vld [vmem:[%s1598_s1 + $0x178] sm:$0xff]   ;;  %v946_v5 = vcombine.low %v23_v61, %v23_v61 }
  0x16   :  { %1129 = vmatprep.subr.bf16.mxu1 %v1248_v21  ;;  %v1292_v62 = vld [vmem:[%s1599_s0 + $0x30] ss:$8 sps:$4 sm:$0xff]   ;;  %v921_v63 = vcombine.high %v879_v60, %v879_v60  ;;  %v920_v4 = vcombine.low %v879_v60, %v879_v60  ;;  %v1305_v6 = vld [vmem:[%s1599_s0 + $0x94] ss:$8 sps:$4 sm:$0xff]   ;;  %v1308_v7 = vld [vmem:[%s1599_s0 + $0xc4] ss:$8 sps:$4 sm:$0xff]  }
  0x17   :  { %v1298_v1 = vld [vmem:[%s1598_s1 + $0x130] sm:$0xff]   ;;  %v1302_v3 = vld [vmem:[%s1598_s1 + $0x138] sm:$0xff]   ;;  %v1306_v10 = vld [vmem:[%s1599_s0 + $0xc0] ss:$8 sps:$4 sm:$0xff]  }
  0x18   :  { %1084 = vmatpush3.bf16.msra.mxu0 %v1249_v22  ;;  %v972_v8 = vld [vmem:[%s1599_s0 + $0xd0] sm:$0xff]  ;;  %v1309_v11 = vld [vmem:[%s1599_s0 + $0xa4] ss:$8 sps:$4 sm:$0xff]   ;;  %v1312_v13 = vld [vmem:[%s1599_s0 + $0xa0] ss:$8 sps:$4 sm:$0xff]  }
  0x19   :  { %1130 = vmatpush3.bf16.msra.mxu1 %v1250_v23  ;;  %1085 = vmatprep.subr.bf16.mxu0 %v1251_v24  ;;  %v1303_v9 = vld [vmem:[%s1599_s0 + $0x90] ss:$8 sps:$4 sm:$0xff]   ;;  %v1014_v12 = vcombine.high %v972_v8, %v972_v8  ;;  %v1013_v14 = vcombine.low %v972_v8, %v972_v8  ;;  %v1314_v15 = vld [vmem:[%s1599_s0 + $0xb4] ss:$8 sps:$4 sm:$0xff]  }
  0x1a   :  { %1131 = vmatprep.subr.bf16.mxu1 %v1252_v25  ;;  %v1316_v16 = vld [vmem:[%s1599_s0 + $0xb0] ss:$8 sps:$4 sm:$0xff]  }
  0x1c   :  { %1086 = vmatpush3.bf16.msra.mxu0 %v1253_v26 }
  0x1d   :  { %1132 = vmatpush3.bf16.msra.mxu1 %v1254_v27  ;;  %1087 = vmatprep.subr.bf16.mxu0 %v1255_v28 }
  0x1e   :  { %1133 = vmatprep.subr.bf16.mxu1 %v1256_v29 }
  0x20   :  { %1088 = vmatpush3.bf16.msra.mxu0 %v1257_v30 }
  0x21   :  { %1134 = vmatpush3.bf16.msra.mxu1 %v1258_v31  ;;  %1165 = vmatprep.subr.bf16.mxu0 %v1265_v36 }
  0x22   :  { %1211 = vmatprep.subr.bf16.mxu1 %v1265_v36 }
  0x23   :  { %275 = vmatmul.mubr.bf16.vlgmr.msra.gmra.mrb[0].mxu0 %v1259_v32 }
  0x24   :  { %490 = vmatmul.mubr.bf16.vlgmr.msra.gmra.mrb[0].mxu1 %v1262_v34  ;;  %1166 = vmatpush3.bf16.msra.mxu0 %v1266_v37 }
  0x25   :  { %1167 = vmatprep.subr.bf16.mxu0 %v1267_v38  ;;  %1219 = vmatpush3.bf16.msra.mxu1 %v1266_v37 }
  0x26   :  { %1212 = vmatprep.subr.bf16.mxu1 %v1267_v38  ;;  %282 = vmatprep.mubr.bf16.mxu0 %v1269_v40 }
  0x27   :  { %497 = vmatprep.mubr.bf16.mxu1 %v1271_v41 }
  0x28   :  { %1168 = vmatpush3.bf16.msra.mxu0 %v1268_v39 }
  0x29   :  { %1220 = vmatpush3.bf16.msra.mxu1 %v1268_v39  ;;  %1169 = vmatprep.subr.bf16.mxu0 %v1275_v44 }
  0x2a   :  { %1213 = vmatprep.subr.bf16.mxu1 %v1275_v44 }
  0x2b   :  { %283 = vmatmul.mubr.bf16.gmra.mrb[4].mxu0 %v1273_v42 }
  0x2c   :  { %498 = vmatmul.mubr.bf16.gmra.mrb[4].mxu1 %v1274_v43  ;;  %1170 = vmatpush3.bf16.msra.mxu0 %v1276_v45 }
  0x2d   :  { %290 = vmatprep.mubr.bf16.mxu0 %v1277_v46  ;;  %505 = vmatprep.mubr.bf16.mxu1 %v1279_v47 }
  0x2e   :  { %1221 = vmatpush3.bf16.msra.mxu1 %v1276_v45  ;;  %1171 = vmatprep.subr.bf16.mxu0 %v1281_v48 }
  0x2f   :  { %1214 = vmatprep.subr.bf16.mxu1 %v1281_v48 }
  0x30   :  { %1172 = vmatpush3.bf16.msra.mxu0 %v1284_v51 }
  0x31   :  { %1173 = vmatprep.subr.bf16.mxu0 %v1285_v52 }
  0x32   :  { %1222 = vmatpush3.bf16.msra.mxu1 %v1284_v51 }
  0x33   :  { %291 = vmatmul.mubr.bf16.gmra.mrb[8].mxu0 %v1282_v49  ;;  %1215 = vmatprep.subr.bf16.mxu1 %v1285_v52 }
  0x34   :  { %506 = vmatmul.mubr.bf16.gmra.mrb[8].mxu1 %v1283_v50  ;;  %298 = vmatprep.mubr.bf16.mxu0 %v1287_v54 }
  0x35   :  { %1174 = vmatpush3.bf16.msra.mxu0 %v1286_v53  ;;  %513 = vmatprep.mubr.bf16.mxu1 %v1289_v55 }
  0x36   :  { %1223 = vmatpush3.bf16.msra.mxu1 %v1286_v53  ;;  %1175 = vmatprep.subr.bf16.mxu0 %v1293_v56 }
  0x37   :  { %1216 = vmatprep.subr.bf16.mxu1 %v1293_v56 }
  0x39   :  { %1176 = vmatpush3.bf16.msra.mxu0 %v1294_v58 }
  0x3a   :  { %1224 = vmatpush3.bf16.msra.mxu1 %v1294_v58  ;;  %1177 = vmatprep.subr.bf16.mxu0 %v1295_v59 }
  0x3b   :  { %299 = vmatmul.mubr.bf16.gmra.mrb[12].mxu0 %v1291_v57  ;;  %1217 = vmatprep.subr.bf16.mxu1 %v1295_v59 }
  0x3c   :  { %514 = vmatmul.mubr.bf16.gmra.mrb[12].mxu1 %v1292_v62  ;;  %306 = vmatprep.mubr.bf16.mxu0 %v921_v63 }
  0x3d   :  { %521 = vmatprep.mubr.bf16.mxu1 %v947_v0  ;;  %1178 = vmatpush3.bf16.msra.mxu0 %v1298_v1 }
  0x3e   :  { %1225 = vmatpush3.bf16.msra.mxu1 %v1298_v1  ;;  %1179 = vmatprep.subr.bf16.mxu0 %v1301_v2 }
  0x3f   :  { %1218 = vmatprep.subr.bf16.mxu1 %v1301_v2 }
  0x41   :  { %1180 = vmatpush3.bf16.msra.mxu0 %v1302_v3 }
  0x42   :  { %1226 = vmatpush3.bf16.msra.mxu1 %v1302_v3 }
  0x43   :  { %307 = vmatmul.mubr.bf16.gmra.mrb[16].mxu0 %v920_v4 }
  0x44   :  { %522 = vmatmul.mubr.bf16.gmra.mrb[16].mxu1 %v946_v5  ;;  %747 = vmatprep.mubr.bf16.mxu0 %v1305_v6 }
  0x45   :  { %771 = vmatprep.mubr.bf16.mxu1 %v1308_v7 }
  0x4b   :  { %748 = vmatmul.mubr.bf16.vlgmr.msra.gmra.mrb[20].mxu0 %v1303_v9 }
  0x4c   :  { %772 = vmatmul.mubr.bf16.vlgmr.msra.gmra.mrb[20].mxu1 %v1306_v10  ;;  %755 = vmatprep.mubr.bf16.mxu0 %v1309_v11 }
  0x4d   :  { %779 = vmatprep.mubr.bf16.mxu1 %v1014_v12 }
  0x53   :  { %756 = vmatmul.mubr.bf16.gmra.mrb[24].mxu0 %v1312_v13 }
  0x54   :  { %780 = vmatmul.mubr.bf16.gmra.mrb[24].mxu1 %v1013_v14  ;;  %763 = vmatprep.mubr.bf16.mxu0 %v1314_v15 }
  0x5b   :  { %764 = vmatmul.mubr.bf16.gmra.mrb[28].mxu0 %v1316_v16 }
  0xf6   :  { %v1089_v17 = vpop.f32.mrb[0].mxu0 }
  0xf7   :  { %v1135_v18 = vpop.f32.mrb[0].mxu1  ;;  %v1090_v19 = vpop.f32.mrb[1].mxu0 }
  0xf8   :  { %v1091_v20 = vadd.f32 %v1090_v19, %v1089_v17  ;;  %v1136_v21 = vpop.f32.mrb[1].mxu1  ;;  %v1092_v22 = vpop.f32.mrb[2].mxu0 }
  0xf9   :  { %v1137_v23 = vadd.f32 %v1136_v21, %v1135_v18  ;;  %v1138_v24 = vpop.f32.mrb[2].mxu1  ;;  %v1093_v25 = vpop.f32.mrb[3].mxu0 }
  0xfa   :  { %v1094_v26 = vadd.f32 %v1093_v25, %v1092_v22  ;;  %v1139_v27 = vpop.f32.mrb[3].mxu1 }
  0xfb   :  { %v1562_v28 = vadd.f32 %v1137_v23, %v1091_v20  ;;  %v1140_v29 = vadd.f32 %v1139_v27, %v1138_v24 }
  0xfd   :  { %v1564_v30 = vadd.f32 %v1140_v29, %v1094_v26  ;;  %v1031_v26 = vld [vmem:[%s1600_s2] ss:$0 sm:$0xff] }
  0xfe   :  { %v1095_v31 = vpop.f32.mrb[4].mxu0 }
  0xff   :  { %v1141_v32 = vpop.f32.mrb[4].mxu1  ;;  %v1096_v33 = vpop.f32.mrb[5].mxu0 }
 0x100   :  { %v1097_v34 = vadd.f32 %v1096_v33, %v1095_v31  ;;  %v1142_v35 = vpop.f32.mrb[5].mxu1  ;;  %v1098_v36 = vpop.f32.mrb[6].mxu0 }
 0x101   :  { %v1143_v37 = vadd.f32 %v1142_v35, %v1141_v32  ;;  %v1144_v38 = vpop.f32.mrb[6].mxu1  ;;  %v1099_v39 = vpop.f32.mrb[7].mxu0 }
 0x102   :  { %v1100_v40 = vadd.f32 %v1099_v39, %v1098_v36  ;;  %v1145_v41 = vpop.f32.mrb[7].mxu1 }
 0x103   :  { %v1566_v42 = vadd.f32 %v1143_v37, %v1097_v34  ;;  %v1146_v43 = vadd.f32 %v1145_v41, %v1144_v38 }
 0x105   :  { %v1568_v44 = vadd.f32 %v1146_v43, %v1100_v40 }
 0x106   :  { %v1101_v45 = vpop.f32.mrb[8].mxu0 }
 0x107   :  { %v1147_v46 = vpop.f32.mrb[8].mxu1  ;;  %v1102_v47 = vpop.f32.mrb[9].mxu0 }
 0x108   :  { %v1103_v48 = vadd.f32 %v1102_v47, %v1101_v45  ;;  %v1148_v49 = vpop.f32.mrb[9].mxu1  ;;  %v1104_v50 = vpop.f32.mrb[10].mxu0 }
 0x109   :  { %v1149_v51 = vadd.f32 %v1148_v49, %v1147_v46  ;;  %v1150_v52 = vpop.f32.mrb[10].mxu1  ;;  %v1105_v53 = vpop.f32.mrb[11].mxu0 }
 0x10a   :  { %v1106_v54 = vadd.f32 %v1105_v53, %v1104_v50  ;;  %v1151_v55 = vpop.f32.mrb[11].mxu1 }
 0x10b   :  { %v1570_v56 = vadd.f32 %v1149_v51, %v1103_v48  ;;  %v1152_v57 = vadd.f32 %v1151_v55, %v1150_v52 }
 0x10d   :  { %v1572_v58 = vadd.f32 %v1152_v57, %v1106_v54 }
 0x10e   :  { %v1107_v59 = vpop.f32.mrb[12].mxu0 }
 0x10f   :  { %v1153_v60 = vpop.f32.mrb[12].mxu1  ;;  %v1108_v61 = vpop.f32.mrb[13].mxu0 }
 0x110   :  { %v1109_v62 = vadd.f32 %v1108_v61, %v1107_v59  ;;  %v1154_v63 = vpop.f32.mrb[13].mxu1  ;;  %v1110_v0 = vpop.f32.mrb[14].mxu0 }
 0x111   :  { %v1155_v1 = vadd.f32 %v1154_v63, %v1153_v60  ;;  %v1156_v2 = vpop.f32.mrb[14].mxu1  ;;  %v1111_v3 = vpop.f32.mrb[15].mxu0 }
 0x112   :  { %v1112_v4 = vadd.f32 %v1111_v3, %v1110_v0  ;;  %v1157_v5 = vpop.f32.mrb[15].mxu1 }
 0x113   :  { %v516_v6 = vadd.f32 %v1155_v1, %v1109_v62  ;;  %v1158_v7 = vadd.f32 %v1157_v5, %v1156_v2 }
 0x115   :  { %v519_v8 = vadd.f32 %v1158_v7, %v1112_v4 }
 0x116   :  { %v1113_v9 = vpop.f32.mrb[16].mxu0 }
 0x117   :  { %v1159_v10 = vpop.f32.mrb[16].mxu1  ;;  %v1114_v11 = vpop.f32.mrb[17].mxu0 }
 0x118   :  { %v1115_v12 = vadd.f32 %v1114_v11, %v1113_v9  ;;  %v1160_v13 = vpop.f32.mrb[17].mxu1  ;;  %v1116_v14 = vpop.f32.mrb[18].mxu0 }
 0x119   :  { %v1161_v15 = vadd.f32 %v1160_v13, %v1159_v10  ;;  %v1117_v16 = vpop.f32.mrb[19].mxu0  ;;  %v1162_v17 = vpop.f32.mrb[18].mxu1 }
 0x11a   :  { %v1163_v18 = vpop.f32.mrb[19].mxu1 }
 0x11b   :  { %v524_v19 = vadd.f32 %v1161_v15, %v1115_v12 }
 0x11e   :  { %v1181_v20 = vpop.f32.mrb[20].mxu0 }
 0x11f   :  { %v1199_v21 = vpop.f32.mrb[20].mxu1  ;;  %v1182_v22 = vpop.f32.mrb[21].mxu0 }
 0x120   :  { %v1183_v23 = vadd.f32 %v1182_v22, %v1181_v20  ;;  %v1200_v24 = vpop.f32.mrb[21].mxu1  ;;  %v1184_v25 = vpop.f32.mrb[22].mxu0 }
 0x121   :  { %v1201_v27 = vadd.f32 %v1200_v24, %v1199_v21  ;;  %v1202_v29 = vpop.f32.mrb[22].mxu1  ;;  %v1185_v31 = vpop.f32.mrb[23].mxu0 }
 0x122   :  { %v787_v32 = vadd.f32 %v1183_v23, %v1562_v28  ;;  %v1186_v33 = vadd.f32 %v1185_v31, %v1184_v25  ;;  %v1203_v34 = vpop.f32.mrb[23].mxu1 }
 0x123   :  { %v793_v35 = vadd.f32 %v1201_v27, %v516_v6  ;;  %v1204_v36 = vadd.f32 %v1203_v34, %v1202_v29 }
 0x124   :  { %v803_v37 = vadd.f32 %v1031_v26, %v787_v32  ;;  %v788_v38 = vadd.f32 %v1186_v33, %v1564_v30 }
 0x125   :  { %v809_v39 = vadd.f32 %v1031_v26, %v793_v35  ;;  %v794_v40 = vadd.f32 %v1204_v36, %v519_v8 }
 0x126   :  { %v804_v41 = vadd.f32 %v1031_v26, %v788_v38  ;;  %v1187_v43 = vpop.f32.mrb[24].mxu0  ;;  %v812_v48 = vmax.f32 %v803_v37, 0.0 }
 0x127   :  { %v810_v45 = vadd.f32 %v1031_v26, %v794_v40  ;;  %v1205_v46 = vpop.f32.mrb[24].mxu1  ;;  %v1188_v47 = vpop.f32.mrb[25].mxu0  ;;  %v818_v28 = vmax.f32 %v809_v39, 0.0 }
 0x128   :  { %v813_v49 = vmax.f32 %v804_v41, 0.0  ;;  %v1189_v50 = vadd.f32 %v1188_v47, %v1187_v43  ;;  %v1206_v51 = vpop.f32.mrb[25].mxu1  ;;  %v1190_v52 = vpop.f32.mrb[26].mxu0 }
 0x129   :  { %v819_v53 = vmax.f32 %v810_v45, 0.0  ;;  %v1207_v54 = vadd.f32 %v1206_v51, %v1205_v46  ;;  %v1191_v55 = vpop.f32.mrb[27].mxu0  ;;  %v1208_v57 = vpop.f32.mrb[26].mxu1 }
 0x12a   :  { %v1053_v59 = vpack.c.bf16 %v813_v49, %v812_v48  ;;  %v789_v30 = vadd.f32 %v1189_v50, %v1566_v42  ;;  %v1192_v60 = vadd.f32 %v1191_v55, %v1190_v52  ;;  %v1209_v61 = vpop.f32.mrb[27].mxu1 }
 0x12b   :  { %v1068_v62 = vpack.c.bf16 %v819_v53, %v818_v28  ;;  %v795_v63 = vadd.f32 %v1207_v54, %v524_v19 }
 0x12c   :  { %1054 = vst [vmem:[%s1601_s3] sm:$0xff] %v1053_v59   ;;  %v805_v0 = vadd.f32 %v1031_v26, %v789_v30  ;;  %v790_v1 = vadd.f32 %v1192_v60, %v1568_v44 }
 0x12d   :  { %1072 = vst [vmem:[%s1601_s3 + $0x18] sm:$0xff] %v1068_v62   ;;  %v811_v2 = vadd.f32 %v1031_v26, %v795_v63 }
 0x12e   :  { %v806_v3 = vadd.f32 %v1031_v26, %v790_v1  ;;  %v1193_v4 = vpop.f32.mrb[28].mxu0  ;;  %v814_v6 = vmax.f32 %v805_v0, 0.0 }
 0x12f   :  { %v820_v5 = vmax.f32 %v811_v2, 0.0  ;;  %v1194_v42 = vpop.f32.mrb[29].mxu0 }
 0x130   :  { %v815_v7 = vmax.f32 %v806_v3, 0.0  ;;  %v1195_v8 = vadd.f32 %v1194_v42, %v1193_v4  ;;  %v1196_v9 = vpop.f32.mrb[30].mxu0 }
 0x131   :  { %v1049_v10 = vpack.c.bf16 %v820_v5, %v820_v5  ;;  %v1197_v11 = vpop.f32.mrb[31].mxu0 }
 0x132   :  { %v1058_v12 = vpack.c.bf16 %v815_v7, %v814_v6  ;;  %v791_v13 = vadd.f32 %v1195_v8, %v1570_v56  ;;  %v1198_v14 = vadd.f32 %v1197_v11, %v1196_v9 }
 0x133   :  { %866 = vst [vmem:[%s1601_s3 + $0x20] sm:$0xf] %v1049_v10 }
 0x134   :  { %1070 = vst [vmem:[%s1601_s3 + $0x8] sm:$0xff] %v1058_v12   ;;  %v807_v44 = vadd.f32 %v1031_v26, %v791_v13  ;;  %v792_v15 = vadd.f32 %v1198_v14, %v1572_v58 }
 0x136   :  { %v808_v16 = vadd.f32 %v1031_v26, %v792_v15  ;;  %v816_v17 = vmax.f32 %v807_v44, 0.0 }
 0x138   :  { %v817_v18 = vmax.f32 %v808_v16, 0.0 }
 0x13a   :  { %v1063_v19 = vpack.c.bf16 %v817_v18, %v816_v17 }
 0x13c   :  { %1071 = vst [vmem:[%s1601_s3 + $0x10] sm:$0xff] %v1063_v19  }

// kernel: wdm_classifier_tiny.9
= control target key start
LH: loop header
LB: loop body
LE: loop exit
PB: predicated region body
PF: predicated region fallthrough
CT: control target
= control target key end

     0   :  { %s1673_s0 = inlined_call_operand.vmem [shape: bf16[3,32,256], index: 0, kind: input, shape index: {}]   ;;  %s1674_s1 = inlined_call_operand.vmem [shape: bf16[3,256,128], index: 1, kind: input, shape index: {}]   ;;  %s1675_s2 = inlined_call_operand.vmem [shape: f32[1,128], index: 2, kind: input, shape index: {}]   ;;  %s1676_s3 = inlined_call_operand.vmem [shape: f32[128,1], index: 3, kind: input, shape index: {}]   ;;  %s1677_s4 = inlined_call_operand.<no memory space> [shape: f32[1,1], index: 4, kind: input, shape index: {}]   ;;  %s1678_s5 = inlined_call_operand.vmem [shape: f32[2,1,1], index: 5, kind: output, shape index: {}]  }
   0x1   :  { %v10_v0 = vstv %s1677_s4 }
   0x2   :  { %11 = vst [vmem:[#allocation2] sm:$0x1] %v10_v0 }
   0x3   :  { %s1416_s20 = smov 0   ;;  %s1418_s21 = smov 0  }
   0x4   :  { %s1420_s22 = smov 0  }
   0x5 LB: > { %s993_s4 = sadd.s32 4294967295, %s1378_s22   ;;  %s1433_s23 = sadd.s32 1, %s1378_s22   ;;  %s1378_s22 = sphi %s1420_s22, %s1681_s22   ;;  %s1374_s21 = sphi %s1418_s21, %s1680_s21   ;;  %s1370_s20 = sphi %s1416_s20, %s1679_s20  }
   0x6   : > { %s21_s24 = ssub.s32 %s1378_s22, %s1433_s23  ;;  %s24_s25 = sadd.s32 1, %s1374_s21 }
   0x7   : > { %p22_p0 = scmp.eq.s32.totalorder %s21_s24, 0  ;;  %p31_p1 = scmp.ne.s32.totalorder %s1374_s21, %s1370_s20 }
   0x8   : > { %p32_p2 = scmp.eq.s32.totalorder %s1378_s22, 0  ;;  %p996_p4 = scmp.ge.s32.totalorder %s1378_s22, 2 }
   0x9   : > { %s1442_s26 = scalar_select %p22_p0, %s1374_s21, %s24_s25  }
   0xa   : > { %p33_p3 = por %p32_p2, %p31_p1  ;;  %179 = sbr.rel (%p996_p4) target bundleno = 24 (0x18), region = 32 }
  0x11   : > { %182 = sbr.rel (!%p33_p3) target bundleno = 24 (0x18), region = 36  ;;  %s184_s27 = sand.u32 (%p33_p3), 1, %s1374_s21  }
  0x12   : > { %s1127_s28 = sshll.u32 (%p33_p3), %s1378_s22, 4  ;;  %s1270_s29 = smul.u32 (%p33_p3), 48, %s184_s27 }
  0x13   : > { %s190_s7 = scalar_lea.vmem (%p33_p3), %s1673_s0, %s1127_s28 }
  0x14   : > { %v228_v1 = vld [vmem:[%s190_s7] sm:$0xff] (%p33_p3)  ;;  %v230_v2 = vld [vmem:[%s190_s7 + $0x8] sm:$0xff] (%p33_p3)  ;;  %s186_s8 = scalar_lea.vmem (%p33_p3), [#allocation3], %s1270_s29 }
  0x15   : > { %v232_v3 = vld [vmem:[%s190_s7 + $0x20] sm:$0xff] (%p33_p3)  ;;  %v234_v4 = vld [vmem:[%s190_s7 + $0x28] sm:$0xff] (%p33_p3)  ;;  %229 = vst [vmem:[%s186_s8] sm:$0xff] (%p33_p3), %v228_v1  ;;  %231 = vst [vmem:[%s186_s8 + $0x8] sm:$0xff] (%p33_p3), %v230_v2 }
  0x16   : > { %v236_v5 = vld [vmem:[%s190_s7 + $0x40] sm:$0xff] (%p33_p3)  ;;  %v238_v6 = vld [vmem:[%s190_s7 + $0x48] sm:$0xff] (%p33_p3)  ;;  %233 = vst [vmem:[%s186_s8 + $0x10] sm:$0xff] (%p33_p3), %v232_v3  ;;  %235 = vst [vmem:[%s186_s8 + $0x18] sm:$0xff] (%p33_p3), %v234_v4 }
  0x17   : > { %237 = vst [vmem:[%s186_s8 + $0x20] sm:$0xff] (%p33_p3), %v236_v5  ;;  %239 = vst [vmem:[%s186_s8 + $0x28] sm:$0xff] (%p33_p3), %v238_v6 }
  0x18 PF: > { %p1000_p5 = scmp.ge.s32.totalorder %s1378_s22, 1  ;;  %p244_p6 = scmp.lt.s32.totalorder %s1378_s22, 3 }
  0x1a   : > { %p245_p7 = pnand %p1000_p5, %p244_p6 }
  0x1b   : > { %v1299_v7 = vld [vmem:[%s1674_s1 + $0xc0] sm:$0xff] (!%p245_p7)   ;;  %v1303_v11 = vld [vmem:[%s1674_s1 + $0xc8] sm:$0xff] (!%p245_p7)   ;;  %v1307_v15 = vld [vmem:[%s1674_s1 + $0xd0] sm:$0xff] (!%p245_p7)   ;;  %s251_s15 = sand.u32 (!%p245_p7), 1, %s1370_s20   ;;  %v1380_v63 = vmov (!%p245_p7), 0.0|0.0   ;;  %vm1381_vm0 = vmmov (!%p245_p7), 0  }
  0x1c   : > { %248 = sbr.rel (%p245_p7) target bundleno = 548 (0x224), region = 74  ;;  %v1300_v8 = vld [vmem:[%s1674_s1 + $0x40] sm:$0xff] (!%p245_p7)   ;;  %1128 = vmatprep.subr.bf16.mxu0 (!%p245_p7), %v1299_v7  ;;  %v1304_v12 = vld [vmem:[%s1674_s1 + $0x48] sm:$0xff] (!%p245_p7)   ;;  %v1308_v16 = vld [vmem:[%s1674_s1 + $0x50] sm:$0xff] (!%p245_p7)   ;;  %vm841_vm1 = vcmask (!%p245_p7), 1040384   ;;  %p277_p8 = scmp.lt.s32.totalorder (!%p245_p7), %s993_s4, 1 }
  0x1d   : > { %v1301_v9 = vld [vmem:[%s1674_s1 + $0x80] sm:$0xff] (!%p245_p7)   ;;  %1150 = vmatprep.subr.bf16.mxu1 (!%p245_p7), %v1300_v8  ;;  %v1305_v13 = vld [vmem:[%s1674_s1 + $0x88] sm:$0xff] (!%p245_p7)   ;;  %v1309_v17 = vld [vmem:[%s1674_s1 + $0x90] sm:$0xff] (!%p245_p7)   ;;  %s1271_s27 = smul.u32 (!%p245_p7), 48, %s251_s15  ;;  %vm938_vm2 = vcmask (!%p245_p7), 0  }
  0x1e   : > { %v1302_v10 = vld [vmem:[%s1674_s1] sm:$0xff] (!%p245_p7)   ;;  %1129 = vmatpush3.bf16.msra.mxu0 (!%p245_p7), %v1301_v9  ;;  %v1306_v14 = vld [vmem:[%s1674_s1 + $0x8] sm:$0xff] (!%p245_p7)   ;;  %v1310_v18 = vld [vmem:[%s1674_s1 + $0x10] sm:$0xff] (!%p245_p7)  }
  0x1f   : > { %1151 = vmatpush3.bf16.msra.mxu1 (!%p245_p7), %v1302_v10  ;;  %1130 = vmatprep.subr.bf16.mxu0 (!%p245_p7), %v1303_v11  ;;  %v1311_v19 = vld [vmem:[%s1674_s1 + $0xd8] sm:$0xff] (!%p245_p7)   ;;  %v1315_v23 = vld [vmem:[%s1674_s1 + $0xe0] sm:$0xff] (!%p245_p7)   ;;  %v1319_v27 = vld [vmem:[%s1674_s1 + $0xe8] sm:$0xff] (!%p245_p7)   ;;  %s1549_s14 = scalar_lea.vmem (!%p245_p7), [#allocation3], %s1271_s27 }
  0x20   : > { %1152 = vmatprep.subr.bf16.mxu1 (!%p245_p7), %v1304_v12  ;;  %v1312_v20 = vld [vmem:[%s1674_s1 + $0x58] sm:$0xff] (!%p245_p7)   ;;  %v1316_v24 = vld [vmem:[%s1674_s1 + $0x60] sm:$0xff] (!%p245_p7)   ;;  %v1320_v28 = vld [vmem:[%s1674_s1 + $0x68] sm:$0xff] (!%p245_p7)  }
  0x21   : > { %v1313_v21 = vld [vmem:[%s1674_s1 + $0x98] sm:$0xff] (!%p245_p7)   ;;  %v1317_v25 = vld [vmem:[%s1674_s1 + $0xa0] sm:$0xff] (!%p245_p7)   ;;  %v1321_v29 = vld [vmem:[%s1674_s1 + $0xa8] sm:$0xff] (!%p245_p7)  }
  0x22   : > { %1131 = vmatpush3.bf16.msra.mxu0 (!%p245_p7), %v1305_v13  ;;  %v1314_v22 = vld [vmem:[%s1674_s1 + $0x18] sm:$0xff] (!%p245_p7)   ;;  %v1318_v26 = vld [vmem:[%s1674_s1 + $0x20] sm:$0xff] (!%p245_p7)   ;;  %v1322_v30 = vld [vmem:[%s1674_s1 + $0x28] sm:$0xff] (!%p245_p7)  }
  0x23   : > { %1153 = vmatpush3.bf16.msra.mxu1 %v1306_v14  ;;  %1132 = vmatprep.subr.bf16.mxu0 %v1307_v15  ;;  %v1323_v31 = vld [vmem:[%s1674_s1 + $0xf0] sm:$0xff]   ;;  %v1327_v35 = vld [vmem:[%s1674_s1 + $0xf8] sm:$0xff]   ;;  %v1337_v43 = vld [vmem:[%s1674_s1 + $0x140] sm:$0xff]   ;;  %s1683_s4 = smov (!%p277_p8, %s993_s4), 1 }
  0x24   : > { %1154 = vmatprep.subr.bf16.mxu1 %v1308_v16  ;;  %v1324_v32 = vld [vmem:[%s1674_s1 + $0x70] sm:$0xff]   ;;  %v1328_v36 = vld [vmem:[%s1674_s1 + $0x78] sm:$0xff]   ;;  %v1338_v44 = vld [vmem:[%s1674_s1 + $0x100] sm:$0xff]   ;;  %s279_s25 = scalar_lea.vmem %s1678_s5, %s1683_s4 }
  0x25   : > { %v1325_v33 = vld [vmem:[%s1674_s1 + $0xb0] sm:$0xff]   ;;  %v1329_v37 = vld [vmem:[%s1674_s1 + $0xb8] sm:$0xff]   ;;  %v1339_v45 = vld [vmem:[%s1674_s1 + $0x148] sm:$0xff]  }
  0x26   : > { %1133 = vmatpush3.bf16.msra.mxu0 %v1309_v17  ;;  %v1326_v34 = vld [vmem:[%s1674_s1 + $0x30] sm:$0xff]   ;;  %v1330_v38 = vld [vmem:[%s1674_s1 + $0x38] sm:$0xff]   ;;  %v1340_v46 = vld [vmem:[%s1674_s1 + $0x108] sm:$0xff]  }
  0x27   : > { %1155 = vmatpush3.bf16.msra.mxu1 %v1310_v18  ;;  %1134 = vmatprep.subr.bf16.mxu0 %v1311_v19  ;;  %v1331_v39 = vld [vmem:[%s1549_s14 + $0x10] ss:$8 sps:$4 sm:$0xff]   ;;  %v1333_v40 = vld [vmem:[%s1549_s14 + $0x14] ss:$8 sps:$4 sm:$0xff]   ;;  %v1334_v41 = vld [vmem:[%s1549_s14] ss:$8 sps:$4 sm:$0xff]  }
  0x28   : > { %1156 = vmatprep.subr.bf16.mxu1 %v1312_v20  ;;  %v1336_v42 = vld [vmem:[%s1549_s14 + $0x4] ss:$8 sps:$4 sm:$0xff]   ;;  %489 = vmatprep.mubr.bf16.mxu0 %v1333_v40  ;;  %v1353_v60 = vld [vmem:[%s1549_s14 + $0x20] ss:$8 sps:$4 sm:$0xff]   ;;  %v1382_v19 = vmov 0.0  }
  0x29   : > { %636 = vmatprep.mubr.bf16.mxu1 %v1336_v42  ;;  %v1341_v47 = vld [vmem:[%s1674_s1 + $0x150] sm:$0xff]   ;;  %v1343_v49 = vld [vmem:[%s1674_s1 + $0x158] sm:$0xff]   ;;  %v1345_v51 = vld [vmem:[%s1674_s1 + $0x160] sm:$0xff]  }
  0x2a   : > { %1135 = vmatpush3.bf16.msra.mxu0 %v1313_v21  ;;  %v1342_v48 = vld [vmem:[%s1674_s1 + $0x110] sm:$0xff]   ;;  %v1344_v50 = vld [vmem:[%s1674_s1 + $0x118] sm:$0xff]   ;;  %v1346_v52 = vld [vmem:[%s1674_s1 + $0x120] sm:$0xff]  }
  0x2b   : > { %1157 = vmatpush3.bf16.msra.mxu1 %v1314_v22  ;;  %1136 = vmatprep.subr.bf16.mxu0 %v1315_v23  ;;  %v1347_v53 = vld [vmem:[%s1674_s1 + $0x168] sm:$0xff]   ;;  %v1349_v56 = vld [vmem:[%s1674_s1 + $0x170] sm:$0xff]   ;;  %v1351_v58 = vld [vmem:[%s1674_s1 + $0x178] sm:$0xff]  }
  0x2c   : > { %1158 = vmatprep.subr.bf16.mxu1 %v1316_v24  ;;  %v1355_v54 = vld [vmem:[%s1549_s14 + $0x24] ss:$8 sps:$4 sm:$0xff]  }
  0x2d   : > { %v1348_v55 = vld [vmem:[%s1674_s1 + $0x128] sm:$0xff]   ;;  %v1350_v57 = vld [vmem:[%s1674_s1 + $0x130] sm:$0xff]   ;;  %v1352_v59 = vld [vmem:[%s1674_s1 + $0x138] sm:$0xff]  }
  0x2e   : > { %1137 = vmatpush3.bf16.msra.mxu0 %v1317_v25  ;;  %v851_v61 = vld [vmem:[%s1676_s3] sm:$0xff]  ;;  %v852_v62 = vld [vmem:[%s1676_s3 + $0x8] sm:$0xff]  ;;  %v853_v1 = vld [vmem:[%s1676_s3 + $0x10] sm:$0xff] }
  0x2f   : > { %1159 = vmatpush3.bf16.msra.mxu1 %v1318_v26  ;;  %1138 = vmatprep.subr.bf16.mxu0 %v1319_v27  ;;  %v1247_v0 = vpack.c.bf16 %v852_v62, %v851_v61  ;;  %v854_v2 = vld [vmem:[%s1676_s3 + $0x18] sm:$0xff]  ;;  %v855_v4 = vld [vmem:[%s1676_s3 + $0x20] sm:$0xff]  ;;  %v856_v5 = vld [vmem:[%s1676_s3 + $0x28] sm:$0xff] }
  0x30   : > { %1160 = vmatprep.subr.bf16.mxu1 %v1320_v28  ;;  %v1250_v3 = vpack.c.bf16 %v854_v2, %v853_v1  ;;  %v1253_v6 = vpack.c.bf16 %v856_v5, %v855_v4  ;;  %v857_v7 = vld [vmem:[%s1676_s3 + $0x30] sm:$0xff]  ;;  %v858_v8 = vld [vmem:[%s1676_s3 + $0x38] sm:$0xff]  ;;  %v859_v10 = vld [vmem:[%s1676_s3 + $0x40] sm:$0xff] }
  0x31   : > { %v1256_v9 = vpack.c.bf16 %v858_v8, %v857_v7  ;;  %v860_v11 = vld [vmem:[%s1676_s3 + $0x48] sm:$0xff]  ;;  %v861_v13 = vld [vmem:[%s1676_s3 + $0x50] sm:$0xff]  ;;  %v862_v14 = vld [vmem:[%s1676_s3 + $0x58] sm:$0xff] }
  0x32   : > { %1139 = vmatpush3.bf16.msra.mxu0 %v1321_v29  ;;  %v1259_v12 = vpack.c.bf16 %v860_v11, %v859_v10  ;;  %v1262_v15 = vpack.c.bf16 %v862_v14, %v861_v13  ;;  %v863_v16 = vld [vmem:[%s1676_s3 + $0x60] sm:$0xff]  ;;  %v864_v17 = vld [vmem:[%s1676_s3 + $0x68] sm:$0xff]  ;;  %v865_v20 = vld [vmem:[%s1676_s3 + $0x70] sm:$0xff] }
  0x33   : > { %1161 = vmatpush3.bf16.msra.mxu1 %v1322_v30  ;;  %1140 = vmatprep.subr.bf16.mxu0 %v1323_v31  ;;  %v1265_v18 = vpack.c.bf16 %v864_v17, %v863_v16  ;;  %v866_v21 = vld [vmem:[%s1676_s3 + $0x78] sm:$0xff] }
  0x34   : > { %1162 = vmatprep.subr.bf16.mxu1 %v1324_v32  ;;  %v1268_v22 = vpack.c.bf16 %v866_v21, %v865_v20 }
  0x36   : > { %1141 = vmatpush3.bf16.msra.mxu0 %v1325_v33 }
  0x37   : > { %1163 = vmatpush3.bf16.msra.mxu1 %v1326_v34  ;;  %1142 = vmatprep.subr.bf16.mxu0 %v1327_v35 }
  0x38   : > { %1164 = vmatprep.subr.bf16.mxu1 %v1328_v36 }
  0x3a   : > { %1143 = vmatpush3.bf16.msra.mxu0 %v1329_v37 }
  0x3b   : > { %1165 = vmatpush3.bf16.msra.mxu1 %v1330_v38  ;;  %1172 = vmatprep.subr.bf16.mxu0 %v1337_v43  ;;  %v1123_v43 = vld [vmem:[%s1675_s2] ss:$0 sm:$0xff] }
  0x3c   : > { %1246 = vmatprep.subr.bf16.mxu1 %v1380_v63 }
  0x3d   : > { %490 = vmatmul.mubr.bf16.vlgmr.msra.gmra.mrb[0].mxu0 %v1331_v39 }
  0x3e   : > { %637 = vmatmul.mubr.bf16.vlgmr.msra.gmra.mrb[0].mxu1 %v1334_v41  ;;  %1173 = vmatpush3.bf16.msra.mxu0 %v1338_v44 }
  0x3f   : > { %1174 = vmatprep.subr.bf16.mxu0 %v1339_v45  ;;  %819 = vmatprep.mubr.bf16.mxu0 %v1355_v54 }
  0x40   : > { %1248 = vmatpush3.bf16.msra.mxu1 %v1247_v0  ;;  %1243 = vmatprep.mubr.msk.f32.mxu1 %vm1381_vm0, %v1382_v19 }
  0x41   : > { %1249 = vmatprep.subr.bf16.mxu1 %v1380_v63 }
  0x42   : > { %1175 = vmatpush3.bf16.msra.mxu0 %v1340_v46 }
  0x43   : > { %1176 = vmatprep.subr.bf16.mxu0 %v1341_v47 }
  0x44   : > { %1251 = vmatpush3.bf16.msra.mxu1 %v1250_v3 }
  0x45   : > { %1252 = vmatprep.subr.bf16.mxu1 %v1380_v63 }
  0x46   : > { %1177 = vmatpush3.bf16.msra.mxu0 %v1342_v48 }
  0x47   : > { %1178 = vmatprep.subr.bf16.mxu0 %v1343_v49 }
  0x48   : > { %1254 = vmatpush3.bf16.msra.mxu1 %v1253_v6 }
  0x49   : > { %1255 = vmatprep.subr.bf16.mxu1 %v1380_v63 }
  0x4a   : > { %1179 = vmatpush3.bf16.msra.mxu0 %v1344_v50 }
  0x4b   : > { %1180 = vmatprep.subr.bf16.mxu0 %v1345_v51 }
  0x4c   : > { %1257 = vmatpush3.bf16.msra.mxu1 %v1256_v9 }
  0x4d   : > { %1258 = vmatprep.subr.bf16.mxu1 %v1380_v63 }
  0x4e   : > { %1181 = vmatpush3.bf16.msra.mxu0 %v1346_v52 }
  0x4f   : > { %1182 = vmatprep.subr.bf16.mxu0 %v1347_v53 }
  0x50   : > { %1260 = vmatpush3.bf16.msra.mxu1 %v1259_v12 }
  0x51   : > { %1261 = vmatprep.subr.bf16.mxu1 %v1380_v63 }
  0x52   : > { %1183 = vmatpush3.bf16.msra.mxu0 %v1348_v55 }
  0x53   : > { %1184 = vmatprep.subr.bf16.mxu0 %v1349_v56 }
  0x54   : > { %1263 = vmatpush3.bf16.msra.mxu1 %v1262_v15 }
  0x55   : > { %1264 = vmatprep.subr.bf16.mxu1 %v1380_v63 }
  0x56   : > { %1185 = vmatpush3.bf16.msra.mxu0 %v1350_v57 }
  0x57   : > { %1186 = vmatprep.subr.bf16.mxu0 %v1351_v58 }
  0x58   : > { %1266 = vmatpush3.bf16.msra.mxu1 %v1265_v18 }
  0x59   : > { %1267 = vmatprep.subr.bf16.mxu1 %v1380_v63 }
  0x5a   : > { %1187 = vmatpush3.bf16.msra.mxu0 %v1352_v59  ;;  %v867_v59 = vld [vmem:[#allocation2] sm:$0x1] }
  0x5c   : > { %1269 = vmatpush3.bf16.msra.mxu1 %v1268_v22 }
  0x5d   : > { %820 = vmatmul.mubr.bf16.vlgmr.msra.gmra.mrb[4].mxu0 %v1353_v60 }
 0x110   : > { %v1144_v23 = vpop.f32.mrb[0].mxu0 }
 0x111   : > { %v1166_v24 = vpop.f32.mrb[0].mxu1  ;;  %v1145_v25 = vpop.f32.mrb[1].mxu0 }
 0x112   : > { %v1146_v26 = vadd.f32 %v1145_v25, %v1144_v23  ;;  %v1167_v27 = vpop.f32.mrb[1].mxu1  ;;  %v1147_v28 = vpop.f32.mrb[2].mxu0 }
 0x113   : > { %v1168_v29 = vadd.f32 %v1167_v27, %v1166_v24  ;;  %v1169_v30 = vpop.f32.mrb[2].mxu1  ;;  %v1148_v31 = vpop.f32.mrb[3].mxu0 }
 0x114   : > { %v1149_v32 = vadd.f32 %v1148_v31, %v1147_v28  ;;  %v1170_v33 = vpop.f32.mrb[3].mxu1 }
 0x115   : > { %v639_v34 = vadd.f32 %v1168_v29, %v1146_v26  ;;  %v1171_v35 = vadd.f32 %v1170_v33, %v1169_v30 }
 0x117   : > { %v642_v36 = vadd.f32 %v1171_v35, %v1149_v32 }
 0x130   : > { %v1188_v37 = vpop.f32.mrb[4].mxu0 }
 0x131   : > { %v1189_v38 = vpop.f32.mrb[5].mxu0 }
 0x132   : > { %v1190_v39 = vadd.f32 %v1189_v38, %v1188_v37  ;;  %v1191_v40 = vpop.f32.mrb[6].mxu0 }
 0x133   : > { %v1192_v41 = vpop.f32.mrb[7].mxu0 }
 0x134   : > { %v828_v42 = vadd.f32 %v1190_v39, %v639_v34  ;;  %v1193_v44 = vadd.f32 %v1192_v41, %v1191_v40 }
 0x136   : > { %v829_v45 = vadd.f32 %v1193_v44, %v642_v36  ;;  %v837_v46 = vadd.f32 %v1123_v43, %v828_v42 }
 0x138   : > { %v838_v47 = vadd.f32 %v1123_v43, %v829_v45  ;;  %v839_v49 = vmax.f32 %v837_v46, 0.0 }
 0x13a   : > { %v840_v48 = vmax.f32 %v838_v47, 0.0 }
 0x13c   : > { %v842_v50 = vsel %vm841_vm1, %v840_v48, 0.0 }
 0x13d   : > { %v843_v51 = vadd.f32 %v842_v50, %v839_v49 }
 0x13f   : > { %v844_v52 = vrot.slane %v843_v51, 4 }
 0x141   : > { %v845_v53 = vadd.f32 %v844_v52, %v843_v51 }
 0x143   : > { %v846_v54 = vrot.slane %v845_v53, 2 }
 0x145   : > { %v847_v55 = vadd.f32 %v846_v54, %v845_v53 }
 0x147   : > { %v848_v56 = vrot.slane %v847_v55, 1 }
 0x149   : > { %v849_v57 = vadd.f32 %v848_v56, %v847_v55 }
 0x14b   : > { %v850_v58 = vmul.f32 0.11111111, %v849_v57 }
 0x14d   : > { %1244 = vmatmul.mubr.f32.vlgmr.msra.gmra.mrb[4].mxu1 %v850_v58 }
 0x220   : > { %v934_v60 = vpop.f32.mrb[4].mxu1 }
 0x221   : > { %v935_v61 = vadd.f32 %v934_v60, %v867_v59  ;;  %v1245_v62 = vpop.f32.mrb[5].mxu1 }
 0x223   : > { %939 = vst.msk [vmem:[%s279_s25] sm:$0x1] %vm938_vm2, %v935_v61 }
 0x224 PF: > { %p14_p9 = scmp.ge.s32.totalorder %s1433_s23, 4   ;;  %s1679_s20 = smov %s1374_s21 }
 0x225   : > { %s1680_s21 = smov %s1442_s26  ;;  %s1681_s22 = smov %s1433_s23 }
 0x226   :  { %16 = sbr.rel (!%p14_p9) target bundleno = 5 (0x5), region = 117 }

</bundles_post_ra>
